<compile_context>
chip_gen: v7x
topology: tpu7x:2x2x1
jax: 0.10.0
libtpu: 0.0.40
codegen_flags: <defaults>
</compile_context>

<pallas_src>
import jax
import jax.numpy as jnp
from jax.experimental import pallas as pl
from jax.experimental.pallas import tpu as pltpu

EPS = 1e-5
MIN_LOG_STD, MAX_LOG_STD = -20.0, 2.0
BF16 = jnp.bfloat16


def _round_up(n, m):
    return ((n + m - 1) // m) * m


# ----------------------------------------------------- BatchNorm1d statistics
def _bn_stats_kernel(x_ref, g_ref, b_ref, scale_ref, shift_ref):
    x = x_ref[...]
    inv_n = 1.0 / x.shape[0]
    mean = jnp.sum(x, axis=0, keepdims=True) * inv_n
    var = jnp.sum((x - mean) ** 2, axis=0, keepdims=True) * inv_n  # biased (PyTorch BN)
    scale = g_ref[...] * jax.lax.rsqrt(var + EPS)
    scale_ref[...] = scale
    shift_ref[...] = b_ref[...] - mean * scale


def bn_scale_shift(x2d, gamma, beta):
    """Fold training-mode BN batch stats into per-channel scale/shift.

    Operates on the raw (B*L, state_dim) input only (a handful of lanes), so a
    single un-gridded pass is cheap; the scale/shift are applied inside the
    fused network kernel so no normalized copy of the input hits HBM.
    """
    n, c = x2d.shape
    return pl.pallas_call(
        _bn_stats_kernel,
        out_shape=(jax.ShapeDtypeStruct((1, c), jnp.float32),
                   jax.ShapeDtypeStruct((1, c), jnp.float32)),
    )(x2d.astype(jnp.float32),
      gamma.reshape(1, c).astype(jnp.float32),
      beta.reshape(1, c).astype(jnp.float32))


def _pick_batch_tile(B, L):
    # Target ~256 rows per MXU matmul (M = TB * L) while TB divides B.
    target = max(1, 256 // max(L, 1))
    tb = min(B, target)
    while B % tb:
        tb -= 1
    return max(tb, 1)


# ------------------------------------------------------ fused Actor forward
def actor_forward(params, x_ncl):
    B, C, L = x_ncl.shape
    x_cl = jnp.transpose(x_ncl, (0, 2, 1)).astype(jnp.float32)   # (B, L, C)

    # 1) tiny BN-statistics pass on the raw input.
    scale, shift = bn_scale_shift(x_cl.reshape(B * L, C),
                                  params["bn_gamma"], params["bn_beta"])

    # 2) fully fused TCN + MLP head, gridded over batch tiles.
    blocks = params["blocks"]
    n_blocks = len(blocks)
    K = blocks[0]["w1"].shape[0]
    chans = [blk["w1"].shape[2] for blk in blocks]
    cins = [C] + chans[:-1]
    dils = [2 ** i for i in range(n_blocks)]
    pads = [(K - 1) * d for d in dils]           # causal left pad per conv
    pads8 = [_round_up(p, 8) for p in pads]      # sublane-aligned pad region
    has_ds = ["wd" in blk for blk in blocks]

    TB = _pick_batch_tile(B, L)
    rows = TB * L
    grid = (B // TB,)

    args = [x_cl, scale, shift]
    in_specs = [
        pl.BlockSpec((TB, L, C), lambda i: (i, 0, 0)),
        pl.BlockSpec((1, C), lambda i: (0, 0)),
        pl.BlockSpec((1, C), lambda i: (0, 0)),
    ]

    def add_const(a):
        args.append(a)
        in_specs.append(pl.BlockSpec(a.shape, lambda i, n=a.ndim: (0,) * n))

    # Conv/FC weights as bf16 (bf16-native MXU path, half the weight bytes);
    # biases & BN scale/shift stay f32.
    for i, blk in enumerate(blocks):
        add_const(blk["w1"].astype(BF16))                                # (K, cin, cout)
        add_const(blk["b1"].reshape(1, -1).astype(jnp.float32))
        add_const(blk["w2"].astype(BF16))                                # (K, cout, cout)
        add_const(blk["b2"].reshape(1, -1).astype(jnp.float32))
        if has_ds[i]:
            add_const(blk["wd"].reshape(cins[i], chans[i]).astype(BF16))
            add_const(blk["bd"].reshape(1, -1).astype(jnp.float32))
    add_const(params["w1"].astype(BF16))
    add_const(params["b1"].reshape(1, -1).astype(jnp.float32))
    add_const(params["w2"].astype(BF16))
    add_const(params["b2"].reshape(1, -1).astype(jnp.float32))
    # mu / log_std heads fused: one (hidden, 2) matmul, one output slab.
    add_const(jnp.concatenate([params["wmu"], params["wls"]], axis=1).astype(BF16))
    add_const(jnp.concatenate([params["bmu"], params["bls"]]).reshape(1, 2)
              .astype(jnp.float32))

    # Per-block zero-left-padded activation buffers in VMEM (no HBM jnp.pad).
    scratch = []
    for i in range(n_blocks):
        scratch.append(pltpu.VMEM((TB, pads8[i] + L, cins[i]), jnp.float32))
        scratch.append(pltpu.VMEM((TB, pads8[i] + L, chans[i]), jnp.float32))

    def kernel(*refs):
        it = iter(refs)
        x_ref, sc_ref, sh_ref = next(it), next(it), next(it)
        blk_refs = []
        for i in range(n_blocks):
            w1, b1, w2, b2 = next(it), next(it), next(it), next(it)
            wd = next(it) if has_ds[i] else None
            bd = next(it) if has_ds[i] else None
            blk_refs.append((w1, b1, w2, b2, wd, bd))
        w_fc1, b_fc1, w_fc2, b_fc2, w_hd, b_hd = (next(it) for _ in range(6))
        out_ref = next(it)
        pad_bufs = [(next(it), next(it)) for _ in range(n_blocks)]

        def mm(a_f32, w_bf16):  # MXU: bf16 operands, f32 accumulation
            return jnp.dot(a_f32.astype(BF16), w_bf16,
                           preferred_element_type=jnp.float32)

        def dconv(p_ref, w_ref, b_ref, dil, base, cin, cout):
            # Dilated causal conv = K shifted (rows, cin) x (cin, cout) matmuls
            # over the zero-left-padded VMEM buffer (static tap offsets).
            # NOTE: block0 conv1 (cin = state_dim) could be im2col'd into one
            # (rows, K*cin) matmul as a further micro-opt.
            acc = jnp.zeros((rows, cout), jnp.float32)
            for k in range(K):
                tap = p_ref[:, pl.ds(base + k * dil, L), :].reshape(rows, cin)
                acc = acc + mm(tap, w_ref[k])
            return acc + b_ref[...]

        def to_padded(p_ref, val_2d, pad8, cin):
            # zero the aligned pad region, then place the activation behind it
            if pad8:
                p_ref[:, pl.ds(0, pad8), :] = jnp.zeros((TB, pad8, cin), jnp.float32)
            p_ref[:, pl.ds(pad8, L), :] = val_2d.reshape(TB, L, cin)

        # BatchNorm1d apply (training-mode stats), f32 elementwise.
        cur = x_ref[...].reshape(rows, C) * sc_ref[...] + sh_ref[...]

        # TemporalConvNet
        for i in range(n_blocks):
            w1, b1, w2, b2, wd, bd = blk_refs[i]
            p_in, p_mid = pad_bufs[i]
            dil, pad8, base = dils[i], pads8[i], pads8[i] - pads[i]
            cin, cout = cins[i], chans[i]

            to_padded(p_in, cur, pad8, cin)
            h = jnp.maximum(dconv(p_in, w1, b1, dil, base, cin, cout), 0.0)

            to_padded(p_mid, h, pad8, cout)
            h2 = jnp.maximum(dconv(p_mid, w2, b2, dil, base, cout, cout), 0.0)

            res = mm(cur, wd[...]) + bd[...] if wd is not None else cur
            cur = jnp.maximum(h2 + res, 0.0)                     # (rows, cout)

        # fc1 -> fc2 -> fused [mu | log_std] head.
        f = jnp.maximum(mm(cur, w_fc1[...]) + b_fc1[...], 0.0)
        f = jnp.maximum(mm(f, w_fc2[...]) + b_fc2[...], 0.0)
        raw = mm(f, w_hd[...]) + b_hd[...]                       # (rows, 2)
        ls = jnp.clip(jnp.maximum(raw, 0.0), MIN_LOG_STD, MAX_LOG_STD)
        col = jax.lax.broadcasted_iota(jnp.int32, raw.shape, 1)
        out = jnp.where(col == 0, raw, ls)                       # col0=mu, col1=log_std
        out_ref[...] = out.reshape(TB, L, 2).astype(out_ref.dtype)

    out = pl.pallas_call(
        kernel,
        grid=grid,
        in_specs=in_specs,
        out_specs=pl.BlockSpec((TB, L, 2), lambda i: (i, 0, 0)),
        out_shape=jax.ShapeDtypeStruct((B, L, 2), jnp.float32),
        scratch_shapes=scratch,
        compiler_params=pltpu.CompilerParams(
            dimension_semantics=("parallel",),        # batch tiles -> megacore
            vmem_limit_bytes=32 * 1024 * 1024),       # actual footprint ~6 MiB
    )(*args)

    return out[..., 0:1], out[..., 1:2]


# ------------------------------------------------------------- parameter init
def init_params(state_dim, num_channels=(256, 256), kernel_size=7, key=None):
    keys = iter(jax.random.split(key, 32))

    def conv_w(K, cin, cout):
        # weight_norm folded: materialize the effective weight directly.
        return jax.random.normal(next(keys), (K, cin, cout), jnp.float32) * ((K * cin) ** -0.5)

    def lin_w(cin, cout):
        return jax.random.normal(next(keys), (cin, cout), jnp.float32) * (cin ** -0.5)

    def bias(c):
        return jax.random.normal(next(keys), (c,), jnp.float32) * 0.01

    blocks = []
    cin = state_dim
    for cout in num_channels:
        blk = dict(w1=conv_w(kernel_size, cin, cout), b1=bias(cout),
                   w2=conv_w(kernel_size, cout, cout), b2=bias(cout))
        if cin != cout:
            blk["wd"] = conv_w(1, cin, cout)
            blk["bd"] = bias(cout)
        blocks.append(blk)
        cin = cout

    return dict(
        bn_gamma=jnp.ones((state_dim,), jnp.float32),
        bn_beta=jnp.zeros((state_dim,), jnp.float32),
        blocks=blocks,
        w1=lin_w(cin, 256), b1=bias(256),
        w2=lin_w(256, 256), b2=bias(256),
        wmu=lin_w(256, 1), bmu=bias(1),
        wls=lin_w(256, 1), bls=bias(1),
    )


# ------------------------------------------------------- pure-JAX reference
def ref_forward(params, x_ncl):
    x = jnp.transpose(x_ncl, (0, 2, 1)).astype(jnp.float32)
    mean = jnp.mean(x, axis=(0, 1), keepdims=True)
    var = jnp.mean((x - mean) ** 2, axis=(0, 1), keepdims=True)
    x = (x - mean) * jax.lax.rsqrt(var + EPS) * params["bn_gamma"] + params["bn_beta"]

    def conv(x, w, b, dil):
        K = w.shape[0]
        pad = (K - 1) * dil
        L = x.shape[1]
        xp = jnp.pad(x, ((0, 0), (pad, 0), (0, 0)))
        out = jnp.zeros(x.shape[:2] + (w.shape[2],), jnp.float32)
        for k in range(K):
            out = out + jnp.einsum("blc,cd->bld", xp[:, k * dil:k * dil + L, :], w[k])
        return out + b

    for i, blk in enumerate(params["blocks"]):
        dil = 2 ** i
        h = jax.nn.relu(conv(x, blk["w1"], blk["b1"], dil))
        h2 = jax.nn.relu(conv(h, blk["w2"], blk["b2"], dil))
        res = conv(x, blk["wd"], blk["bd"], 1) if "wd" in blk else x
        x = jax.nn.relu(h2 + res)

    h = jax.nn.relu(x @ params["w1"] + params["b1"])
    h = jax.nn.relu(h @ params["w2"] + params["b2"])
    mu = h @ params["wmu"] + params["bmu"]
    ls = jnp.clip(jax.nn.relu(h @ params["wls"] + params["bls"]),
                  MIN_LOG_STD, MAX_LOG_STD)
    return mu, ls


if __name__ == "__main__":
    B, STATE_DIM, SEQ = 2, 4, 8   # small shapes consistent with (N, state_dim, L) input
    key = jax.random.PRNGKey(0)
    kx, kp = jax.random.split(key)
    x = jax.random.normal(kx, (B, STATE_DIM, SEQ), jnp.float32)  # PyTorch NCL layout

    params = init_params(STATE_DIM, key=kp)

    mu, log_std = jax.jit(actor_forward)(params, x)
    jax.block_until_ready((mu, log_std))

    mu_ref, ls_ref = ref_forward(params, x)
    assert mu.shape == (B, SEQ, 1) and log_std.shape == (B, SEQ, 1)
    # Kernel matmuls use bf16 MXU operands (f32 accumulation); compare against
    # the f32 reference with a matching tolerance.
    assert jnp.allclose(mu, mu_ref, atol=5e-2, rtol=5e-2)
    assert jnp.allclose(log_std, ls_ref, atol=5e-2, rtol=5e-2)
    print("KERNEL_OK")
</pallas_src>

<mosaic_0001>
module attributes {stable_mosaic.version = 11 : i64} {
  func.func @_bn_stats_kernel(%arg0: memref<16x4xf32, #tpu.memory_space<vmem>>, %arg1: memref<1x4xf32, #tpu.memory_space<vmem>>, %arg2: memref<1x4xf32, #tpu.memory_space<vmem>>, %arg3: memref<1x4xf32, #tpu.memory_space<vmem>>, %arg4: memref<1x4xf32, #tpu.memory_space<vmem>>) attributes {dimension_semantics = [], scalar_prefetch = 0 : i64, scratch_operands = 0 : i64, tpu.core_type = #tpu.core_type<tc>} {
    %c0 = arith.constant 0 : index
    %c0_0 = arith.constant 0 : index
    %0 = vector.load %arg0[%c0, %c0_0] : memref<16x4xf32, #tpu.memory_space<vmem>>, vector<16x4xf32>
    %cst = arith.constant dense<0.000000e+00> : vector<4xf32>
    %1 = vector.multi_reduction <add>, %0, %cst [0] : vector<16x4xf32> to vector<4xf32>
    %2 = vector.shape_cast %1 : vector<4xf32> to vector<1x4xf32>
    %cst_1 = arith.constant 6.250000e-02 : f32
    %3 = vector.broadcast %cst_1 : f32 to vector<1x4xf32>
    %4 = arith.mulf %2, %3 : vector<1x4xf32>
    %5 = vector.broadcast %4 : vector<1x4xf32> to vector<16x4xf32>
    %6 = arith.subf %0, %5 : vector<16x4xf32>
    %7 = arith.mulf %6, %6 : vector<16x4xf32>
    %cst_2 = arith.constant dense<0.000000e+00> : vector<4xf32>
    %8 = vector.multi_reduction <add>, %7, %cst_2 [0] : vector<16x4xf32> to vector<4xf32>
    %9 = vector.shape_cast %8 : vector<4xf32> to vector<1x4xf32>
    %cst_3 = arith.constant 6.250000e-02 : f32
    %10 = vector.broadcast %cst_3 : f32 to vector<1x4xf32>
    %11 = arith.mulf %9, %10 : vector<1x4xf32>
    %c0_4 = arith.constant 0 : index
    %c0_5 = arith.constant 0 : index
    %12 = vector.load %arg1[%c0_4, %c0_5] : memref<1x4xf32, #tpu.memory_space<vmem>>, vector<1x4xf32>
    %cst_6 = arith.constant 9.99999974E-6 : f32
    %13 = vector.broadcast %cst_6 : f32 to vector<1x4xf32>
    %14 = arith.addf %11, %13 : vector<1x4xf32>
    %15 = math.rsqrt %14 : vector<1x4xf32>
    %16 = arith.mulf %12, %15 : vector<1x4xf32>
    %c0_7 = arith.constant 0 : index
    %c0_8 = arith.constant 0 : index
    %17 = vector.load %arg3[%c0_7, %c0_8] : memref<1x4xf32, #tpu.memory_space<vmem>>, vector<1x4xf32>
    tpu.vector_store %arg3[%c0_7, %c0_8], %16 {strides = array<i32>} : memref<1x4xf32, #tpu.memory_space<vmem>>, vector<1x4xf32>,
    %c0_9 = arith.constant 0 : index
    %c0_10 = arith.constant 0 : index
    %18 = vector.load %arg2[%c0_9, %c0_10] : memref<1x4xf32, #tpu.memory_space<vmem>>, vector<1x4xf32>
    %19 = arith.mulf %4, %16 : vector<1x4xf32>
    %20 = arith.subf %18, %19 : vector<1x4xf32>
    %c0_11 = arith.constant 0 : index
    %c0_12 = arith.constant 0 : index
    %21 = vector.load %arg4[%c0_11, %c0_12] : memref<1x4xf32, #tpu.memory_space<vmem>>, vector<1x4xf32>
    tpu.vector_store %arg4[%c0_11, %c0_12], %20 {strides = array<i32>} : memref<1x4xf32, #tpu.memory_space<vmem>>, vector<1x4xf32>,
    return
  }
}

module attributes {stable_mosaic.version = 11 : i64} {
  func.func @kernel(%arg0: i32, %arg1: memref<2x8x4xf32, #tpu.memory_space<vmem>>, %arg2: memref<1x4xf32, #tpu.memory_space<vmem>>, %arg3: memref<1x4xf32, #tpu.memory_space<vmem>>, %arg4: memref<7x4x256xbf16, #tpu.memory_space<vmem>>, %arg5: memref<1x256xf32, #tpu.memory_space<vmem>>, %arg6: memref<7x256x256xbf16, #tpu.memory_space<vmem>>, %arg7: memref<1x256xf32, #tpu.memory_space<vmem>>, %arg8: memref<4x256xbf16, #tpu.memory_space<vmem>>, %arg9: memref<1x256xf32, #tpu.memory_space<vmem>>, %arg10: memref<7x256x256xbf16, #tpu.memory_space<vmem>>, %arg11: memref<1x256xf32, #tpu.memory_space<vmem>>, %arg12: memref<7x256x256xbf16, #tpu.memory_space<vmem>>, %arg13: memref<1x256xf32, #tpu.memory_space<vmem>>, %arg14: memref<256x256xbf16, #tpu.memory_space<vmem>>, %arg15: memref<1x256xf32, #tpu.memory_space<vmem>>, %arg16: memref<256x256xbf16, #tpu.memory_space<vmem>>, %arg17: memref<1x256xf32, #tpu.memory_space<vmem>>, %arg18: memref<256x2xbf16, #tpu.memory_space<vmem>>, %arg19: memref<1x2xf32, #tpu.memory_space<vmem>>, %arg20: memref<2x8x2xf32, #tpu.memory_space<vmem>>, %arg21: memref<2x16x4xf32, #tpu.memory_space<vmem>>, %arg22: memref<2x16x256xf32, #tpu.memory_space<vmem>>, %arg23: memref<2x24x256xf32, #tpu.memory_space<vmem>>, %arg24: memref<2x24x256xf32, #tpu.memory_space<vmem>>) attributes {dimension_semantics = [#tpu.dimension_semantics<parallel>], iteration_bounds = array<i64: 1>, scalar_prefetch = 0 : i64, scratch_operands = 4 : i64, tpu.core_type = #tpu.core_type<tc>, window_params = [{transform_indices = @transform_0, window_bounds = array<i64: 2, 8, 4>}, {pipeline_mode = #tpu.pipeline_mode<synchronous>, transform_indices = @transform_1, window_bounds = array<i64: 1, 4>}, {pipeline_mode = #tpu.pipeline_mode<synchronous>, transform_indices = @transform_2, window_bounds = array<i64: 1, 4>}, {pipeline_mode = #tpu.pipeline_mode<synchronous>, transform_indices = @transform_3, window_bounds = array<i64: 7, 4, 256>}, {pipeline_mode = #tpu.pipeline_mode<synchronous>, transform_indices = @transform_4, window_bounds = array<i64: 1, 256>}, {pipeline_mode = #tpu.pipeline_mode<synchronous>, transform_indices = @transform_5, window_bounds = array<i64: 7, 256, 256>}, {pipeline_mode = #tpu.pipeline_mode<synchronous>, transform_indices = @transform_6, window_bounds = array<i64: 1, 256>}, {pipeline_mode = #tpu.pipeline_mode<synchronous>, transform_indices = @transform_7, window_bounds = array<i64: 4, 256>}, {pipeline_mode = #tpu.pipeline_mode<synchronous>, transform_indices = @transform_8, window_bounds = array<i64: 1, 256>}, {pipeline_mode = #tpu.pipeline_mode<synchronous>, transform_indices = @transform_9, window_bounds = array<i64: 7, 256, 256>}, {pipeline_mode = #tpu.pipeline_mode<synchronous>, transform_indices = @transform_10, window_bounds = array<i64: 1, 256>}, {pipeline_mode = #tpu.pipeline_mode<synchronous>, transform_indices = @transform_11, window_bounds = array<i64: 7, 256, 256>}, {pipeline_mode = #tpu.pipeline_mode<synchronous>, transform_indices = @transform_12, window_bounds = array<i64: 1, 256>}, {pipeline_mode = #tpu.pipeline_mode<synchronous>, transform_indices = @transform_13, window_bounds = array<i64: 256, 256>}, {pipeline_mode = #tpu.pipeline_mode<synchronous>, transform_indices = @transform_14, window_bounds = array<i64: 1, 256>}, {pipeline_mode = #tpu.pipeline_mode<synchronous>, transform_indices = @transform_15, window_bounds = array<i64: 256, 256>}, {pipeline_mode = #tpu.pipeline_mode<synchronous>, transform_indices = @transform_16, window_bounds = array<i64: 1, 256>}, {pipeline_mode = #tpu.pipeline_mode<synchronous>, transform_indices = @transform_17, window_bounds = array<i64: 256, 2>}, {pipeline_mode = #tpu.pipeline_mode<synchronous>, transform_indices = @transform_18, window_bounds = array<i64: 1, 2>}, {transform_indices = @transform_19, window_bounds = array<i64: 2, 8, 2>}]} {
    %c0 = arith.constant 0 : index
    %c0_0 = arith.constant 0 : index
    %c0_1 = arith.constant 0 : index
    %0 = vector.load %arg1[%c0, %c0_0, %c0_1] : memref<2x8x4xf32, #tpu.memory_space<vmem>>, vector<2x8x4xf32>
    %1 = vector.shape_cast %0 : vector<2x8x4xf32> to vector<16x4xf32>
    %c0_2 = arith.constant 0 : index
    %c0_3 = arith.constant 0 : index
    %2 = vector.load %arg2[%c0_2, %c0_3] : memref<1x4xf32, #tpu.memory_space<vmem>>, vector<1x4xf32>
    %3 = vector.broadcast %2 : vector<1x4xf32> to vector<16x4xf32>
    %4 = arith.mulf %1, %3 : vector<16x4xf32>
    %c0_4 = arith.constant 0 : index
    %c0_5 = arith.constant 0 : index
    %5 = vector.load %arg3[%c0_4, %c0_5] : memref<1x4xf32, #tpu.memory_space<vmem>>, vector<1x4xf32>
    %6 = vector.broadcast %5 : vector<1x4xf32> to vector<16x4xf32>
    %7 = arith.addf %4, %6 : vector<16x4xf32>
    %cst = arith.constant 0.000000e+00 : f32
    %8 = vector.broadcast %cst : f32 to vector<2x8x4xf32>
    %c0_6 = arith.constant 0 : index
    %c0_7 = arith.constant 0 : index
    %c0_8 = arith.constant 0 : index
    %9 = vector.load %arg21[%c0_6, %c0_7, %c0_8] : memref<2x16x4xf32, #tpu.memory_space<vmem>>, vector<2x8x4xf32>
    tpu.vector_store %arg21[%c0_6, %c0_7, %c0_8], %8 {strides = array<i32>} : memref<2x16x4xf32, #tpu.memory_space<vmem>>, vector<2x8x4xf32>,
    %10 = vector.shape_cast %7 : vector<16x4xf32> to vector<2x8x4xf32>
    %c0_9 = arith.constant 0 : index
    %c8 = arith.constant 8 : index
    %c0_10 = arith.constant 0 : index
    %11 = vector.load %arg21[%c0_9, %c8, %c0_10] : memref<2x16x4xf32, #tpu.memory_space<vmem>>, vector<2x8x4xf32>
    tpu.vector_store %arg21[%c0_9, %c8, %c0_10], %10 {strides = array<i32>} : memref<2x16x4xf32, #tpu.memory_space<vmem>>, vector<2x8x4xf32>,
    %cst_11 = arith.constant 0.000000e+00 : f32
    %12 = vector.broadcast %cst_11 : f32 to vector<16x256xf32>
    %c0_12 = arith.constant 0 : index
    %c2 = arith.constant 2 : index
    %c0_13 = arith.constant 0 : index
    %13 = vector.load %arg21[%c0_12, %c2, %c0_13] : memref<2x16x4xf32, #tpu.memory_space<vmem>>, vector<2x8x4xf32>
    %14 = vector.shape_cast %13 : vector<2x8x4xf32> to vector<16x4xf32>
    %c0_14 = arith.constant 0 : index
    %c0_15 = arith.constant 0 : index
    %c0_16 = arith.constant 0 : index
    %15 = vector.load %arg4[%c0_14, %c0_15, %c0_16] : memref<7x4x256xbf16, #tpu.memory_space<vmem>>, vector<1x4x256xbf16>
    %16 = vector.shape_cast %15 : vector<1x4x256xbf16> to vector<4x256xbf16>
    %17 = arith.truncf %14 : vector<16x4xf32> to vector<16x4xbf16>
    %cst_17 = arith.constant dense<0.000000e+00> : vector<16x256xf32>
    %18 = tpu.matmul %17, %16, %cst_17 {dimension_numbers = #tpu.dot_dimension_numbers<[1], [0], [0], [1], [0, 0, 1, 1], [], []>} : vector<16x4xbf16>, vector<4x256xbf16>, vector<16x256xf32> -> vector<16x256xf32>
    %19 = arith.addf %12, %18 : vector<16x256xf32>
    %c0_18 = arith.constant 0 : index
    %c3 = arith.constant 3 : index
    %c0_19 = arith.constant 0 : index
    %20 = vector.load %arg21[%c0_18, %c3, %c0_19] : memref<2x16x4xf32, #tpu.memory_space<vmem>>, vector<2x8x4xf32>
    %21 = vector.shape_cast %20 : vector<2x8x4xf32> to vector<16x4xf32>
    %c1 = arith.constant 1 : index
    %c0_20 = arith.constant 0 : index
    %c0_21 = arith.constant 0 : index
    %22 = vector.load %arg4[%c1, %c0_20, %c0_21] : memref<7x4x256xbf16, #tpu.memory_space<vmem>>, vector<1x4x256xbf16>
    %23 = vector.shape_cast %22 : vector<1x4x256xbf16> to vector<4x256xbf16>
    %24 = arith.truncf %21 : vector<16x4xf32> to vector<16x4xbf16>
    %cst_22 = arith.constant dense<0.000000e+00> : vector<16x256xf32>
    %25 = tpu.matmul %24, %23, %cst_22 {dimension_numbers = #tpu.dot_dimension_numbers<[1], [0], [0], [1], [0, 0, 1, 1], [], []>} : vector<16x4xbf16>, vector<4x256xbf16>, vector<16x256xf32> -> vector<16x256xf32>
    %26 = arith.addf %19, %25 : vector<16x256xf32>
    %c0_23 = arith.constant 0 : index
    %c4 = arith.constant 4 : index
    %c0_24 = arith.constant 0 : index
    %27 = vector.load %arg21[%c0_23, %c4, %c0_24] : memref<2x16x4xf32, #tpu.memory_space<vmem>>, vector<2x8x4xf32>
    %28 = vector.shape_cast %27 : vector<2x8x4xf32> to vector<16x4xf32>
    %c2_25 = arith.constant 2 : index
    %c0_26 = arith.constant 0 : index
    %c0_27 = arith.constant 0 : index
    %29 = vector.load %arg4[%c2_25, %c0_26, %c0_27] : memref<7x4x256xbf16, #tpu.memory_space<vmem>>, vector<1x4x256xbf16>
    %30 = vector.shape_cast %29 : vector<1x4x256xbf16> to vector<4x256xbf16>
    %31 = arith.truncf %28 : vector<16x4xf32> to vector<16x4xbf16>
    %cst_28 = arith.constant dense<0.000000e+00> : vector<16x256xf32>
    %32 = tpu.matmul %31, %30, %cst_28 {dimension_numbers = #tpu.dot_dimension_numbers<[1], [0], [0], [1], [0, 0, 1, 1], [], []>} : vector<16x4xbf16>, vector<4x256xbf16>, vector<16x256xf32> -> vector<16x256xf32>
    %33 = arith.addf %26, %32 : vector<16x256xf32>
    %c0_29 = arith.constant 0 : index
    %c5 = arith.constant 5 : index
    %c0_30 = arith.constant 0 : index
    %34 = vector.load %arg21[%c0_29, %c5, %c0_30] : memref<2x16x4xf32, #tpu.memory_space<vmem>>, vector<2x8x4xf32>
    %35 = vector.shape_cast %34 : vector<2x8x4xf32> to vector<16x4xf32>
    %c3_31 = arith.constant 3 : index
    %c0_32 = arith.constant 0 : index
    %c0_33 = arith.constant 0 : index
    %36 = vector.load %arg4[%c3_31, %c0_32, %c0_33] : memref<7x4x256xbf16, #tpu.memory_space<vmem>>, vector<1x4x256xbf16>
    %37 = vector.shape_cast %36 : vector<1x4x256xbf16> to vector<4x256xbf16>
    %38 = arith.truncf %35 : vector<16x4xf32> to vector<16x4xbf16>
    %cst_34 = arith.constant dense<0.000000e+00> : vector<16x256xf32>
    %39 = tpu.matmul %38, %37, %cst_34 {dimension_numbers = #tpu.dot_dimension_numbers<[1], [0], [0], [1], [0, 0, 1, 1], [], []>} : vector<16x4xbf16>, vector<4x256xbf16>, vector<16x256xf32> -> vector<16x256xf32>
    %40 = arith.addf %33, %39 : vector<16x256xf32>
    %c0_35 = arith.constant 0 : index
    %c6 = arith.constant 6 : index
    %c0_36 = arith.constant 0 : index
    %41 = vector.load %arg21[%c0_35, %c6, %c0_36] : memref<2x16x4xf32, #tpu.memory_space<vmem>>, vector<2x8x4xf32>
    %42 = vector.shape_cast %41 : vector<2x8x4xf32> to vector<16x4xf32>
    %c4_37 = arith.constant 4 : index
    %c0_38 = arith.constant 0 : index
    %c0_39 = arith.constant 0 : index
    %43 = vector.load %arg4[%c4_37, %c0_38, %c0_39] : memref<7x4x256xbf16, #tpu.memory_space<vmem>>, vector<1x4x256xbf16>
    %44 = vector.shape_cast %43 : vector<1x4x256xbf16> to vector<4x256xbf16>
    %45 = arith.truncf %42 : vector<16x4xf32> to vector<16x4xbf16>
    %cst_40 = arith.constant dense<0.000000e+00> : vector<16x256xf32>
    %46 = tpu.matmul %45, %44, %cst_40 {dimension_numbers = #tpu.dot_dimension_numbers<[1], [0], [0], [1], [0, 0, 1, 1], [], []>} : vector<16x4xbf16>, vector<4x256xbf16>, vector<16x256xf32> -> vector<16x256xf32>
    %47 = arith.addf %40, %46 : vector<16x256xf32>
    %c0_41 = arith.constant 0 : index
    %c7 = arith.constant 7 : index
    %c0_42 = arith.constant 0 : index
    %48 = vector.load %arg21[%c0_41, %c7, %c0_42] : memref<2x16x4xf32, #tpu.memory_space<vmem>>, vector<2x8x4xf32>
    %49 = vector.shape_cast %48 : vector<2x8x4xf32> to vector<16x4xf32>
    %c5_43 = arith.constant 5 : index
    %c0_44 = arith.constant 0 : index
    %c0_45 = arith.constant 0 : index
    %50 = vector.load %arg4[%c5_43, %c0_44, %c0_45] : memref<7x4x256xbf16, #tpu.memory_space<vmem>>, vector<1x4x256xbf16>
    %51 = vector.shape_cast %50 : vector<1x4x256xbf16> to vector<4x256xbf16>
    %52 = arith.truncf %49 : vector<16x4xf32> to vector<16x4xbf16>
    %cst_46 = arith.constant dense<0.000000e+00> : vector<16x256xf32>
    %53 = tpu.matmul %52, %51, %cst_46 {dimension_numbers = #tpu.dot_dimension_numbers<[1], [0], [0], [1], [0, 0, 1, 1], [], []>} : vector<16x4xbf16>, vector<4x256xbf16>, vector<16x256xf32> -> vector<16x256xf32>
    %54 = arith.addf %47, %53 : vector<16x256xf32>
    %c0_47 = arith.constant 0 : index
    %c8_48 = arith.constant 8 : index
    %c0_49 = arith.constant 0 : index
    %55 = vector.load %arg21[%c0_47, %c8_48, %c0_49] : memref<2x16x4xf32, #tpu.memory_space<vmem>>, vector<2x8x4xf32>
    %56 = vector.shape_cast %55 : vector<2x8x4xf32> to vector<16x4xf32>
    %c6_50 = arith.constant 6 : index
    %c0_51 = arith.constant 0 : index
    %c0_52 = arith.constant 0 : index
    %57 = vector.load %arg4[%c6_50, %c0_51, %c0_52] : memref<7x4x256xbf16, #tpu.memory_space<vmem>>, vector<1x4x256xbf16>
    %58 = vector.shape_cast %57 : vector<1x4x256xbf16> to vector<4x256xbf16>
    %59 = arith.truncf %56 : vector<16x4xf32> to vector<16x4xbf16>
    %cst_53 = arith.constant dense<0.000000e+00> : vector<16x256xf32>
    %60 = tpu.matmul %59, %58, %cst_53 {dimension_numbers = #tpu.dot_dimension_numbers<[1], [0], [0], [1], [0, 0, 1, 1], [], []>} : vector<16x4xbf16>, vector<4x256xbf16>, vector<16x256xf32> -> vector<16x256xf32>
    %61 = arith.addf %54, %60 : vector<16x256xf32>
    %c0_54 = arith.constant 0 : index
    %c0_55 = arith.constant 0 : index
    %62 = vector.load %arg5[%c0_54, %c0_55] : memref<1x256xf32, #tpu.memory_space<vmem>>, vector<1x256xf32>
    %63 = vector.broadcast %62 : vector<1x256xf32> to vector<16x256xf32>
    %64 = arith.addf %61, %63 : vector<16x256xf32>
    %cst_56 = arith.constant 0.000000e+00 : f32
    %65 = vector.broadcast %cst_56 : f32 to vector<16x256xf32>
    %66 = arith.maximumf %64, %65 : vector<16x256xf32>
    %cst_57 = arith.constant 0.000000e+00 : f32
    %67 = vector.broadcast %cst_57 : f32 to vector<2x8x256xf32>
    %c0_58 = arith.constant 0 : index
    %c0_59 = arith.constant 0 : index
    %c0_60 = arith.constant 0 : index
    %68 = vector.load %arg22[%c0_58, %c0_59, %c0_60] : memref<2x16x256xf32, #tpu.memory_space<vmem>>, vector<2x8x256xf32>
    tpu.vector_store %arg22[%c0_58, %c0_59, %c0_60], %67 {strides = array<i32>} : memref<2x16x256xf32, #tpu.memory_space<vmem>>, vector<2x8x256xf32>,
    %69 = vector.shape_cast %66 : vector<16x256xf32> to vector<2x8x256xf32>
    %c0_61 = arith.constant 0 : index
    %c8_62 = arith.constant 8 : index
    %c0_63 = arith.constant 0 : index
    %70 = vector.load %arg22[%c0_61, %c8_62, %c0_63] : memref<2x16x256xf32, #tpu.memory_space<vmem>>, vector<2x8x256xf32>
    tpu.vector_store %arg22[%c0_61, %c8_62, %c0_63], %69 {strides = array<i32>} : memref<2x16x256xf32, #tpu.memory_space<vmem>>, vector<2x8x256xf32>,
    %cst_64 = arith.constant 0.000000e+00 : f32
    %71 = vector.broadcast %cst_64 : f32 to vector<16x256xf32>
    %c0_65 = arith.constant 0 : index
    %c2_66 = arith.constant 2 : index
    %c0_67 = arith.constant 0 : index
    %72 = vector.load %arg22[%c0_65, %c2_66, %c0_67] : memref<2x16x256xf32, #tpu.memory_space<vmem>>, vector<2x8x256xf32>
    %73 = vector.shape_cast %72 : vector<2x8x256xf32> to vector<16x256xf32>
    %c0_68 = arith.constant 0 : index
    %c0_69 = arith.constant 0 : index
    %c0_70 = arith.constant 0 : index
    %74 = vector.load %arg6[%c0_68, %c0_69, %c0_70] : memref<7x256x256xbf16, #tpu.memory_space<vmem>>, vector<1x256x256xbf16>
    %75 = vector.shape_cast %74 : vector<1x256x256xbf16> to vector<256x256xbf16>
    %76 = arith.truncf %73 : vector<16x256xf32> to vector<16x256xbf16>
    %cst_71 = arith.constant dense<0.000000e+00> : vector<16x256xf32>
    %77 = tpu.matmul %76, %75, %cst_71 {dimension_numbers = #tpu.dot_dimension_numbers<[1], [0], [0], [1], [0, 0, 1, 1], [], []>} : vector<16x256xbf16>, vector<256x256xbf16>, vector<16x256xf32> -> vector<16x256xf32>
    %78 = arith.addf %71, %77 : vector<16x256xf32>
    %c0_72 = arith.constant 0 : index
    %c3_73 = arith.constant 3 : index
    %c0_74 = arith.constant 0 : index
    %79 = vector.load %arg22[%c0_72, %c3_73, %c0_74] : memref<2x16x256xf32, #tpu.memory_space<vmem>>, vector<2x8x256xf32>
    %80 = vector.shape_cast %79 : vector<2x8x256xf32> to vector<16x256xf32>
    %c1_75 = arith.constant 1 : index
    %c0_76 = arith.constant 0 : index
    %c0_77 = arith.constant 0 : index
    %81 = vector.load %arg6[%c1_75, %c0_76, %c0_77] : memref<7x256x256xbf16, #tpu.memory_space<vmem>>, vector<1x256x256xbf16>
    %82 = vector.shape_cast %81 : vector<1x256x256xbf16> to vector<256x256xbf16>
    %83 = arith.truncf %80 : vector<16x256xf32> to vector<16x256xbf16>
    %cst_78 = arith.constant dense<0.000000e+00> : vector<16x256xf32>
    %84 = tpu.matmul %83, %82, %cst_78 {dimension_numbers = #tpu.dot_dimension_numbers<[1], [0], [0], [1], [0, 0, 1, 1], [], []>} : vector<16x256xbf16>, vector<256x256xbf16>, vector<16x256xf32> -> vector<16x256xf32>
    %85 = arith.addf %78, %84 : vector<16x256xf32>
    %c0_79 = arith.constant 0 : index
    %c4_80 = arith.constant 4 : index
    %c0_81 = arith.constant 0 : index
    %86 = vector.load %arg22[%c0_79, %c4_80, %c0_81] : memref<2x16x256xf32, #tpu.memory_space<vmem>>, vector<2x8x256xf32>
    %87 = vector.shape_cast %86 : vector<2x8x256xf32> to vector<16x256xf32>
    %c2_82 = arith.constant 2 : index
    %c0_83 = arith.constant 0 : index
    %c0_84 = arith.constant 0 : index
    %88 = vector.load %arg6[%c2_82, %c0_83, %c0_84] : memref<7x256x256xbf16, #tpu.memory_space<vmem>>, vector<1x256x256xbf16>
    %89 = vector.shape_cast %88 : vector<1x256x256xbf16> to vector<256x256xbf16>
    %90 = arith.truncf %87 : vector<16x256xf32> to vector<16x256xbf16>
    %cst_85 = arith.constant dense<0.000000e+00> : vector<16x256xf32>
    %91 = tpu.matmul %90, %89, %cst_85 {dimension_numbers = #tpu.dot_dimension_numbers<[1], [0], [0], [1], [0, 0, 1, 1], [], []>} : vector<16x256xbf16>, vector<256x256xbf16>, vector<16x256xf32> -> vector<16x256xf32>
    %92 = arith.addf %85, %91 : vector<16x256xf32>
    %c0_86 = arith.constant 0 : index
    %c5_87 = arith.constant 5 : index
    %c0_88 = arith.constant 0 : index
    %93 = vector.load %arg22[%c0_86, %c5_87, %c0_88] : memref<2x16x256xf32, #tpu.memory_space<vmem>>, vector<2x8x256xf32>
    %94 = vector.shape_cast %93 : vector<2x8x256xf32> to vector<16x256xf32>
    %c3_89 = arith.constant 3 : index
    %c0_90 = arith.constant 0 : index
    %c0_91 = arith.constant 0 : index
    %95 = vector.load %arg6[%c3_89, %c0_90, %c0_91] : memref<7x256x256xbf16, #tpu.memory_space<vmem>>, vector<1x256x256xbf16>
    %96 = vector.shape_cast %95 : vector<1x256x256xbf16> to vector<256x256xbf16>
    %97 = arith.truncf %94 : vector<16x256xf32> to vector<16x256xbf16>
    %cst_92 = arith.constant dense<0.000000e+00> : vector<16x256xf32>
    %98 = tpu.matmul %97, %96, %cst_92 {dimension_numbers = #tpu.dot_dimension_numbers<[1], [0], [0], [1], [0, 0, 1, 1], [], []>} : vector<16x256xbf16>, vector<256x256xbf16>, vector<16x256xf32> -> vector<16x256xf32>
    %99 = arith.addf %92, %98 : vector<16x256xf32>
    %c0_93 = arith.constant 0 : index
    %c6_94 = arith.constant 6 : index
    %c0_95 = arith.constant 0 : index
    %100 = vector.load %arg22[%c0_93, %c6_94, %c0_95] : memref<2x16x256xf32, #tpu.memory_space<vmem>>, vector<2x8x256xf32>
    %101 = vector.shape_cast %100 : vector<2x8x256xf32> to vector<16x256xf32>
    %c4_96 = arith.constant 4 : index
    %c0_97 = arith.constant 0 : index
    %c0_98 = arith.constant 0 : index
    %102 = vector.load %arg6[%c4_96, %c0_97, %c0_98] : memref<7x256x256xbf16, #tpu.memory_space<vmem>>, vector<1x256x256xbf16>
    %103 = vector.shape_cast %102 : vector<1x256x256xbf16> to vector<256x256xbf16>
    %104 = arith.truncf %101 : vector<16x256xf32> to vector<16x256xbf16>
    %cst_99 = arith.constant dense<0.000000e+00> : vector<16x256xf32>
    %105 = tpu.matmul %104, %103, %cst_99 {dimension_numbers = #tpu.dot_dimension_numbers<[1], [0], [0], [1], [0, 0, 1, 1], [], []>} : vector<16x256xbf16>, vector<256x256xbf16>, vector<16x256xf32> -> vector<16x256xf32>
    %106 = arith.addf %99, %105 : vector<16x256xf32>
    %c0_100 = arith.constant 0 : index
    %c7_101 = arith.constant 7 : index
    %c0_102 = arith.constant 0 : index
    %107 = vector.load %arg22[%c0_100, %c7_101, %c0_102] : memref<2x16x256xf32, #tpu.memory_space<vmem>>, vector<2x8x256xf32>
    %108 = vector.shape_cast %107 : vector<2x8x256xf32> to vector<16x256xf32>
    %c5_103 = arith.constant 5 : index
    %c0_104 = arith.constant 0 : index
    %c0_105 = arith.constant 0 : index
    %109 = vector.load %arg6[%c5_103, %c0_104, %c0_105] : memref<7x256x256xbf16, #tpu.memory_space<vmem>>, vector<1x256x256xbf16>
    %110 = vector.shape_cast %109 : vector<1x256x256xbf16> to vector<256x256xbf16>
    %111 = arith.truncf %108 : vector<16x256xf32> to vector<16x256xbf16>
    %cst_106 = arith.constant dense<0.000000e+00> : vector<16x256xf32>
    %112 = tpu.matmul %111, %110, %cst_106 {dimension_numbers = #tpu.dot_dimension_numbers<[1], [0], [0], [1], [0, 0, 1, 1], [], []>} : vector<16x256xbf16>, vector<256x256xbf16>, vector<16x256xf32> -> vector<16x256xf32>
    %113 = arith.addf %106, %112 : vector<16x256xf32>
    %c0_107 = arith.constant 0 : index
    %c8_108 = arith.constant 8 : index
    %c0_109 = arith.constant 0 : index
    %114 = vector.load %arg22[%c0_107, %c8_108, %c0_109] : memref<2x16x256xf32, #tpu.memory_space<vmem>>, vector<2x8x256xf32>
    %115 = vector.shape_cast %114 : vector<2x8x256xf32> to vector<16x256xf32>
    %c6_110 = arith.constant 6 : index
    %c0_111 = arith.constant 0 : index
    %c0_112 = arith.constant 0 : index
    %116 = vector.load %arg6[%c6_110, %c0_111, %c0_112] : memref<7x256x256xbf16, #tpu.memory_space<vmem>>, vector<1x256x256xbf16>
    %117 = vector.shape_cast %116 : vector<1x256x256xbf16> to vector<256x256xbf16>
    %118 = arith.truncf %115 : vector<16x256xf32> to vector<16x256xbf16>
    %cst_113 = arith.constant dense<0.000000e+00> : vector<16x256xf32>
    %119 = tpu.matmul %118, %117, %cst_113 {dimension_numbers = #tpu.dot_dimension_numbers<[1], [0], [0], [1], [0, 0, 1, 1], [], []>} : vector<16x256xbf16>, vector<256x256xbf16>, vector<16x256xf32> -> vector<16x256xf32>
    %120 = arith.addf %113, %119 : vector<16x256xf32>
    %c0_114 = arith.constant 0 : index
    %c0_115 = arith.constant 0 : index
    %121 = vector.load %arg7[%c0_114, %c0_115] : memref<1x256xf32, #tpu.memory_space<vmem>>, vector<1x256xf32>
    %122 = vector.broadcast %121 : vector<1x256xf32> to vector<16x256xf32>
    %123 = arith.addf %120, %122 : vector<16x256xf32>
    %cst_116 = arith.constant 0.000000e+00 : f32
    %124 = vector.broadcast %cst_116 : f32 to vector<16x256xf32>
    %125 = arith.maximumf %123, %124 : vector<16x256xf32>
    %c0_117 = arith.constant 0 : index
    %c0_118 = arith.constant 0 : index
    %126 = vector.load %arg8[%c0_117, %c0_118] : memref<4x256xbf16, #tpu.memory_space<vmem>>, vector<4x256xbf16>
    %127 = arith.truncf %7 : vector<16x4xf32> to vector<16x4xbf16>
    %cst_119 = arith.constant dense<0.000000e+00> : vector<16x256xf32>
    %128 = tpu.matmul %127, %126, %cst_119 {dimension_numbers = #tpu.dot_dimension_numbers<[1], [0], [0], [1], [0, 0, 1, 1], [], []>} : vector<16x4xbf16>, vector<4x256xbf16>, vector<16x256xf32> -> vector<16x256xf32>
    %c0_120 = arith.constant 0 : index
    %c0_121 = arith.constant 0 : index
    %129 = vector.load %arg9[%c0_120, %c0_121] : memref<1x256xf32, #tpu.memory_space<vmem>>, vector<1x256xf32>
    %130 = vector.broadcast %129 : vector<1x256xf32> to vector<16x256xf32>
    %131 = arith.addf %128, %130 : vector<16x256xf32>
    %132 = arith.addf %125, %131 : vector<16x256xf32>
    %cst_122 = arith.constant 0.000000e+00 : f32
    %133 = vector.broadcast %cst_122 : f32 to vector<16x256xf32>
    %134 = arith.maximumf %132, %133 : vector<16x256xf32>
    %cst_123 = arith.constant 0.000000e+00 : f32
    %135 = vector.broadcast %cst_123 : f32 to vector<2x16x256xf32>
    %c0_124 = arith.constant 0 : index
    %c0_125 = arith.constant 0 : index
    %c0_126 = arith.constant 0 : index
    %136 = vector.load %arg23[%c0_124, %c0_125, %c0_126] : memref<2x24x256xf32, #tpu.memory_space<vmem>>, vector<2x16x256xf32>
    tpu.vector_store %arg23[%c0_124, %c0_125, %c0_126], %135 {strides = array<i32>} : memref<2x24x256xf32, #tpu.memory_space<vmem>>, vector<2x16x256xf32>,
    %137 = vector.shape_cast %134 : vector<16x256xf32> to vector<2x8x256xf32>
    %c0_127 = arith.constant 0 : index
    %c16 = arith.constant 16 : index
    %c0_128 = arith.constant 0 : index
    %138 = vector.load %arg23[%c0_127, %c16, %c0_128] : memref<2x24x256xf32, #tpu.memory_space<vmem>>, vector<2x8x256xf32>
    tpu.vector_store %arg23[%c0_127, %c16, %c0_128], %137 {strides = array<i32>} : memref<2x24x256xf32, #tpu.memory_space<vmem>>, vector<2x8x256xf32>,
    %cst_129 = arith.constant 0.000000e+00 : f32
    %139 = vector.broadcast %cst_129 : f32 to vector<16x256xf32>
    %c0_130 = arith.constant 0 : index
    %c4_131 = arith.constant 4 : index
    %c0_132 = arith.constant 0 : index
    %140 = vector.load %arg23[%c0_130, %c4_131, %c0_132] : memref<2x24x256xf32, #tpu.memory_space<vmem>>, vector<2x8x256xf32>
    %141 = vector.shape_cast %140 : vector<2x8x256xf32> to vector<16x256xf32>
    %c0_133 = arith.constant 0 : index
    %c0_134 = arith.constant 0 : index
    %c0_135 = arith.constant 0 : index
    %142 = vector.load %arg10[%c0_133, %c0_134, %c0_135] : memref<7x256x256xbf16, #tpu.memory_space<vmem>>, vector<1x256x256xbf16>
    %143 = vector.shape_cast %142 : vector<1x256x256xbf16> to vector<256x256xbf16>
    %144 = arith.truncf %141 : vector<16x256xf32> to vector<16x256xbf16>
    %cst_136 = arith.constant dense<0.000000e+00> : vector<16x256xf32>
    %145 = tpu.matmul %144, %143, %cst_136 {dimension_numbers = #tpu.dot_dimension_numbers<[1], [0], [0], [1], [0, 0, 1, 1], [], []>} : vector<16x256xbf16>, vector<256x256xbf16>, vector<16x256xf32> -> vector<16x256xf32>
    %146 = arith.addf %139, %145 : vector<16x256xf32>
    %c0_137 = arith.constant 0 : index
    %c6_138 = arith.constant 6 : index
    %c0_139 = arith.constant 0 : index
    %147 = vector.load %arg23[%c0_137, %c6_138, %c0_139] : memref<2x24x256xf32, #tpu.memory_space<vmem>>, vector<2x8x256xf32>
    %148 = vector.shape_cast %147 : vector<2x8x256xf32> to vector<16x256xf32>
    %c1_140 = arith.constant 1 : index
    %c0_141 = arith.constant 0 : index
    %c0_142 = arith.constant 0 : index
    %149 = vector.load %arg10[%c1_140, %c0_141, %c0_142] : memref<7x256x256xbf16, #tpu.memory_space<vmem>>, vector<1x256x256xbf16>
    %150 = vector.shape_cast %149 : vector<1x256x256xbf16> to vector<256x256xbf16>
    %151 = arith.truncf %148 : vector<16x256xf32> to vector<16x256xbf16>
    %cst_143 = arith.constant dense<0.000000e+00> : vector<16x256xf32>
    %152 = tpu.matmul %151, %150, %cst_143 {dimension_numbers = #tpu.dot_dimension_numbers<[1], [0], [0], [1], [0, 0, 1, 1], [], []>} : vector<16x256xbf16>, vector<256x256xbf16>, vector<16x256xf32> -> vector<16x256xf32>
    %153 = arith.addf %146, %152 : vector<16x256xf32>
    %c0_144 = arith.constant 0 : index
    %c8_145 = arith.constant 8 : index
    %c0_146 = arith.constant 0 : index
    %154 = vector.load %arg23[%c0_144, %c8_145, %c0_146] : memref<2x24x256xf32, #tpu.memory_space<vmem>>, vector<2x8x256xf32>
    %155 = vector.shape_cast %154 : vector<2x8x256xf32> to vector<16x256xf32>
    %c2_147 = arith.constant 2 : index
    %c0_148 = arith.constant 0 : index
    %c0_149 = arith.constant 0 : index
    %156 = vector.load %arg10[%c2_147, %c0_148, %c0_149] : memref<7x256x256xbf16, #tpu.memory_space<vmem>>, vector<1x256x256xbf16>
    %157 = vector.shape_cast %156 : vector<1x256x256xbf16> to vector<256x256xbf16>
    %158 = arith.truncf %155 : vector<16x256xf32> to vector<16x256xbf16>
    %cst_150 = arith.constant dense<0.000000e+00> : vector<16x256xf32>
    %159 = tpu.matmul %158, %157, %cst_150 {dimension_numbers = #tpu.dot_dimension_numbers<[1], [0], [0], [1], [0, 0, 1, 1], [], []>} : vector<16x256xbf16>, vector<256x256xbf16>, vector<16x256xf32> -> vector<16x256xf32>
    %160 = arith.addf %153, %159 : vector<16x256xf32>
    %c0_151 = arith.constant 0 : index
    %c10 = arith.constant 10 : index
    %c0_152 = arith.constant 0 : index
    %161 = vector.load %arg23[%c0_151, %c10, %c0_152] : memref<2x24x256xf32, #tpu.memory_space<vmem>>, vector<2x8x256xf32>
    %162 = vector.shape_cast %161 : vector<2x8x256xf32> to vector<16x256xf32>
    %c3_153 = arith.constant 3 : index
    %c0_154 = arith.constant 0 : index
    %c0_155 = arith.constant 0 : index
    %163 = vector.load %arg10[%c3_153, %c0_154, %c0_155] : memref<7x256x256xbf16, #tpu.memory_space<vmem>>, vector<1x256x256xbf16>
    %164 = vector.shape_cast %163 : vector<1x256x256xbf16> to vector<256x256xbf16>
    %165 = arith.truncf %162 : vector<16x256xf32> to vector<16x256xbf16>
    %cst_156 = arith.constant dense<0.000000e+00> : vector<16x256xf32>
    %166 = tpu.matmul %165, %164, %cst_156 {dimension_numbers = #tpu.dot_dimension_numbers<[1], [0], [0], [1], [0, 0, 1, 1], [], []>} : vector<16x256xbf16>, vector<256x256xbf16>, vector<16x256xf32> -> vector<16x256xf32>
    %167 = arith.addf %160, %166 : vector<16x256xf32>
    %c0_157 = arith.constant 0 : index
    %c12 = arith.constant 12 : index
    %c0_158 = arith.constant 0 : index
    %168 = vector.load %arg23[%c0_157, %c12, %c0_158] : memref<2x24x256xf32, #tpu.memory_space<vmem>>, vector<2x8x256xf32>
    %169 = vector.shape_cast %168 : vector<2x8x256xf32> to vector<16x256xf32>
    %c4_159 = arith.constant 4 : index
    %c0_160 = arith.constant 0 : index
    %c0_161 = arith.constant 0 : index
    %170 = vector.load %arg10[%c4_159, %c0_160, %c0_161] : memref<7x256x256xbf16, #tpu.memory_space<vmem>>, vector<1x256x256xbf16>
    %171 = vector.shape_cast %170 : vector<1x256x256xbf16> to vector<256x256xbf16>
    %172 = arith.truncf %169 : vector<16x256xf32> to vector<16x256xbf16>
    %cst_162 = arith.constant dense<0.000000e+00> : vector<16x256xf32>
    %173 = tpu.matmul %172, %171, %cst_162 {dimension_numbers = #tpu.dot_dimension_numbers<[1], [0], [0], [1], [0, 0, 1, 1], [], []>} : vector<16x256xbf16>, vector<256x256xbf16>, vector<16x256xf32> -> vector<16x256xf32>
    %174 = arith.addf %167, %173 : vector<16x256xf32>
    %c0_163 = arith.constant 0 : index
    %c14 = arith.constant 14 : index
    %c0_164 = arith.constant 0 : index
    %175 = vector.load %arg23[%c0_163, %c14, %c0_164] : memref<2x24x256xf32, #tpu.memory_space<vmem>>, vector<2x8x256xf32>
    %176 = vector.shape_cast %175 : vector<2x8x256xf32> to vector<16x256xf32>
    %c5_165 = arith.constant 5 : index
    %c0_166 = arith.constant 0 : index
    %c0_167 = arith.constant 0 : index
    %177 = vector.load %arg10[%c5_165, %c0_166, %c0_167] : memref<7x256x256xbf16, #tpu.memory_space<vmem>>, vector<1x256x256xbf16>
    %178 = vector.shape_cast %177 : vector<1x256x256xbf16> to vector<256x256xbf16>
    %179 = arith.truncf %176 : vector<16x256xf32> to vector<16x256xbf16>
    %cst_168 = arith.constant dense<0.000000e+00> : vector<16x256xf32>
    %180 = tpu.matmul %179, %178, %cst_168 {dimension_numbers = #tpu.dot_dimension_numbers<[1], [0], [0], [1], [0, 0, 1, 1], [], []>} : vector<16x256xbf16>, vector<256x256xbf16>, vector<16x256xf32> -> vector<16x256xf32>
    %181 = arith.addf %174, %180 : vector<16x256xf32>
    %c0_169 = arith.constant 0 : index
    %c16_170 = arith.constant 16 : index
    %c0_171 = arith.constant 0 : index
    %182 = vector.load %arg23[%c0_169, %c16_170, %c0_171] : memref<2x24x256xf32, #tpu.memory_space<vmem>>, vector<2x8x256xf32>
    %183 = vector.shape_cast %182 : vector<2x8x256xf32> to vector<16x256xf32>
    %c6_172 = arith.constant 6 : index
    %c0_173 = arith.constant 0 : index
    %c0_174 = arith.constant 0 : index
    %184 = vector.load %arg10[%c6_172, %c0_173, %c0_174] : memref<7x256x256xbf16, #tpu.memory_space<vmem>>, vector<1x256x256xbf16>
    %185 = vector.shape_cast %184 : vector<1x256x256xbf16> to vector<256x256xbf16>
    %186 = arith.truncf %183 : vector<16x256xf32> to vector<16x256xbf16>
    %cst_175 = arith.constant dense<0.000000e+00> : vector<16x256xf32>
    %187 = tpu.matmul %186, %185, %cst_175 {dimension_numbers = #tpu.dot_dimension_numbers<[1], [0], [0], [1], [0, 0, 1, 1], [], []>} : vector<16x256xbf16>, vector<256x256xbf16>, vector<16x256xf32> -> vector<16x256xf32>
    %188 = arith.addf %181, %187 : vector<16x256xf32>
    %c0_176 = arith.constant 0 : index
    %c0_177 = arith.constant 0 : index
    %189 = vector.load %arg11[%c0_176, %c0_177] : memref<1x256xf32, #tpu.memory_space<vmem>>, vector<1x256xf32>
    %190 = vector.broadcast %189 : vector<1x256xf32> to vector<16x256xf32>
    %191 = arith.addf %188, %190 : vector<16x256xf32>
    %cst_178 = arith.constant 0.000000e+00 : f32
    %192 = vector.broadcast %cst_178 : f32 to vector<16x256xf32>
    %193 = arith.maximumf %191, %192 : vector<16x256xf32>
    %cst_179 = arith.constant 0.000000e+00 : f32
    %194 = vector.broadcast %cst_179 : f32 to vector<2x16x256xf32>
    %c0_180 = arith.constant 0 : index
    %c0_181 = arith.constant 0 : index
    %c0_182 = arith.constant 0 : index
    %195 = vector.load %arg24[%c0_180, %c0_181, %c0_182] : memref<2x24x256xf32, #tpu.memory_space<vmem>>, vector<2x16x256xf32>
    tpu.vector_store %arg24[%c0_180, %c0_181, %c0_182], %194 {strides = array<i32>} : memref<2x24x256xf32, #tpu.memory_space<vmem>>, vector<2x16x256xf32>,
    %196 = vector.shape_cast %193 : vector<16x256xf32> to vector<2x8x256xf32>
    %c0_183 = arith.constant 0 : index
    %c16_184 = arith.constant 16 : index
    %c0_185 = arith.constant 0 : index
    %197 = vector.load %arg24[%c0_183, %c16_184, %c0_185] : memref<2x24x256xf32, #tpu.memory_space<vmem>>, vector<2x8x256xf32>
    tpu.vector_store %arg24[%c0_183, %c16_184, %c0_185], %196 {strides = array<i32>} : memref<2x24x256xf32, #tpu.memory_space<vmem>>, vector<2x8x256xf32>,
    %cst_186 = arith.constant 0.000000e+00 : f32
    %198 = vector.broadcast %cst_186 : f32 to vector<16x256xf32>
    %c0_187 = arith.constant 0 : index
    %c4_188 = arith.constant 4 : index
    %c0_189 = arith.constant 0 : index
    %199 = vector.load %arg24[%c0_187, %c4_188, %c0_189] : memref<2x24x256xf32, #tpu.memory_space<vmem>>, vector<2x8x256xf32>
    %200 = vector.shape_cast %199 : vector<2x8x256xf32> to vector<16x256xf32>
    %c0_190 = arith.constant 0 : index
    %c0_191 = arith.constant 0 : index
    %c0_192 = arith.constant 0 : index
    %201 = vector.load %arg12[%c0_190, %c0_191, %c0_192] : memref<7x256x256xbf16, #tpu.memory_space<vmem>>, vector<1x256x256xbf16>
    %202 = vector.shape_cast %201 : vector<1x256x256xbf16> to vector<256x256xbf16>
    %203 = arith.truncf %200 : vector<16x256xf32> to vector<16x256xbf16>
    %cst_193 = arith.constant dense<0.000000e+00> : vector<16x256xf32>
    %204 = tpu.matmul %203, %202, %cst_193 {dimension_numbers = #tpu.dot_dimension_numbers<[1], [0], [0], [1], [0, 0, 1, 1], [], []>} : vector<16x256xbf16>, vector<256x256xbf16>, vector<16x256xf32> -> vector<16x256xf32>
    %205 = arith.addf %198, %204 : vector<16x256xf32>
    %c0_194 = arith.constant 0 : index
    %c6_195 = arith.constant 6 : index
    %c0_196 = arith.constant 0 : index
    %206 = vector.load %arg24[%c0_194, %c6_195, %c0_196] : memref<2x24x256xf32, #tpu.memory_space<vmem>>, vector<2x8x256xf32>
    %207 = vector.shape_cast %206 : vector<2x8x256xf32> to vector<16x256xf32>
    %c1_197 = arith.constant 1 : index
    %c0_198 = arith.constant 0 : index
    %c0_199 = arith.constant 0 : index
    %208 = vector.load %arg12[%c1_197, %c0_198, %c0_199] : memref<7x256x256xbf16, #tpu.memory_space<vmem>>, vector<1x256x256xbf16>
    %209 = vector.shape_cast %208 : vector<1x256x256xbf16> to vector<256x256xbf16>
    %210 = arith.truncf %207 : vector<16x256xf32> to vector<16x256xbf16>
    %cst_200 = arith.constant dense<0.000000e+00> : vector<16x256xf32>
    %211 = tpu.matmul %210, %209, %cst_200 {dimension_numbers = #tpu.dot_dimension_numbers<[1], [0], [0], [1], [0, 0, 1, 1], [], []>} : vector<16x256xbf16>, vector<256x256xbf16>, vector<16x256xf32> -> vector<16x256xf32>
    %212 = arith.addf %205, %211 : vector<16x256xf32>
    %c0_201 = arith.constant 0 : index
    %c8_202 = arith.constant 8 : index
    %c0_203 = arith.constant 0 : index
    %213 = vector.load %arg24[%c0_201, %c8_202, %c0_203] : memref<2x24x256xf32, #tpu.memory_space<vmem>>, vector<2x8x256xf32>
    %214 = vector.shape_cast %213 : vector<2x8x256xf32> to vector<16x256xf32>
    %c2_204 = arith.constant 2 : index
    %c0_205 = arith.constant 0 : index
    %c0_206 = arith.constant 0 : index
    %215 = vector.load %arg12[%c2_204, %c0_205, %c0_206] : memref<7x256x256xbf16, #tpu.memory_space<vmem>>, vector<1x256x256xbf16>
    %216 = vector.shape_cast %215 : vector<1x256x256xbf16> to vector<256x256xbf16>
    %217 = arith.truncf %214 : vector<16x256xf32> to vector<16x256xbf16>
    %cst_207 = arith.constant dense<0.000000e+00> : vector<16x256xf32>
    %218 = tpu.matmul %217, %216, %cst_207 {dimension_numbers = #tpu.dot_dimension_numbers<[1], [0], [0], [1], [0, 0, 1, 1], [], []>} : vector<16x256xbf16>, vector<256x256xbf16>, vector<16x256xf32> -> vector<16x256xf32>
    %219 = arith.addf %212, %218 : vector<16x256xf32>
    %c0_208 = arith.constant 0 : index
    %c10_209 = arith.constant 10 : index
    %c0_210 = arith.constant 0 : index
    %220 = vector.load %arg24[%c0_208, %c10_209, %c0_210] : memref<2x24x256xf32, #tpu.memory_space<vmem>>, vector<2x8x256xf32>
    %221 = vector.shape_cast %220 : vector<2x8x256xf32> to vector<16x256xf32>
    %c3_211 = arith.constant 3 : index
    %c0_212 = arith.constant 0 : index
    %c0_213 = arith.constant 0 : index
    %222 = vector.load %arg12[%c3_211, %c0_212, %c0_213] : memref<7x256x256xbf16, #tpu.memory_space<vmem>>, vector<1x256x256xbf16>
    %223 = vector.shape_cast %222 : vector<1x256x256xbf16> to vector<256x256xbf16>
    %224 = arith.truncf %221 : vector<16x256xf32> to vector<16x256xbf16>
    %cst_214 = arith.constant dense<0.000000e+00> : vector<16x256xf32>
    %225 = tpu.matmul %224, %223, %cst_214 {dimension_numbers = #tpu.dot_dimension_numbers<[1], [0], [0], [1], [0, 0, 1, 1], [], []>} : vector<16x256xbf16>, vector<256x256xbf16>, vector<16x256xf32> -> vector<16x256xf32>
    %226 = arith.addf %219, %225 : vector<16x256xf32>
    %c0_215 = arith.constant 0 : index
    %c12_216 = arith.constant 12 : index
    %c0_217 = arith.constant 0 : index
    %227 = vector.load %arg24[%c0_215, %c12_216, %c0_217] : memref<2x24x256xf32, #tpu.memory_space<vmem>>, vector<2x8x256xf32>
    %228 = vector.shape_cast %227 : vector<2x8x256xf32> to vector<16x256xf32>
    %c4_218 = arith.constant 4 : index
    %c0_219 = arith.constant 0 : index
    %c0_220 = arith.constant 0 : index
    %229 = vector.load %arg12[%c4_218, %c0_219, %c0_220] : memref<7x256x256xbf16, #tpu.memory_space<vmem>>, vector<1x256x256xbf16>
    %230 = vector.shape_cast %229 : vector<1x256x256xbf16> to vector<256x256xbf16>
    %231 = arith.truncf %228 : vector<16x256xf32> to vector<16x256xbf16>
    %cst_221 = arith.constant dense<0.000000e+00> : vector<16x256xf32>
    %232 = tpu.matmul %231, %230, %cst_221 {dimension_numbers = #tpu.dot_dimension_numbers<[1], [0], [0], [1], [0, 0, 1, 1], [], []>} : vector<16x256xbf16>, vector<256x256xbf16>, vector<16x256xf32> -> vector<16x256xf32>
    %233 = arith.addf %226, %232 : vector<16x256xf32>
    %c0_222 = arith.constant 0 : index
    %c14_223 = arith.constant 14 : index
    %c0_224 = arith.constant 0 : index
    %234 = vector.load %arg24[%c0_222, %c14_223, %c0_224] : memref<2x24x256xf32, #tpu.memory_space<vmem>>, vector<2x8x256xf32>
    %235 = vector.shape_cast %234 : vector<2x8x256xf32> to vector<16x256xf32>
    %c5_225 = arith.constant 5 : index
    %c0_226 = arith.constant 0 : index
    %c0_227 = arith.constant 0 : index
    %236 = vector.load %arg12[%c5_225, %c0_226, %c0_227] : memref<7x256x256xbf16, #tpu.memory_space<vmem>>, vector<1x256x256xbf16>
    %237 = vector.shape_cast %236 : vector<1x256x256xbf16> to vector<256x256xbf16>
    %238 = arith.truncf %235 : vector<16x256xf32> to vector<16x256xbf16>
    %cst_228 = arith.constant dense<0.000000e+00> : vector<16x256xf32>
    %239 = tpu.matmul %238, %237, %cst_228 {dimension_numbers = #tpu.dot_dimension_numbers<[1], [0], [0], [1], [0, 0, 1, 1], [], []>} : vector<16x256xbf16>, vector<256x256xbf16>, vector<16x256xf32> -> vector<16x256xf32>
    %240 = arith.addf %233, %239 : vector<16x256xf32>
    %c0_229 = arith.constant 0 : index
    %c16_230 = arith.constant 16 : index
    %c0_231 = arith.constant 0 : index
    %241 = vector.load %arg24[%c0_229, %c16_230, %c0_231] : memref<2x24x256xf32, #tpu.memory_space<vmem>>, vector<2x8x256xf32>
    %242 = vector.shape_cast %241 : vector<2x8x256xf32> to vector<16x256xf32>
    %c6_232 = arith.constant 6 : index
    %c0_233 = arith.constant 0 : index
    %c0_234 = arith.constant 0 : index
    %243 = vector.load %arg12[%c6_232, %c0_233, %c0_234] : memref<7x256x256xbf16, #tpu.memory_space<vmem>>, vector<1x256x256xbf16>
    %244 = vector.shape_cast %243 : vector<1x256x256xbf16> to vector<256x256xbf16>
    %245 = arith.truncf %242 : vector<16x256xf32> to vector<16x256xbf16>
    %cst_235 = arith.constant dense<0.000000e+00> : vector<16x256xf32>
    %246 = tpu.matmul %245, %244, %cst_235 {dimension_numbers = #tpu.dot_dimension_numbers<[1], [0], [0], [1], [0, 0, 1, 1], [], []>} : vector<16x256xbf16>, vector<256x256xbf16>, vector<16x256xf32> -> vector<16x256xf32>
    %247 = arith.addf %240, %246 : vector<16x256xf32>
    %c0_236 = arith.constant 0 : index
    %c0_237 = arith.constant 0 : index
    %248 = vector.load %arg13[%c0_236, %c0_237] : memref<1x256xf32, #tpu.memory_space<vmem>>, vector<1x256xf32>
    %249 = vector.broadcast %248 : vector<1x256xf32> to vector<16x256xf32>
    %250 = arith.addf %247, %249 : vector<16x256xf32>
    %cst_238 = arith.constant 0.000000e+00 : f32
    %251 = vector.broadcast %cst_238 : f32 to vector<16x256xf32>
    %252 = arith.maximumf %250, %251 : vector<16x256xf32>
    %253 = arith.addf %252, %134 : vector<16x256xf32>
    %cst_239 = arith.constant 0.000000e+00 : f32
    %254 = vector.broadcast %cst_239 : f32 to vector<16x256xf32>
    %255 = arith.maximumf %253, %254 : vector<16x256xf32>
    %c0_240 = arith.constant 0 : index
    %c0_241 = arith.constant 0 : index
    %256 = vector.load %arg14[%c0_240, %c0_241] : memref<256x256xbf16, #tpu.memory_space<vmem>>, vector<256x256xbf16>
    %257 = arith.truncf %255 : vector<16x256xf32> to vector<16x256xbf16>
    %cst_242 = arith.constant dense<0.000000e+00> : vector<16x256xf32>
    %258 = tpu.matmul %257, %256, %cst_242 {dimension_numbers = #tpu.dot_dimension_numbers<[1], [0], [0], [1], [0, 0, 1, 1], [], []>} : vector<16x256xbf16>, vector<256x256xbf16>, vector<16x256xf32> -> vector<16x256xf32>
    %c0_243 = arith.constant 0 : index
    %c0_244 = arith.constant 0 : index
    %259 = vector.load %arg15[%c0_243, %c0_244] : memref<1x256xf32, #tpu.memory_space<vmem>>, vector<1x256xf32>
    %260 = vector.broadcast %259 : vector<1x256xf32> to vector<16x256xf32>
    %261 = arith.addf %258, %260 : vector<16x256xf32>
    %cst_245 = arith.constant 0.000000e+00 : f32
    %262 = vector.broadcast %cst_245 : f32 to vector<16x256xf32>
    %263 = arith.maximumf %261, %262 : vector<16x256xf32>
    %c0_246 = arith.constant 0 : index
    %c0_247 = arith.constant 0 : index
    %264 = vector.load %arg16[%c0_246, %c0_247] : memref<256x256xbf16, #tpu.memory_space<vmem>>, vector<256x256xbf16>
    %265 = arith.truncf %263 : vector<16x256xf32> to vector<16x256xbf16>
    %cst_248 = arith.constant dense<0.000000e+00> : vector<16x256xf32>
    %266 = tpu.matmul %265, %264, %cst_248 {dimension_numbers = #tpu.dot_dimension_numbers<[1], [0], [0], [1], [0, 0, 1, 1], [], []>} : vector<16x256xbf16>, vector<256x256xbf16>, vector<16x256xf32> -> vector<16x256xf32>
    %c0_249 = arith.constant 0 : index
    %c0_250 = arith.constant 0 : index
    %267 = vector.load %arg17[%c0_249, %c0_250] : memref<1x256xf32, #tpu.memory_space<vmem>>, vector<1x256xf32>
    %268 = vector.broadcast %267 : vector<1x256xf32> to vector<16x256xf32>
    %269 = arith.addf %266, %268 : vector<16x256xf32>
    %cst_251 = arith.constant 0.000000e+00 : f32
    %270 = vector.broadcast %cst_251 : f32 to vector<16x256xf32>
    %271 = arith.maximumf %269, %270 : vector<16x256xf32>
    %c0_252 = arith.constant 0 : index
    %c0_253 = arith.constant 0 : index
    %272 = vector.load %arg18[%c0_252, %c0_253] : memref<256x2xbf16, #tpu.memory_space<vmem>>, vector<256x2xbf16>
    %273 = arith.truncf %271 : vector<16x256xf32> to vector<16x256xbf16>
    %cst_254 = arith.constant dense<0.000000e+00> : vector<16x2xf32>
    %274 = tpu.matmul %273, %272, %cst_254 {dimension_numbers = #tpu.dot_dimension_numbers<[1], [0], [0], [1], [0, 0, 1, 1], [], []>} : vector<16x256xbf16>, vector<256x2xbf16>, vector<16x2xf32> -> vector<16x2xf32>
    %c0_255 = arith.constant 0 : index
    %c0_256 = arith.constant 0 : index
    %275 = vector.load %arg19[%c0_255, %c0_256] : memref<1x2xf32, #tpu.memory_space<vmem>>, vector<1x2xf32>
    %276 = vector.broadcast %275 : vector<1x2xf32> to vector<16x2xf32>
    %277 = arith.addf %274, %276 : vector<16x2xf32>
    %cst_257 = arith.constant 0.000000e+00 : f32
    %278 = vector.broadcast %cst_257 : f32 to vector<16x2xf32>
    %279 = arith.maximumf %277, %278 : vector<16x2xf32>
    %cst_258 = arith.constant -2.000000e+01 : f32
    %cst_259 = arith.constant 2.000000e+00 : f32
    %280 = vector.broadcast %cst_258 : f32 to vector<16x2xf32>
    %281 = arith.maximumf %280, %279 : vector<16x2xf32>
    %282 = vector.broadcast %cst_259 : f32 to vector<16x2xf32>
    %283 = arith.minimumf %282, %281 : vector<16x2xf32>
    %284 = tpu.iota {dimensions = array<i32: 1>} : vector<16x2xi32>
    %c0_i32 = arith.constant 0 : i32
    %285 = vector.broadcast %c0_i32 : i32 to vector<16x2xi32>
    %286 = arith.cmpi eq, %284, %285 : vector<16x2xi32>
    %287 = arith.select %286, %277, %283 : vector<16x2xi1>, vector<16x2xf32>
    %288 = vector.shape_cast %287 : vector<16x2xf32> to vector<2x8x2xf32>
    %c0_260 = arith.constant 0 : index
    %c0_261 = arith.constant 0 : index
    %c0_262 = arith.constant 0 : index
    %289 = vector.load %arg20[%c0_260, %c0_261, %c0_262] : memref<2x8x2xf32, #tpu.memory_space<vmem>>, vector<2x8x2xf32>
    tpu.vector_store %arg20[%c0_260, %c0_261, %c0_262], %288 {strides = array<i32>} : memref<2x8x2xf32, #tpu.memory_space<vmem>>, vector<2x8x2xf32>,
    return
  }
  func.func @transform_0(%arg0: i32) -> (i32, i32, i32) {
    %c0_i32 = arith.constant 0 : i32
    %c0_i32_0 = arith.constant 0 : i32
    %c0_i32_1 = arith.constant 0 : i32
    return %arg0, %c0_i32, %c0_i32_0 : i32, i32, i32
  }
  func.func @transform_1(%arg0: i32) -> (i32, i32) {
    %c0_i32 = arith.constant 0 : i32
    %c0_i32_0 = arith.constant 0 : i32
    %c0_i32_1 = arith.constant 0 : i32
    return %c0_i32, %c0_i32_0 : i32, i32
  }
  func.func @transform_2(%arg0: i32) -> (i32, i32) {
    %c0_i32 = arith.constant 0 : i32
    %c0_i32_0 = arith.constant 0 : i32
    %c0_i32_1 = arith.constant 0 : i32
    return %c0_i32, %c0_i32_0 : i32, i32
  }
  func.func @transform_3(%arg0: i32) -> (i32, i32, i32) {
    %c0_i32 = arith.constant 0 : i32
    %c0_i32_0 = arith.constant 0 : i32
    %c0_i32_1 = arith.constant 0 : i32
    %c0_i32_2 = arith.constant 0 : i32
    return %c0_i32, %c0_i32_0, %c0_i32_1 : i32, i32, i32
  }
  func.func @transform_4(%arg0: i32) -> (i32, i32) {
    %c0_i32 = arith.constant 0 : i32
    %c0_i32_0 = arith.constant 0 : i32
    %c0_i32_1 = arith.constant 0 : i32
    return %c0_i32, %c0_i32_0 : i32, i32
  }
  func.func @transform_5(%arg0: i32) -> (i32, i32, i32) {
    %c0_i32 = arith.constant 0 : i32
    %c0_i32_0 = arith.constant 0 : i32
    %c0_i32_1 = arith.constant 0 : i32
    %c0_i32_2 = arith.constant 0 : i32
    return %c0_i32, %c0_i32_0, %c0_i32_1 : i32, i32, i32
  }
  func.func @transform_6(%arg0: i32) -> (i32, i32) {
    %c0_i32 = arith.constant 0 : i32
    %c0_i32_0 = arith.constant 0 : i32
    %c0_i32_1 = arith.constant 0 : i32
    return %c0_i32, %c0_i32_0 : i32, i32
  }
  func.func @transform_7(%arg0: i32) -> (i32, i32) {
    %c0_i32 = arith.constant 0 : i32
    %c0_i32_0 = arith.constant 0 : i32
    %c0_i32_1 = arith.constant 0 : i32
    return %c0_i32, %c0_i32_0 : i32, i32
  }
  func.func @transform_8(%arg0: i32) -> (i32, i32) {
    %c0_i32 = arith.constant 0 : i32
    %c0_i32_0 = arith.constant 0 : i32
    %c0_i32_1 = arith.constant 0 : i32
    return %c0_i32, %c0_i32_0 : i32, i32
  }
  func.func @transform_9(%arg0: i32) -> (i32, i32, i32) {
    %c0_i32 = arith.constant 0 : i32
    %c0_i32_0 = arith.constant 0 : i32
    %c0_i32_1 = arith.constant 0 : i32
    %c0_i32_2 = arith.constant 0 : i32
    return %c0_i32, %c0_i32_0, %c0_i32_1 : i32, i32, i32
  }
  func.func @transform_10(%arg0: i32) -> (i32, i32) {
    %c0_i32 = arith.constant 0 : i32
    %c0_i32_0 = arith.constant 0 : i32
    %c0_i32_1 = arith.constant 0 : i32
    return %c0_i32, %c0_i32_0 : i32, i32
  }
  func.func @transform_11(%arg0: i32) -> (i32, i32, i32) {
    %c0_i32 = arith.constant 0 : i32
    %c0_i32_0 = arith.constant 0 : i32
    %c0_i32_1 = arith.constant 0 : i32
    %c0_i32_2 = arith.constant 0 : i32
    return %c0_i32, %c0_i32_0, %c0_i32_1 : i32, i32, i32
  }
  func.func @transform_12(%arg0: i32) -> (i32, i32) {
    %c0_i32 = arith.constant 0 : i32
    %c0_i32_0 = arith.constant 0 : i32
    %c0_i32_1 = arith.constant 0 : i32
    return %c0_i32, %c0_i32_0 : i32, i32
  }
  func.func @transform_13(%arg0: i32) -> (i32, i32) {
    %c0_i32 = arith.constant 0 : i32
    %c0_i32_0 = arith.constant 0 : i32
    %c0_i32_1 = arith.constant 0 : i32
    return %c0_i32, %c0_i32_0 : i32, i32
  }
  func.func @transform_14(%arg0: i32) -> (i32, i32) {
    %c0_i32 = arith.constant 0 : i32
    %c0_i32_0 = arith.constant 0 : i32
    %c0_i32_1 = arith.constant 0 : i32
    return %c0_i32, %c0_i32_0 : i32, i32
  }
  func.func @transform_15(%arg0: i32) -> (i32, i32) {
    %c0_i32 = arith.constant 0 : i32
    %c0_i32_0 = arith.constant 0 : i32
    %c0_i32_1 = arith.constant 0 : i32
    return %c0_i32, %c0_i32_0 : i32, i32
  }
  func.func @transform_16(%arg0: i32) -> (i32, i32) {
    %c0_i32 = arith.constant 0 : i32
    %c0_i32_0 = arith.constant 0 : i32
    %c0_i32_1 = arith.constant 0 : i32
    return %c0_i32, %c0_i32_0 : i32, i32
  }
  func.func @transform_17(%arg0: i32) -> (i32, i32) {
    %c0_i32 = arith.constant 0 : i32
    %c0_i32_0 = arith.constant 0 : i32
    %c0_i32_1 = arith.constant 0 : i32
    return %c0_i32, %c0_i32_0 : i32, i32
  }
  func.func @transform_18(%arg0: i32) -> (i32, i32) {
    %c0_i32 = arith.constant 0 : i32
    %c0_i32_0 = arith.constant 0 : i32
    %c0_i32_1 = arith.constant 0 : i32
    return %c0_i32, %c0_i32_0 : i32, i32
  }
  func.func @transform_19(%arg0: i32) -> (i32, i32, i32) {
    %c0_i32 = arith.constant 0 : i32
    %c0_i32_0 = arith.constant 0 : i32
    %c0_i32_1 = arith.constant 0 : i32
    return %arg0, %c0_i32, %c0_i32_0 : i32, i32, i32
  }
}

</mosaic_0001>

<bundles_post_ra>
// kernel: actor_forward.2
= control target key start
LH: loop header
LB: loop body
LE: loop exit
PB: predicated region body
PF: predicated region fallthrough
CT: control target
= control target key end

     0   :  { %10 = vsyncpa [#allocation3], 0  ;;  %s206_s0 = inlined_call_operand.vmem [shape: f32[16,4], index: 0, kind: input, shape index: {}]   ;;  %s207_s1 = inlined_call_operand.hbm [shape: f32[1,4], index: 1, kind: input, shape index: {}]   ;;  %s208_s2 = inlined_call_operand.hbm [shape: f32[1,4], index: 2, kind: input, shape index: {}]   ;;  %s209_s3 = inlined_call_operand.vmem [shape: f32[1,4], index: 3, kind: output, shape index: {0}]   ;;  %s210_s4 = inlined_call_operand.vmem [shape: f32[1,4], index: 4, kind: output, shape index: {1}]  }
   0x1   :  { %11 = vsyncpa [#allocation5], 0  ;;  %s139_s15 = smov [#allocation2]   ;;  %s140_s17 = smov [#allocation4]  }
   0x2   :  { %s20_s16 = sshll.u32 %s139_s15, 4  ;;  %s30_s18 = sshll.u32 %s140_s17, 4  ;;  %s21_s16 = int_to_ptr.vmem [resolvable:$true] %s20_s16  ;;  %s31_s18 = int_to_ptr.vmem [resolvable:$true] %s30_s18 }
   0x3   :  { %s91_s21 = scalar_lea.hbm %s207_s1, 16 }
   0x4   :  { %p92_p0 = scmp.ne.s32.totalorder %s207_s1, %s91_s21  ;;  %p95_p1 = scmp.lt.u32.totalorder %s91_s21, %s207_s1 }
   0x6   :  { %p97_p2 = pnand %p95_p1, %p92_p0 }
   0x8   :  { %100 = shalt.err (!%p97_p2)
}
   0x9   :  { %s101_s26 = scalar_lea.vmem %s21_s16, 16  ;;  %s105_s27 = scalar_lea.vmem %s21_s16, 32 }
   0xa   :  { %p102_p3 = scmp.ne.s32.totalorder %s21_s16, %s101_s26  ;;  %p106_p4 = scmp.lt.s32.totalorder %s21_s16, %s21_s16 }
   0xb   :  { %p107_p5 = scmp.lt.s32.totalorder %s105_s27, %s101_s26 }
   0xd   :  { %p108_p6 = por %p107_p5, %p106_p4 }
   0xf   :  { %p109_p7 = pnand %p108_p6, %p102_p3 }
  0x11   :  { %112 = shalt.err (!%p109_p7)
}
  0x12   :  { %23 = dma.hbm_to_vmem [thread:$0]  %s207_s1, 16, %s21_s16, [#allocation3]  }
  0x13   :  { %s113_s6 = scalar_lea.hbm %s208_s2, 16 }
  0x14   :  { %p114_p8 = scmp.ne.s32.totalorder %s208_s2, %s113_s6  ;;  %p117_p9 = scmp.lt.u32.totalorder %s113_s6, %s208_s2 }
  0x16   :  { %p119_p10 = pnand %p117_p9, %p114_p8 }
  0x18   :  { %122 = shalt.err (!%p119_p10)
}
  0x19   :  { %s123_s11 = scalar_lea.vmem %s31_s18, 16  ;;  %s127_s12 = scalar_lea.vmem %s31_s18, 32 }
  0x1a   :  { %p124_p11 = scmp.ne.s32.totalorder %s31_s18, %s123_s11  ;;  %p128_p12 = scmp.lt.s32.totalorder %s31_s18, %s31_s18 }
  0x1b   :  { %p129_p13 = scmp.lt.s32.totalorder %s127_s12, %s123_s11 }
  0x1d   :  { %p130_p0 = por %p129_p13, %p128_p12 }
  0x1f   :  { %p131_p1 = pnand %p130_p0, %p124_p11 }
  0x21   :  { %134 = shalt.err (!%p131_p1)
}
  0x22   :  { %33 = dma.hbm_to_vmem [thread:$0]  %s208_s2, 16, %s31_s18, [#allocation5]  }
  0x23   :  { %135 = dma.done.wait [#allocation3], 16  }
  0x24   :  { %136 = vsyncadd [#allocation3], 4294967280 }
  0x25   :  { %137 = dma.done.wait [#allocation5], 16  }
  0x26   :  { %138 = vsyncadd [#allocation5], 4294967280  ;;  %vm42_vm0 = vcmask 31744   ;;  %v40_v0 = vld [vmem:[%s206_s0] sm:$0xff]  ;;  %v41_v1 = vld [vmem:[%s206_s0 + $0x8] sm:$0xff]  ;;  %vm71_vm1 = vcmask 24576  }
  0x27   :  { %v43_v2 = vsel %vm42_vm0, %v40_v0, 0.0  ;;  %v44_v3 = vsel %vm42_vm0, %v41_v1, 0.0  ;;  %v67_v27 = vld [vmem:[#allocation2] sm:$0x1]  ;;  %v73_v30 = vld [vmem:[#allocation4] sm:$0x1] }
  0x28   :  { %v45_v4 = vadd.f32 %v44_v3, %v43_v2 }
  0x2a   :  { %v46_v5 = vrot.slane %v45_v4, 4 }
  0x2c   :  { %v47_v6 = vadd.f32 %v46_v5, %v45_v4 }
  0x2e   :  { %v48_v7 = vrot.slane %v47_v6, 2 }
  0x30   :  { %v49_v8 = vadd.f32 %v48_v7, %v47_v6 }
  0x32   :  { %v50_v9 = vrot.slane %v49_v8, 1 }
  0x34   :  { %v51_v10 = vadd.f32 %v50_v9, %v49_v8 }
  0x36   :  { %v52_v11 = vmul.f32 0.0625, %v51_v10 }
  0x38   :  { %v53_v12 = vsub.f32 %v40_v0, %v52_v11  ;;  %v54_v13 = vsub.f32 %v41_v1, %v52_v11 }
  0x3a   :  { %v55_v14 = vmul.f32 %v53_v12, %v53_v12  ;;  %v56_v15 = vmul.f32 %v54_v13, %v54_v13 }
  0x3c   :  { %v57_v16 = vsel %vm42_vm0, %v55_v14, 0.0  ;;  %v58_v17 = vsel %vm42_vm0, %v56_v15, 0.0 }
  0x3d   :  { %v59_v18 = vadd.f32 %v58_v17, %v57_v16 }
  0x3f   :  { %v60_v19 = vrot.slane %v59_v18, 4 }
  0x41   :  { %v61_v20 = vadd.f32 %v60_v19, %v59_v18 }
  0x43   :  { %v62_v21 = vrot.slane %v61_v20, 2 }
  0x45   :  { %v63_v22 = vadd.f32 %v62_v21, %v61_v20 }
  0x47   :  { %v64_v23 = vrot.slane %v63_v22, 1 }
  0x49   :  { %v65_v24 = vadd.f32 %v64_v23, %v63_v22 }
  0x4b   :  { %v66_v25 = vmul.f32 0.0625, %v65_v24 }
  0x4d   :  { %v68_v26 = vadd.f32 1e-05, %v66_v25 }
  0x4f   :  { %89 = vrsqrt.f32 %v68_v26 }
  0x59   :  { %v90_v28 = vpop.eup %89 }
  0x5a   :  { %v70_v29 = vmul.f32 %v90_v28, %v67_v27 }
  0x5c   :  { %72 = vst.msk [vmem:[%s209_s3] sm:$0x1] %vm71_vm1, %v70_v29  ;;  %v74_v31 = vmul.f32 %v70_v29, %v52_v11 }
  0x5e   :  { %v75_v32 = vsub.f32 %v73_v30, %v74_v31 }
  0x60   :  { %76 = vst.msk [vmem:[%s210_s4] sm:$0x1] %vm71_vm1, %v75_v32 }
  0x61   :  { %85 = vsyncpa [#allocation3], 1 }
  0x62   :  { %86 = vsyncpa [#allocation5], 1 }

// kernel: actor_forward.3
= control target key start
LH: loop header
LB: loop body
LE: loop exit
PB: predicated region body
PF: predicated region fallthrough
CT: control target
= control target key end

     0   :  { %vm109_vm0 = vcmask 1041408   ;;  %vm83_vm1 = vcmask 31744   ;;  %v9676_v1 = vmov 0   ;;  %v9677_v4 = vmov 0.0   ;;  %s12283_s3 = inlined_call_operand.vmem [shape: bf16[7,4,256], index: 3, kind: input, shape index: {}]   ;;  %s12284_s0 = inlined_call_operand.vmem [shape: f32[2,8,4], index: 0, kind: input, shape index: {}]   ;;  %s12285_s1 = inlined_call_operand.vmem [shape: f32[1,4], index: 1, kind: input, shape index: {}]   ;;  %s12286_s2 = inlined_call_operand.vmem [shape: f32[1,4], index: 2, kind: input, shape index: {}]   ;;  %s12287_s5 = inlined_call_operand.vmem [shape: bf16[7,256,256], index: 5, kind: input, shape index: {}]   ;;  %s12288_s4 = inlined_call_operand.vmem [shape: f32[1,256], index: 4, kind: input, shape index: {}]   ;;  %s12289_s7 = inlined_call_operand.vmem [shape: bf16[4,256], index: 7, kind: input, shape index: {}]   ;;  %s12290_s9 = inlined_call_operand.vmem [shape: bf16[7,256,256], index: 9, kind: input, shape index: {}]   ;;  %s12291_s6 = inlined_call_operand.vmem [shape: f32[1,256], index: 6, kind: input, shape index: {}]   ;;  %s12292_s8 = inlined_call_operand.vmem [shape: f32[1,256], index: 8, kind: input, shape index: {}]   ;;  %s12293_s11 = inlined_call_operand.vmem [shape: bf16[7,256,256], index: 11, kind: input, shape index: {}]   ;;  %s12294_s10 = inlined_call_operand.vmem [shape: f32[1,256], index: 10, kind: input, shape index: {}]   ;;  %s12295_s13 = inlined_call_operand.vmem [shape: bf16[256,256], index: 13, kind: input, shape index: {}]   ;;  %s12296_s15 = inlined_call_operand.vmem [shape: bf16[256,256], index: 15, kind: input, shape index: {}]   ;;  %s12297_s12 = inlined_call_operand.vmem [shape: f32[1,256], index: 12, kind: input, shape index: {}]   ;;  %s12298_s17 = inlined_call_operand.vmem [shape: bf16[256,2], index: 17, kind: input, shape index: {}]   ;;  %s12299_s14 = inlined_call_operand.vmem [shape: f32[1,256], index: 14, kind: input, shape index: {}]   ;;  %s12300_s16 = inlined_call_operand.vmem [shape: f32[1,256], index: 16, kind: input, shape index: {}]   ;;  %s12301_s18 = inlined_call_operand.vmem [shape: f32[1,2], index: 18, kind: input, shape index: {}]   ;;  %s12302_s19 = inlined_call_operand.vmem [shape: f32[2,8,2], index: 19, kind: output, shape index: {}]  }
   0x1   :  { %12305 = sst [smem:[#allocation6_spill]] %s12283_s3  ;;  %275 = vmatprep.mubr.bf16.mxu0 %v9676_v1  ;;  %84 = vst.msk [vmem:[#allocation2] sm:$0xff] %vm83_vm1, %v9677_v4  ;;  %85 = vst.msk [vmem:[#allocation2 + $0x10] sm:$0xff] %vm83_vm1, %v9677_v4  ;;  %148 = vmatprep.mubr.bf16.mxu1 %v9676_v1  ;;  %v8553_v30 = vld [vmem:[%s12287_s5 + $0x204] ss:$8 sps:$4 sm:$0xff]   ;;  %vm681_vm2 = vcmask 1044480  }
   0x2   :  { %12306 = sst [smem:[#allocation7_spill]] %s12284_s0  ;;  %s12309_s20 = sld [smem:[#allocation6_spill]]  ;;  %590 = vst [vmem:[#allocation3] sm:$0xff] %v9677_v4  ;;  %591 = vst [vmem:[#allocation3 + $0x8] sm:$0xff] %v9677_v4  ;;  %v8551_v40 = vld [vmem:[%s12287_s5 + $0x200] ss:$8 sps:$4 sm:$0xff]  }
   0x3   :  { %12307 = sst [smem:[#allocation8_spill]] %s12285_s1  ;;  %s12310_s22 = sld [smem:[#allocation7_spill]]  ;;  %592 = vst [vmem:[#allocation3 + $0x20] sm:$0xff] %v9677_v4  ;;  %593 = vst [vmem:[#allocation3 + $0x28] sm:$0xff] %v9677_v4  ;;  %v8559_v41 = vld [vmem:[%s12287_s5 + $0x214] ss:$8 sps:$4 sm:$0xff]  }
   0x4   :  { %12308 = sst [smem:[#allocation9_spill]] %s12286_s2  ;;  %2587 = vst [vmem:[#allocation4] sm:$0xff] %v9677_v4  ;;  %2588 = vst [vmem:[#allocation4 + $0x8] sm:$0xff] %v9677_v4  ;;  %s12311_s27 = sld [smem:[#allocation8_spill]]  ;;  %v8557_v42 = vld [vmem:[%s12287_s5 + $0x210] ss:$8 sps:$4 sm:$0xff]  }
   0x5   :  { %2589 = vst [vmem:[#allocation4 + $0x10] sm:$0xff] %v9677_v4  ;;  %2590 = vst [vmem:[#allocation4 + $0x18] sm:$0xff] %v9677_v4  ;;  %s12312_s3 = sld [smem:[#allocation9_spill]]  ;;  %v8565_v43 = vld [vmem:[%s12287_s5 + $0x224] ss:$8 sps:$4 sm:$0xff]   ;;  %vm1155_vm3 = vcmask 1043456  }
   0x6   :  { %2591 = vst [vmem:[#allocation4 + $0x30] sm:$0xff] %v9677_v4  ;;  %2592 = vst [vmem:[#allocation4 + $0x38] sm:$0xff] %v9677_v4  ;;  %v8563_v47 = vld [vmem:[%s12287_s5 + $0x220] ss:$8 sps:$4 sm:$0xff]   ;;  %v8571_v48 = vld [vmem:[%s12287_s5 + $0x234] ss:$8 sps:$4 sm:$0xff]  }
   0x7   :  { %2593 = vst [vmem:[#allocation4 + $0x40] sm:$0xff] %v9677_v4  ;;  %2594 = vst [vmem:[#allocation4 + $0x48] sm:$0xff] %v9677_v4  ;;  %v8569_v50 = vld [vmem:[%s12287_s5 + $0x230] ss:$8 sps:$4 sm:$0xff]   ;;  %v8577_v53 = vld [vmem:[%s12287_s5 + $0x244] ss:$8 sps:$4 sm:$0xff]  }
   0x8   :  { %v7077_v0 = vld.sshfl [vmem:[%s12309_s20 + $0x8] sm:$0x33 pattern:$0x76325410]  ;;  %4472 = vst [vmem:[#allocation5] sm:$0xff] %v9677_v4  ;;  %4473 = vst [vmem:[#allocation5 + $0x8] sm:$0xff] %v9677_v4 }
   0x9   :  { %v63_v2 = vld [vmem:[%s12310_s22] sm:$0xff]  ;;  %v64_v3 = vld [vmem:[%s12310_s22 + $0x8] sm:$0xff]  ;;  %4474 = vst [vmem:[#allocation5 + $0x10] sm:$0xff] %v9677_v4  ;;  %4475 = vst [vmem:[#allocation5 + $0x18] sm:$0xff] %v9677_v4  ;;  %v233_v5 = vcombine.high %v7077_v0, %v7077_v0  ;;  %v238_v6 = vsel %vm109_vm0, %v7077_v0, 0  ;;  %vm614_vm4 = vcmask 1045504  }
   0xa   :  { %4476 = vst [vmem:[#allocation5 + $0x30] sm:$0xff] %v9677_v4  ;;  %4477 = vst [vmem:[#allocation5 + $0x38] sm:$0xff] %v9677_v4  ;;  %v7081_v7 = vld.sshfl [vmem:[%s12309_s20 + $0xc] sm:$0x33 pattern:$0x76325410] }
   0xb   :  { %4478 = vst [vmem:[#allocation5 + $0x40] sm:$0xff] %v9677_v4  ;;  %4479 = vst [vmem:[#allocation5 + $0x48] sm:$0xff] %v9677_v4  ;;  %v303_v8 = vcombine.high %v7081_v7, %v7081_v7  ;;  %v7067_v9 = vld [vmem:[%s12311_s27] ss:$0 sm:$0xff]  ;;  %7078 = vmatprep.subr.msk.bf16.mxu0 %vm109_vm0, %v233_v5  ;;  %v308_v24 = vsel %vm109_vm0, %v7081_v7, 0  ;;  %vm1430_vm5 = vcmask 1042432  }
   0xc   :  { %v7068_v10 = vld [vmem:[%s12312_s3] ss:$0 sm:$0xff]  ;;  %v72_v11 = vmul.f32 %v7067_v9, %v63_v2  ;;  %v73_v12 = vmul.f32 %v7067_v9, %v64_v3  ;;  %244 = vmatpush1.bf16.msra.mxu0 %v238_v6  ;;  %v7070_v13 = vld.sshfl [vmem:[%s12309_s20 + $0x4] sm:$0x33 pattern:$0x76325410] }
   0xd   :  { %7082 = vmatprep.subr.msk.bf16.mxu0 %vm109_vm0, %v303_v8  ;;  %v105_v16 = vcombine.high %v7070_v13, %v7070_v13  ;;  %v111_v17 = vsel %vm109_vm0, %v7070_v13, 0  ;;  %v7073_v18 = vld.sshfl [vmem:[%s12309_s20] sm:$0x33 pattern:$0x76325410]  ;;  %vm1979_vm6 = vcmask 1040384  }
   0xe   :  { %v9806_v14 = vadd.f32 %v7068_v10, %v72_v11  ;;  %v9808_v15 = vadd.f32 %v7068_v10, %v73_v12  ;;  %v167_v19 = vcombine.high %v7073_v18, %v7073_v18  ;;  %v7085_v20 = vld.sshfl [vmem:[%s12309_s20 + $0x10] sm:$0x33 pattern:$0x76325410]  ;;  %v172_v29 = vsel %vm109_vm0, %v7073_v18, 0 }
   0xf   :  { %7071 = vmatprep.subr.msk.bf16.mxu1 %vm109_vm0, %v105_v16  ;;  %v373_v25 = vcombine.high %v7085_v20, %v7085_v20  ;;  %v7089_v33 = vld.sshfl [vmem:[%s12309_s20 + $0x14] sm:$0x33 pattern:$0x76325410]  ;;  %v378_v37 = vsel %vm109_vm0, %v7085_v20, 0  ;;  %vm7060_vm8 = vcmask 15360  }
  0x10   :  { %86 = vst.msk [vmem:[#allocation2 + $0x8] sm:$0xff] %vm83_vm1, %v9806_v14  ;;  %87 = vst.msk [vmem:[#allocation2 + $0x18] sm:$0xff] %vm83_vm1, %v9808_v15  ;;  %117 = vmatpush1.bf16.msra.mxu1 %v111_v17  ;;  %v443_v38 = vcombine.high %v7089_v33, %v7089_v33  ;;  %v7093_v46 = vld.sshfl [vmem:[%s12309_s20 + $0x18] sm:$0x33 pattern:$0x76325410] }
  0x11   :  { %7074 = vmatprep.subr.msk.bf16.mxu1 %vm109_vm0, %v167_v19  ;;  %v448_v51 = vsel %vm109_vm0, %v7089_v33, 0  ;;  %v513_v52 = vcombine.high %v7093_v46, %v7093_v46  ;;  %v8575_v54 = vld [vmem:[%s12287_s5 + $0x240] ss:$8 sps:$4 sm:$0xff]   ;;  %v8583_v55 = vld [vmem:[%s12287_s5 + $0x254] ss:$8 sps:$4 sm:$0xff]   ;;  %v518_v63 = vsel %vm109_vm0, %v7093_v46, 0 }
  0x12   :  { %v8581_v58 = vld [vmem:[%s12287_s5 + $0x250] ss:$8 sps:$4 sm:$0xff]   ;;  %v8589_v59 = vld [vmem:[%s12287_s5 + $0x264] ss:$8 sps:$4 sm:$0xff]   ;;  %v8587_v62 = vld [vmem:[%s12287_s5 + $0x260] ss:$8 sps:$4 sm:$0xff]  }
  0x13   :  { %v8550_v61 = vld [vmem:[%s12287_s5 + $0x104] ss:$8 sps:$4 sm:$0xff]   ;;  %v8548_v3 = vld [vmem:[%s12287_s5 + $0x100] ss:$8 sps:$4 sm:$0xff]   ;;  %v8556_v5 = vld [vmem:[%s12287_s5 + $0x114] ss:$8 sps:$4 sm:$0xff]  }
  0x14   :  { %v8554_v6 = vld [vmem:[%s12287_s5 + $0x110] ss:$8 sps:$4 sm:$0xff]   ;;  %v8562_v7 = vld [vmem:[%s12287_s5 + $0x124] ss:$8 sps:$4 sm:$0xff]   ;;  %v8560_v8 = vld [vmem:[%s12287_s5 + $0x120] ss:$8 sps:$4 sm:$0xff]  }
  0x15   :  { %v8568_v9 = vld [vmem:[%s12287_s5 + $0x134] ss:$8 sps:$4 sm:$0xff]   ;;  %v8566_v10 = vld [vmem:[%s12287_s5 + $0x130] ss:$8 sps:$4 sm:$0xff]   ;;  %v8574_v11 = vld [vmem:[%s12287_s5 + $0x144] ss:$8 sps:$4 sm:$0xff]  }
  0x16   :  { %v8572_v12 = vld [vmem:[%s12287_s5 + $0x140] ss:$8 sps:$4 sm:$0xff]   ;;  %v8580_v13 = vld [vmem:[%s12287_s5 + $0x154] ss:$8 sps:$4 sm:$0xff]   ;;  %v8578_v16 = vld [vmem:[%s12287_s5 + $0x150] ss:$8 sps:$4 sm:$0xff]  }
  0x17   :  { %v220_v21 = vld [vmem:[#allocation2 + $0x4] sm:$0xff]  ;;  %v221_v22 = vld [vmem:[#allocation2 + $0x14] sm:$0xff] }
  0x18   :  { %v224_v23 = vpack.c.bf16 %v221_v22, %v220_v21  ;;  %v92_v26 = vld [vmem:[#allocation2 + $0x3] sm:$0xff]  ;;  %v93_v27 = vld [vmem:[#allocation2 + $0x13] sm:$0xff] }
  0x19   :  { %v96_v28 = vpack.c.bf16 %v93_v27, %v92_v26  ;;  %v290_v31 = vld [vmem:[#allocation2 + $0x5] sm:$0xff]  ;;  %v291_v32 = vld [vmem:[#allocation2 + $0x15] sm:$0xff] }
  0x1a   :  { %7079 = vmatmul.mubr.msk.bf16.vlgmr.msra.gmra.mrb[0].mxu0 %vm83_vm1, %v224_v23  ;;  %v88_v34 = vld [vmem:[#allocation2 + $0x2] sm:$0xff]  ;;  %v89_v35 = vld [vmem:[#allocation2 + $0x12] sm:$0xff]  ;;  %v294_v36 = vpack.c.bf16 %v291_v32, %v290_v31 }
  0x1b   :  { %314 = vmatpush1.bf16.msra.mxu0 %v308_v24  ;;  %345 = vmatprep.mubr.bf16.mxu0 %v9676_v1  ;;  %v91_v39 = vpack.c.bf16 %v89_v35, %v88_v34  ;;  %v360_v44 = vld [vmem:[#allocation2 + $0x6] sm:$0xff]  ;;  %v361_v45 = vld [vmem:[#allocation2 + $0x16] sm:$0xff] }
  0x1c   :  { %7086 = vmatprep.subr.msk.bf16.mxu0 %vm109_vm0, %v373_v25  ;;  %7072 = vmatmul.mubr.msk.bf16.vlgmr.msra.gmra.mrb[0].mxu1 %vm83_vm1, %v96_v28  ;;  %v364_v49 = vpack.c.bf16 %v361_v45, %v360_v44  ;;  %v430_v56 = vld [vmem:[#allocation2 + $0x7] sm:$0xff]  ;;  %v431_v57 = vld [vmem:[#allocation2 + $0x17] sm:$0xff] }
  0x1d   :  { %178 = vmatpush1.bf16.msra.mxu1 %v172_v29  ;;  %209 = vmatprep.mubr.bf16.mxu1 %v9676_v1  ;;  %v434_v60 = vpack.c.bf16 %v431_v57, %v430_v56  ;;  %v500_v0 = vld [vmem:[#allocation2 + $0x8] sm:$0xff]  ;;  %v501_v2 = vld [vmem:[#allocation2 + $0x18] sm:$0xff] }
  0x1e   :  { %1367 = vmatprep.subr.bf16.mxu1 %v8553_v30  ;;  %v504_v4 = vpack.c.bf16 %v501_v2, %v500_v0  ;;  %v8586_v17 = vld [vmem:[%s12287_s5 + $0x164] ss:$8 sps:$4 sm:$0xff]   ;;  %v8584_v18 = vld [vmem:[%s12287_s5 + $0x160] ss:$8 sps:$4 sm:$0xff]   ;;  %v8590_v19 = vld [vmem:[%s12287_s5 + $0x170] ss:$8 sps:$4 sm:$0xff]  }
  0x1f   :  { %v8592_v20 = vld [vmem:[%s12287_s5 + $0x174] ss:$8 sps:$4 sm:$0xff]   ;;  %v8593_v21 = vld [vmem:[%s12287_s5 + $0x270] ss:$8 sps:$4 sm:$0xff]   ;;  %v8598_v23 = vld [vmem:[%s12287_s5 + $0x184] ss:$8 sps:$4 sm:$0xff]  }
  0x20   :  { %v8595_v22 = vld [vmem:[%s12287_s5 + $0x274] ss:$8 sps:$4 sm:$0xff]   ;;  %v8601_v24 = vld [vmem:[%s12287_s5 + $0x284] ss:$8 sps:$4 sm:$0xff]   ;;  %v8596_v25 = vld [vmem:[%s12287_s5 + $0x180] ss:$8 sps:$4 sm:$0xff]  }
  0x21   :  { %v8599_v26 = vld [vmem:[%s12287_s5 + $0x280] ss:$8 sps:$4 sm:$0xff]   ;;  %v8604_v27 = vld [vmem:[%s12287_s5 + $0x194] ss:$8 sps:$4 sm:$0xff]   ;;  %v8602_v29 = vld [vmem:[%s12287_s5 + $0x190] ss:$8 sps:$4 sm:$0xff]  }
  0x22   :  { %v8607_v28 = vld [vmem:[%s12287_s5 + $0x294] ss:$8 sps:$4 sm:$0xff]   ;;  %v8605_v30 = vld [vmem:[%s12287_s5 + $0x290] ss:$8 sps:$4 sm:$0xff]   ;;  %v8610_v31 = vld [vmem:[%s12287_s5 + $0x1a4] ss:$8 sps:$4 sm:$0xff]  }
  0x23   :  { %v8613_v32 = vld [vmem:[%s12287_s5 + $0x2a4] ss:$8 sps:$4 sm:$0xff]   ;;  %v8608_v33 = vld [vmem:[%s12287_s5 + $0x1a0] ss:$8 sps:$4 sm:$0xff]   ;;  %v8616_v35 = vld [vmem:[%s12287_s5 + $0x1b4] ss:$8 sps:$4 sm:$0xff]  }
  0x24   :  { %v8611_v34 = vld [vmem:[%s12287_s5 + $0x2a0] ss:$8 sps:$4 sm:$0xff]   ;;  %v8631_v44 = vld [vmem:[%s12287_s5 + $0x2d4] ss:$8 sps:$4 sm:$0xff]   ;;  %v8626_v45 = vld [vmem:[%s12287_s5 + $0x1d0] ss:$8 sps:$4 sm:$0xff]  }
  0x25   :  { %v8629_v46 = vld [vmem:[%s12287_s5 + $0x2d0] ss:$8 sps:$4 sm:$0xff]   ;;  %v8649_v56 = vld [vmem:[%s12287_s5 + $0x304] ss:$8 sps:$4 sm:$0xff]   ;;  %v570_v0 = vld [vmem:[%s12288_s4] sm:$0x3] }
  0x26   :  { %7083 = vmatmul.mubr.msk.bf16.vlgmr.msra.gmra.mrb[0].mxu0 %vm83_vm1, %v294_v36  ;;  %v8619_v36 = vld [vmem:[%s12287_s5 + $0x2b4] ss:$8 sps:$4 sm:$0xff]  }
  0x27   :  { %384 = vmatpush1.bf16.msra.mxu0 %v378_v37  ;;  %415 = vmatprep.mubr.bf16.mxu0 %v9676_v1  ;;  %v8614_v37 = vld [vmem:[%s12287_s5 + $0x1b0] ss:$8 sps:$4 sm:$0xff]  }
  0x28   :  { %7090 = vmatprep.subr.msk.bf16.mxu0 %vm109_vm0, %v443_v38  ;;  %7075 = vmatmul.mubr.msk.bf16.vlgmr.msra.gmra.mrb[0].mxu1 %vm83_vm1, %v91_v39  ;;  %v8617_v38 = vld [vmem:[%s12287_s5 + $0x2b0] ss:$8 sps:$4 sm:$0xff]   ;;  %v8622_v39 = vld [vmem:[%s12287_s5 + $0x1c4] ss:$8 sps:$4 sm:$0xff]  }
  0x29   :  { %1368 = vmatpush1.bf16.msra.mxu1 %v8551_v40  ;;  %v8625_v40 = vld [vmem:[%s12287_s5 + $0x2c4] ss:$8 sps:$4 sm:$0xff]  }
  0x2a   :  { %1369 = vmatprep.subr.bf16.mxu1 %v8559_v41  ;;  %v8620_v41 = vld [vmem:[%s12287_s5 + $0x1c0] ss:$8 sps:$4 sm:$0xff]  }
  0x2d   :  { %1370 = vmatpush1.bf16.msra.mxu1 %v8557_v42  ;;  %v8623_v42 = vld [vmem:[%s12287_s5 + $0x2c0] ss:$8 sps:$4 sm:$0xff]  }
  0x2e   :  { %1371 = vmatprep.subr.bf16.mxu1 %v8565_v43  ;;  %v8628_v43 = vld [vmem:[%s12287_s5 + $0x1d4] ss:$8 sps:$4 sm:$0xff]  }
  0x31   :  { %1372 = vmatpush1.bf16.msra.mxu1 %v8563_v47  ;;  %v8634_v47 = vld [vmem:[%s12287_s5 + $0x1e4] ss:$8 sps:$4 sm:$0xff]  }
  0x32   :  { %7087 = vmatmul.mubr.msk.bf16.vlgmr.msra.gmra.mrb[0].mxu0 %vm83_vm1, %v364_v49  ;;  %1373 = vmatprep.subr.bf16.mxu1 %v8571_v48  ;;  %v8637_v48 = vld [vmem:[%s12287_s5 + $0x2e4] ss:$8 sps:$4 sm:$0xff]   ;;  %v8632_v49 = vld [vmem:[%s12287_s5 + $0x1e0] ss:$8 sps:$4 sm:$0xff]  }
  0x33   :  { %454 = vmatpush1.bf16.msra.mxu0 %v448_v51  ;;  %485 = vmatprep.mubr.bf16.mxu0 %v9676_v1  ;;  %v8640_v51 = vld [vmem:[%s12287_s5 + $0x1f4] ss:$8 sps:$4 sm:$0xff]  }
  0x34   :  { %7094 = vmatprep.subr.msk.bf16.mxu0 %vm109_vm0, %v513_v52  ;;  %v8643_v52 = vld [vmem:[%s12287_s5 + $0x2f4] ss:$8 sps:$4 sm:$0xff]  }
  0x35   :  { %1374 = vmatpush1.bf16.msra.mxu1 %v8569_v50  ;;  %v8635_v50 = vld [vmem:[%s12287_s5 + $0x2e0] ss:$8 sps:$4 sm:$0xff]  }
  0x36   :  { %1375 = vmatprep.subr.bf16.mxu1 %v8577_v53  ;;  %v8638_v53 = vld [vmem:[%s12287_s5 + $0x1f0] ss:$8 sps:$4 sm:$0xff]  }
  0x39   :  { %1376 = vmatpush1.bf16.msra.mxu1 %v8575_v54  ;;  %v8641_v54 = vld [vmem:[%s12287_s5 + $0x2f0] ss:$8 sps:$4 sm:$0xff]  }
  0x3a   :  { %1377 = vmatprep.subr.bf16.mxu1 %v8583_v55  ;;  %v8646_v55 = vld [vmem:[%s12287_s5 + $0x4] ss:$8 sps:$4 sm:$0xff]  }
  0x3d   :  { %1378 = vmatpush1.bf16.msra.mxu1 %v8581_v58 }
  0x3e   :  { %7091 = vmatmul.mubr.msk.bf16.vlgmr.msra.gmra.mrb[0].mxu0 %vm83_vm1, %v434_v60  ;;  %1379 = vmatprep.subr.bf16.mxu1 %v8589_v59 }
  0x3f   :  { %524 = vmatpush1.bf16.msra.mxu0 %v518_v63  ;;  %555 = vmatprep.mubr.bf16.mxu0 %v9676_v1 }
  0x40   :  { %893 = vmatprep.subr.bf16.mxu0 %v8550_v61  ;;  %v572_v61 = vlaneseq }
  0x41   :  { %1380 = vmatpush1.bf16.msra.mxu1 %v8587_v62 }
  0x42   :  { %1381 = vmatprep.subr.bf16.mxu1 %v8595_v22  ;;  %v573_v62 = vshrl.u32 %v572_v61, 7  ;;  %v666_v22 = vld [vmem:[#allocation3 + $0x8] sm:$0xf8] }
  0x44   :  { %v10048_v63 = vsub.s32 0, %v573_v62  ;;  %v10053_v2 = vsub.s32 1, %v573_v62 }
  0x45   :  { %1382 = vmatpush1.bf16.msra.mxu1 %v8593_v21 }
  0x46   :  { %1383 = vmatprep.subr.bf16.mxu1 %v8601_v24  ;;  %v670_v24 = vld [vmem:[#allocation3 + $0x28] sm:$0xf8] }
  0x49   :  { %1384 = vmatpush1.bf16.msra.mxu1 %v8599_v26 }
  0x4a   :  { %7095 = vmatmul.mubr.msk.bf16.vlgmr.msra.gmra.mrb[0].mxu0 %vm83_vm1, %v504_v4  ;;  %1385 = vmatprep.subr.bf16.mxu1 %v8607_v28 }
  0x4b   :  { %894 = vmatpush1.bf16.msra.mxu0 %v8548_v3  ;;  %v575_v3 = vrot.slane %v570_v0, %v10048_v63 }
  0x4c   :  { %895 = vmatprep.subr.bf16.mxu0 %v8556_v5  ;;  %v579_v5 = vrot.slane %v570_v0, %v10053_v2 }
  0x4d   :  { %1386 = vmatpush1.bf16.msra.mxu1 %v8605_v30  ;;  %v1139_v30 = vld [vmem:[#allocation3] sm:$0xf0] }
  0x4e   :  { %1387 = vmatprep.subr.bf16.mxu1 %v8613_v32  ;;  %v685_v32 = vrot.slane %v666_v22, 3 }
  0x4f   :  { %896 = vmatpush1.bf16.msra.mxu0 %v8554_v6 }
  0x50   :  { %897 = vmatprep.subr.bf16.mxu0 %v8562_v7 }
  0x51   :  { %1388 = vmatpush1.bf16.msra.mxu1 %v8611_v34  ;;  %v10057_v34 = vld [vmem:[#allocation3 + $0x8] sm:$0xe0] }
  0x52   :  { %1389 = vmatprep.subr.bf16.mxu1 %v8619_v36 }
  0x53   :  { %898 = vmatpush1.bf16.msra.mxu0 %v8560_v8 }
  0x54   :  { %899 = vmatprep.subr.bf16.mxu0 %v8568_v9 }
  0x55   :  { %1390 = vmatpush1.bf16.msra.mxu1 %v8617_v38  ;;  %v1419_v38 = vld [vmem:[#allocation3 + $0x28] sm:$0xe0] }
  0x56   :  { %1391 = vmatprep.subr.bf16.mxu1 %v8625_v40 }
  0x57   :  { %900 = vmatpush1.bf16.msra.mxu0 %v8566_v10 }
  0x58   :  { %901 = vmatprep.subr.bf16.mxu0 %v8574_v11 }
  0x59   :  { %1392 = vmatpush1.bf16.msra.mxu1 %v8623_v42 }
  0x5a   :  { %1393 = vmatprep.subr.bf16.mxu1 %v8631_v44  ;;  %v1434_v44 = vrot.slane %v10057_v34, 5 }
  0x5b   :  { %902 = vmatpush1.bf16.msra.mxu0 %v8572_v12 }
  0x5c   :  { %903 = vmatprep.subr.bf16.mxu0 %v8580_v13 }
  0x5d   :  { %1394 = vmatpush1.bf16.msra.mxu1 %v8629_v46 }
  0x5e   :  { %1395 = vmatprep.subr.bf16.mxu1 %v8637_v48  ;;  %v1440_v48 = vrot.slane %v1419_v38, 5  ;;  %v8661_v38 = vld [vmem:[%s12287_s5 + $0x324] ss:$8 sps:$4 sm:$0xff]  }
  0x5f   :  { %904 = vmatpush1.bf16.msra.mxu0 %v8578_v16 }
  0x60   :  { %905 = vmatprep.subr.bf16.mxu0 %v8586_v17 }
  0x61   :  { %1396 = vmatpush1.bf16.msra.mxu1 %v8635_v50 }
  0x62   :  { %1397 = vmatprep.subr.bf16.mxu1 %v8643_v52 }
  0x63   :  { %906 = vmatpush1.bf16.msra.mxu0 %v8584_v18 }
  0x64   :  { %907 = vmatprep.subr.bf16.mxu0 %v8592_v20 }
  0x65   :  { %1398 = vmatpush1.bf16.msra.mxu1 %v8641_v54 }
  0x66   :  { %1642 = vmatprep.subr.bf16.mxu1 %v8649_v56 }
  0x67   :  { %908 = vmatpush1.bf16.msra.mxu0 %v8590_v19  ;;  %v665_v19 = vld [vmem:[#allocation3] sm:$0xf8] }
  0x68   :  { %909 = vmatprep.subr.bf16.mxu0 %v8598_v23  ;;  %v682_v28 = vrot.slane %v665_v19, 3  ;;  %v8644_v19 = vld [vmem:[%s12287_s5] ss:$8 sps:$4 sm:$0xff]  }
  0x6b   :  { %910 = vmatpush1.bf16.msra.mxu0 %v8596_v25  ;;  %v1140_v25 = vld [vmem:[#allocation3 + $0x8] sm:$0xf0] }
  0x6c   :  { %911 = vmatprep.subr.bf16.mxu0 %v8604_v27  ;;  %v669_v27 = vld [vmem:[#allocation3 + $0x20] sm:$0xf8] }
  0x6d   :  { %v688_v36 = vrot.slane %v669_v27, 3 }
  0x6f   :  { %912 = vmatpush1.bf16.msra.mxu0 %v8602_v29  ;;  %v1144_v29 = vld [vmem:[#allocation3 + $0x28] sm:$0xf0] }
  0x70   :  { %913 = vmatprep.subr.bf16.mxu0 %v8610_v31  ;;  %v1143_v31 = vld [vmem:[#allocation3 + $0x20] sm:$0xf0]  ;;  %v1165_v40 = vrot.slane %v1144_v29, 4 }
  0x71   :  { %v1162_v42 = vrot.slane %v1143_v31, 4 }
  0x73   :  { %914 = vmatpush1.bf16.msra.mxu0 %v8608_v33  ;;  %v599_v33 = vld [vmem:[#allocation3 + $0x8] sm:$0xfc] }
  0x74   :  { %915 = vmatprep.subr.bf16.mxu0 %v8616_v35  ;;  %v1159_v35 = vrot.slane %v1140_v25, 4 }
  0x77   :  { %916 = vmatpush1.bf16.msra.mxu0 %v8614_v37  ;;  %v603_v37 = vld [vmem:[#allocation3 + $0x28] sm:$0xfc] }
  0x78   :  { %917 = vmatprep.subr.bf16.mxu0 %v8622_v39  ;;  %v691_v39 = vrot.slane %v670_v24, 3 }
  0x7b   :  { %918 = vmatpush1.bf16.msra.mxu0 %v8620_v41  ;;  %v1156_v41 = vrot.slane %v1139_v30, 4  ;;  %v8655_v30 = vld [vmem:[%s12287_s5 + $0x314] ss:$8 sps:$4 sm:$0xff]  }
  0x7c   :  { %919 = vmatprep.subr.bf16.mxu0 %v8628_v43  ;;  %v618_v43 = vrot.slane %v599_v33, 2 }
  0x7f   :  { %920 = vmatpush1.bf16.msra.mxu0 %v8626_v45 }
  0x80   :  { %921 = vmatprep.subr.bf16.mxu0 %v8634_v47  ;;  %v624_v47 = vrot.slane %v603_v37, 2  ;;  %v8658_v37 = vld [vmem:[%s12287_s5 + $0x24] ss:$8 sps:$4 sm:$0xff]  }
  0x83   :  { %922 = vmatpush1.bf16.msra.mxu0 %v8632_v49 }
  0x84   :  { %923 = vmatprep.subr.bf16.mxu0 %v8640_v51 }
  0x87   :  { %924 = vmatpush1.bf16.msra.mxu0 %v8638_v53 }
  0x88   :  { %1096 = vmatprep.subr.bf16.mxu0 %v8646_v55 }
  0xfb   :  { %v211_v57 = vpop.f32.mrb[0].mxu1 }
  0xfc   :  { %v213_v58 = vpop.f32.mrb[1].mxu1 }
  0xfd   :  { %v215_v59 = vpop.f32.mrb[2].mxu1 }
  0xfe   :  { %v217_v60 = vpop.f32.mrb[3].mxu1 }
 0x11d   :  { %v557_v4 = vpop.f32.mrb[0].mxu0 }
 0x11e   :  { %v8450_v6 = vadd.f32 %v557_v4, %v211_v57  ;;  %v559_v7 = vpop.f32.mrb[1].mxu0 }
 0x11f   :  { %v8451_v8 = vadd.f32 %v559_v7, %v213_v58  ;;  %v561_v9 = vpop.f32.mrb[2].mxu0 }
 0x120   :  { %v582_v10 = vadd.f32 %v8450_v6, %v575_v3  ;;  %v8452_v11 = vadd.f32 %v561_v9, %v215_v59  ;;  %v563_v12 = vpop.f32.mrb[3].mxu0 }
 0x121   :  { %v583_v13 = vadd.f32 %v8451_v8, %v579_v5  ;;  %v8453_v16 = vadd.f32 %v563_v12, %v217_v60 }
 0x122   :  { %v586_v17 = vmax.f32 %v582_v10, 0.0  ;;  %v584_v18 = vadd.f32 %v8452_v11, %v575_v3 }
 0x123   :  { %v587_v20 = vmax.f32 %v583_v13, 0.0  ;;  %v585_v21 = vadd.f32 %v8453_v16, %v579_v5 }
 0x124   :  { %594 = vst [vmem:[#allocation3 + $0x10] sm:$0xff] %v586_v17  ;;  %v588_v23 = vmax.f32 %v584_v18, 0.0 }
 0x125   :  { %595 = vst [vmem:[#allocation3 + $0x18] sm:$0xff] %v587_v20  ;;  %v589_v26 = vmax.f32 %v585_v21, 0.0  ;;  %v8647_v21 = vld [vmem:[%s12287_s5 + $0x300] ss:$8 sps:$4 sm:$0xff]  }
 0x126   :  { %596 = vst [vmem:[#allocation3 + $0x30] sm:$0xff] %v588_v23 }
 0x127   :  { %597 = vst [vmem:[#allocation3 + $0x38] sm:$0xff] %v589_v26 }
 0x12b   :  { %v667_v45 = vld [vmem:[#allocation3 + $0x10] sm:$0x7] }
 0x12c   :  { %v1141_v46 = vld [vmem:[#allocation3 + $0x10] sm:$0xf]  ;;  %v668_v49 = vld [vmem:[#allocation3 + $0x18] sm:$0x7]  ;;  %v683_v51 = vrot.slane %v667_v45, 3 }
 0x12d   :  { %v1142_v50 = vld [vmem:[#allocation3 + $0x18] sm:$0xf]  ;;  %v1157_v52 = vrot.slane %v1141_v46, 4  ;;  %v686_v53 = vrot.slane %v668_v49, 3  ;;  %v671_v55 = vld [vmem:[#allocation3 + $0x30] sm:$0x7] }
 0x12e   :  { %v1160_v54 = vrot.slane %v1142_v50, 4  ;;  %v1145_v56 = vld [vmem:[#allocation3 + $0x30] sm:$0xf]  ;;  %v672_v57 = vld [vmem:[#allocation3 + $0x38] sm:$0x7]  ;;  %v689_v59 = vrot.slane %v671_v55, 3  ;;  %v684_v3 = vsel %vm681_vm2, %v682_v28, %v683_v51 }
 0x12f   :  { %v1146_v58 = vld [vmem:[#allocation3 + $0x38] sm:$0xf]  ;;  %v1163_v60 = vrot.slane %v1145_v56, 4  ;;  %v692_v62 = vrot.slane %v672_v57, 3  ;;  %v687_v12 = vsel %vm681_vm2, %v685_v32, %v686_v53  ;;  %v1158_v22 = vsel %vm1155_vm3, %v1156_v41, %v1157_v52  ;;  %v8652_v28 = vld [vmem:[%s12287_s5 + $0x14] ss:$8 sps:$4 sm:$0xff]  }
 0x130   :  { %v1166_v0 = vrot.slane %v1146_v58, 4  ;;  %v601_v4 = vld [vmem:[#allocation3 + $0x18] sm:$0x3]  ;;  %v690_v6 = vsel %vm681_vm2, %v688_v36, %v689_v59  ;;  %v1161_v16 = vsel %vm1155_vm3, %v1159_v35, %v1160_v54  ;;  %v8664_v41 = vld [vmem:[%s12287_s5 + $0x34] ss:$8 sps:$4 sm:$0xff]  }
 0x131   :  { %v605_v5 = vld [vmem:[#allocation3 + $0x38] sm:$0x3]  ;;  %v1164_v7 = vsel %vm1155_vm3, %v1162_v42, %v1163_v60  ;;  %v619_v8 = vrot.slane %v601_v4, 2  ;;  %v693_v13 = vsel %vm681_vm2, %v691_v39, %v692_v62  ;;  %v731_v24 = vpack.c.bf16 %v690_v6, %v684_v3  ;;  %v8656_v39 = vld [vmem:[%s12287_s5 + $0x20] ss:$8 sps:$4 sm:$0xff]  }
 0x132   :  { %v625_v9 = vrot.slane %v605_v5, 2  ;;  %v1417_v10 = vld [vmem:[#allocation3 + $0x18] sm:$0x1f]  ;;  %v1167_v17 = vsel %vm1155_vm3, %v1165_v40, %v1166_v0  ;;  %v732_v18 = vpack.c.bf16 %v693_v13, %v687_v12  ;;  %v1205_v25 = vpack.c.bf16 %v1164_v7, %v1158_v22  ;;  %v8659_v40 = vld [vmem:[%s12287_s5 + $0x320] ss:$8 sps:$4 sm:$0xff]  }
 0x133   :  { %v1421_v11 = vld [vmem:[#allocation3 + $0x38] sm:$0x1f]  ;;  %v1206_v20 = vpack.c.bf16 %v1167_v17, %v1161_v16  ;;  %v1435_v26 = vrot.slane %v1417_v10, 5  ;;  %v620_v29 = vsel %vm614_vm4, %v618_v43, %v619_v8  ;;  %v8670_v45 = vld [vmem:[%s12287_s5 + $0x44] ss:$8 sps:$4 sm:$0xff]  }
 0x134   :  { %v626_v23 = vsel %vm614_vm4, %v624_v47, %v625_v9  ;;  %v1441_v27 = vrot.slane %v1421_v11, 5  ;;  %925 = vmatprep.mubr.bf16.mxu0 %v732_v18  ;;  %v8650_v35 = vld [vmem:[%s12287_s5 + $0x10] ss:$8 sps:$4 sm:$0xff]   ;;  %v8667_v42 = vld [vmem:[%s12287_s5 + $0x334] ss:$8 sps:$4 sm:$0xff]  }
 0x135   :  { %1399 = vmatprep.mubr.bf16.mxu1 %v1206_v20  ;;  %926 = vmatmul.mubr.bf16.vlgmr.msra.gmra.mrb[4].mxu0 %v731_v24  ;;  %v664_v31 = vpack.c.bf16 %v626_v23, %v620_v29  ;;  %v1436_v32 = vsel %vm1430_vm5, %v1434_v44, %v1435_v26  ;;  %v8653_v36 = vld [vmem:[%s12287_s5 + $0x310] ss:$8 sps:$4 sm:$0xff]   ;;  %v8673_v46 = vld [vmem:[%s12287_s5 + $0x344] ss:$8 sps:$4 sm:$0xff]   ;;  %v8668_v47 = vld [vmem:[%s12287_s5 + $0x40] ss:$8 sps:$4 sm:$0xff]  }
 0x136   :  { %1400 = vmatmul.mubr.bf16.vlgmr.msra.gmra.mrb[4].mxu1 %v1205_v25  ;;  %v1442_v33 = vsel %vm1430_vm5, %v1440_v48, %v1441_v27  ;;  %1097 = vmatpush1.bf16.msra.mxu0 %v8644_v19  ;;  %v8662_v43 = vld [vmem:[%s12287_s5 + $0x30] ss:$8 sps:$4 sm:$0xff]   ;;  %v8671_v48 = vld [vmem:[%s12287_s5 + $0x340] ss:$8 sps:$4 sm:$0xff]   ;;  %v8676_v49 = vld [vmem:[%s12287_s5 + $0x54] ss:$8 sps:$4 sm:$0xff]  }
 0x137   :  { %1643 = vmatpush1.bf16.msra.mxu1 %v8647_v21  ;;  %v1481_v34 = vpack.c.bf16 %v1442_v33, %v1436_v32  ;;  %1128 = vmatprep.mubr.bf16.mxu0 %v664_v31  ;;  %v8665_v44 = vld [vmem:[%s12287_s5 + $0x330] ss:$8 sps:$4 sm:$0xff]   ;;  %v8679_v50 = vld [vmem:[%s12287_s5 + $0x354] ss:$8 sps:$4 sm:$0xff]   ;;  %v8682_v53 = vld [vmem:[%s12287_s5 + $0x64] ss:$8 sps:$4 sm:$0xff]  }
 0x138   :  { %1098 = vmatprep.subr.bf16.mxu0 %v8652_v28  ;;  %1644 = vmatprep.subr.bf16.mxu1 %v8655_v30  ;;  %v8674_v51 = vld [vmem:[%s12287_s5 + $0x50] ss:$8 sps:$4 sm:$0xff]   ;;  %v8685_v54 = vld [vmem:[%s12287_s5 + $0x364] ss:$8 sps:$4 sm:$0xff]   ;;  %v8680_v55 = vld [vmem:[%s12287_s5 + $0x60] ss:$8 sps:$4 sm:$0xff]  }
 0x139   :  { %1674 = vmatprep.mubr.bf16.mxu1 %v1481_v34  ;;  %v8677_v52 = vld [vmem:[%s12287_s5 + $0x350] ss:$8 sps:$4 sm:$0xff]   ;;  %v8683_v56 = vld [vmem:[%s12287_s5 + $0x360] ss:$8 sps:$4 sm:$0xff]   ;;  %v8688_v57 = vld [vmem:[%s12287_s5 + $0x74] ss:$8 sps:$4 sm:$0xff]  }
 0x13a   :  { %1099 = vmatpush1.bf16.msra.mxu0 %v8650_v35  ;;  %v8691_v58 = vld [vmem:[%s12287_s5 + $0x374] ss:$8 sps:$4 sm:$0xff]   ;;  %v8686_v59 = vld [vmem:[%s12287_s5 + $0x70] ss:$8 sps:$4 sm:$0xff]   ;;  %v8694_v62 = vld [vmem:[%s12287_s5 + $0x84] ss:$8 sps:$4 sm:$0xff]  }
 0x13b   :  { %1645 = vmatpush1.bf16.msra.mxu1 %v8653_v36  ;;  %1100 = vmatprep.subr.bf16.mxu0 %v8658_v37  ;;  %v8689_v60 = vld [vmem:[%s12287_s5 + $0x370] ss:$8 sps:$4 sm:$0xff]   ;;  %v8697_v0 = vld [vmem:[%s12287_s5 + $0x384] ss:$8 sps:$4 sm:$0xff]   ;;  %v8692_v3 = vld [vmem:[%s12287_s5 + $0x80] ss:$8 sps:$4 sm:$0xff]  }
 0x13c   :  { %1646 = vmatprep.subr.bf16.mxu1 %v8661_v38  ;;  %v8695_v4 = vld [vmem:[%s12287_s5 + $0x380] ss:$8 sps:$4 sm:$0xff]   ;;  %v8700_v5 = vld [vmem:[%s12287_s5 + $0x94] ss:$8 sps:$4 sm:$0xff]   ;;  %v8698_v7 = vld [vmem:[%s12287_s5 + $0x90] ss:$8 sps:$4 sm:$0xff]  }
 0x13d   :  { %v8703_v6 = vld [vmem:[%s12287_s5 + $0x394] ss:$8 sps:$4 sm:$0xff]   ;;  %v8701_v8 = vld [vmem:[%s12287_s5 + $0x390] ss:$8 sps:$4 sm:$0xff]   ;;  %v8706_v9 = vld [vmem:[%s12287_s5 + $0xa4] ss:$8 sps:$4 sm:$0xff]  }
 0x13e   :  { %1101 = vmatpush1.bf16.msra.mxu0 %v8656_v39  ;;  %v8709_v10 = vld [vmem:[%s12287_s5 + $0x3a4] ss:$8 sps:$4 sm:$0xff]   ;;  %v8704_v11 = vld [vmem:[%s12287_s5 + $0xa0] ss:$8 sps:$4 sm:$0xff]   ;;  %v8712_v13 = vld [vmem:[%s12287_s5 + $0xb4] ss:$8 sps:$4 sm:$0xff]  }
 0x13f   :  { %1647 = vmatpush1.bf16.msra.mxu1 %v8659_v40  ;;  %1102 = vmatprep.subr.bf16.mxu0 %v8664_v41  ;;  %v8707_v12 = vld [vmem:[%s12287_s5 + $0x3a0] ss:$8 sps:$4 sm:$0xff]   ;;  %v8715_v16 = vld [vmem:[%s12287_s5 + $0x3b4] ss:$8 sps:$4 sm:$0xff]   ;;  %v8710_v17 = vld [vmem:[%s12287_s5 + $0xb0] ss:$8 sps:$4 sm:$0xff]  }
 0x140   :  { %1648 = vmatprep.subr.bf16.mxu1 %v8667_v42  ;;  %v8713_v18 = vld [vmem:[%s12287_s5 + $0x3b0] ss:$8 sps:$4 sm:$0xff]   ;;  %v8718_v19 = vld [vmem:[%s12287_s5 + $0xc4] ss:$8 sps:$4 sm:$0xff]   ;;  %v8716_v21 = vld [vmem:[%s12287_s5 + $0xc0] ss:$8 sps:$4 sm:$0xff]  }
 0x141   :  { %v8721_v20 = vld [vmem:[%s12287_s5 + $0x3c4] ss:$8 sps:$4 sm:$0xff]   ;;  %v8719_v22 = vld [vmem:[%s12287_s5 + $0x3c0] ss:$8 sps:$4 sm:$0xff]   ;;  %v8724_v23 = vld [vmem:[%s12287_s5 + $0xd4] ss:$8 sps:$4 sm:$0xff]  }
 0x142   :  { %1103 = vmatpush1.bf16.msra.mxu0 %v8662_v43  ;;  %v8727_v24 = vld [vmem:[%s12287_s5 + $0x3d4] ss:$8 sps:$4 sm:$0xff]   ;;  %v602_v25 = vld [vmem:[#allocation3 + $0x20] sm:$0xfc]  ;;  %v8722_v27 = vld [vmem:[%s12287_s5 + $0xd0] ss:$8 sps:$4 sm:$0xff]  }
 0x143   :  { %1649 = vmatpush1.bf16.msra.mxu1 %v8665_v44  ;;  %1104 = vmatprep.subr.bf16.mxu0 %v8670_v45  ;;  %v1418_v26 = vld [vmem:[#allocation3 + $0x20] sm:$0xe0]  ;;  %v8725_v28 = vld [vmem:[%s12287_s5 + $0x3d0] ss:$8 sps:$4 sm:$0xff]   ;;  %v621_v32 = vrot.slane %v602_v25, 2 }
 0x144   :  { %1650 = vmatprep.subr.bf16.mxu1 %v8673_v46  ;;  %v8730_v29 = vld [vmem:[%s12287_s5 + $0xe4] ss:$8 sps:$4 sm:$0xff]   ;;  %v1437_v34 = vrot.slane %v1418_v26, 5  ;;  %v8728_v36 = vld [vmem:[%s12287_s5 + $0xe0] ss:$8 sps:$4 sm:$0xff]  }
 0x145   :  { %v8733_v30 = vld [vmem:[%s12287_s5 + $0x3e4] ss:$8 sps:$4 sm:$0xff]   ;;  %v604_v37 = vld [vmem:[#allocation3 + $0x30] sm:$0x3]  ;;  %v8731_v39 = vld [vmem:[%s12287_s5 + $0x3e0] ss:$8 sps:$4 sm:$0xff]  }
 0x146   :  { %1105 = vmatpush1.bf16.msra.mxu0 %v8668_v47  ;;  %v598_v31 = vld [vmem:[#allocation3] sm:$0xfc]  ;;  %v1694_v35 = vld [vmem:[#allocation3 + $0x28] sm:$0xc0]  ;;  %v1420_v38 = vld [vmem:[#allocation3 + $0x30] sm:$0x1f] }
 0x147   :  { %1651 = vmatpush1.bf16.msra.mxu1 %v8671_v48  ;;  %1106 = vmatprep.subr.bf16.mxu0 %v8676_v49  ;;  %v1414_v33 = vld [vmem:[#allocation3] sm:$0xe0]  ;;  %v8736_v40 = vld [vmem:[%s12287_s5 + $0xf4] ss:$8 sps:$4 sm:$0xff]   ;;  %v600_v43 = vld [vmem:[#allocation3 + $0x10] sm:$0x3] }
 0x148   :  { %1652 = vmatprep.subr.bf16.mxu1 %v8679_v50  ;;  %v1696_v41 = vld [vmem:[#allocation3 + $0x38] sm:$0x3f]  ;;  %v1416_v44 = vld [vmem:[#allocation3 + $0x10] sm:$0x1f]  ;;  %v622_v45 = vrot.slane %v604_v37, 2  ;;  %v1438_v46 = vrot.slane %v1420_v38, 5  ;;  %v2505_v37 = vpack.c.bf16 %v9808_v15, %v9806_v14 }
 0x149   :  { %v8739_v42 = vld [vmem:[%s12287_s5 + $0x3f4] ss:$8 sps:$4 sm:$0xff]   ;;  %v1690_v47 = vld [vmem:[#allocation3 + $0x8] sm:$0xc0]  ;;  %v615_v49 = vrot.slane %v598_v31, 2  ;;  %v1431_v50 = vrot.slane %v1414_v33, 5 }
 0x14a   :  { %1107 = vmatpush1.bf16.msra.mxu0 %v8674_v51  ;;  %v1692_v48 = vld [vmem:[#allocation3 + $0x18] sm:$0x3f]  ;;  %v1714_v51 = vrot.slane %v1694_v35, 6  ;;  %v8766_v25 = vld [vmem:[%s12287_s5 + $0x484] ss:$8 sps:$4 sm:$0xff]  }
 0x14b   :  { %1653 = vmatpush1.bf16.msra.mxu1 %v8677_v52  ;;  %1108 = vmatprep.subr.bf16.mxu0 %v8682_v53  ;;  %v1715_v52 = vrot.slane %v1696_v41, 6  ;;  %v8734_v53 = vld [vmem:[%s12287_s5 + $0xf0] ss:$8 sps:$4 sm:$0xff]   ;;  %v8764_v26 = vld [vmem:[%s12287_s5 + $0x480] ss:$8 sps:$4 sm:$0xff]  }
 0x14c   :  { %1654 = vmatprep.subr.bf16.mxu1 %v8685_v54  ;;  %v8737_v54 = vld [vmem:[%s12287_s5 + $0x3f0] ss:$8 sps:$4 sm:$0xff]   ;;  %v8775_v31 = vld [vmem:[%s12287_s5 + $0x4b4] ss:$8 sps:$4 sm:$0xff]   ;;  %v8776_v38 = vld [vmem:[%s12287_s5 + $0x4c0] ss:$8 sps:$4 sm:$0xff]  }
 0x14d   :  { %v8773_v35 = vld [vmem:[%s12287_s5 + $0x4b0] ss:$8 sps:$4 sm:$0xff]   ;;  %v8874_v14 = vld [vmem:[%s12290_s9 + $0x104] ss:$8 sps:$4 sm:$0xff]  }
 0x14e   :  { %1109 = vmatpush1.bf16.msra.mxu0 %v8680_v55  ;;  %v616_v55 = vrot.slane %v600_v43, 2  ;;  %v8779_v15 = vld [vmem:[%s12287_s5 + $0x4d0] ss:$8 sps:$4 sm:$0xff]   ;;  %v8784_v41 = vld [vmem:[%s12287_s5 + $0x4e4] ss:$8 sps:$4 sm:$0xff]  }
 0x14f   :  { %1655 = vmatpush1.bf16.msra.mxu1 %v8683_v56  ;;  %1110 = vmatprep.subr.bf16.mxu0 %v8688_v57  ;;  %v1432_v56 = vrot.slane %v1416_v44, 5  ;;  %v8742_v57 = vld [vmem:[%s12287_s5 + $0x404] ss:$8 sps:$4 sm:$0xff]   ;;  %v1695_v44 = vld [vmem:[#allocation3 + $0x30] sm:$0x3f] }
 0x150   :  { %1656 = vmatprep.subr.bf16.mxu1 %v8691_v58  ;;  %v1708_v58 = vrot.slane %v1690_v47, 6  ;;  %v1693_v43 = vld [vmem:[#allocation3 + $0x20] sm:$0xc0]  ;;  %v1968_v47 = vld [vmem:[#allocation3 + $0x28] sm:$0x80] }
 0x152   :  { %1111 = vmatpush1.bf16.msra.mxu0 %v8686_v59  ;;  %v1709_v59 = vrot.slane %v1692_v48, 6  ;;  %v8787_v48 = vld [vmem:[%s12287_s5 + $0x4f4] ss:$8 sps:$4 sm:$0xff]  }
 0x153   :  { %1657 = vmatpush1.bf16.msra.mxu1 %v8689_v60  ;;  %1112 = vmatprep.subr.bf16.mxu0 %v8694_v62  ;;  %v623_v60 = vsel %vm614_vm4, %v621_v32, %v622_v45  ;;  %v1439_v62 = vsel %vm1430_vm5, %v1437_v34, %v1438_v46  ;;  %v7512_v32 = vld.sshfl [vmem:[%s12289_s7] sm:$0x33 pattern:$0x76325410]  ;;  %v8878_v45 = vld [vmem:[%s12290_s9 + $0x110] ss:$8 sps:$4 sm:$0xff]  }
 0x154   :  { %1658 = vmatprep.subr.bf16.mxu1 %v8697_v0  ;;  %v1716_v0 = vsel %vm109_vm0, %v1714_v51, %v1715_v52  ;;  %v2526_v33 = vcombine.high %v7512_v32, %v7512_v32  ;;  %v2531_v34 = vsel %vm109_vm0, %v7512_v32, 0  ;;  %v8782_v46 = vld [vmem:[%s12287_s5 + $0x4e0] ss:$8 sps:$4 sm:$0xff]   ;;  %v1964_v51 = vld [vmem:[#allocation3 + $0x8] sm:$0x80] }
 0x155   :  { %v1966_v52 = vld [vmem:[#allocation3 + $0x18] sm:$0x7f]  ;;  %v8800_v32 = vld [vmem:[%s12287_s5 + $0x540] ss:$8 sps:$4 sm:$0xff]  }
 0x156   :  { %1113 = vmatpush1.bf16.msra.mxu0 %v8692_v3  ;;  %v617_v3 = vsel %vm614_vm4, %v615_v49, %v616_v55  ;;  %v1689_v49 = vld [vmem:[#allocation3] sm:$0xc0]  ;;  %v8884_v55 = vld [vmem:[%s12290_s9 + $0x120] ss:$8 sps:$4 sm:$0xff]  }
 0x157   :  { %1659 = vmatpush1.bf16.msra.mxu1 %v8695_v4  ;;  %1114 = vmatprep.subr.bf16.mxu0 %v8700_v5  ;;  %v1433_v4 = vsel %vm1430_vm5, %v1431_v50, %v1432_v56  ;;  %v8740_v5 = vld [vmem:[%s12287_s5 + $0x400] ss:$8 sps:$4 sm:$0xff]   ;;  %v1691_v50 = vld [vmem:[#allocation3 + $0x10] sm:$0x3f] }
 0x158   :  { %1660 = vmatprep.subr.bf16.mxu1 %v8703_v6  ;;  %v663_v6 = vpack.c.bf16 %v623_v60, %v617_v3  ;;  %v8785_v56 = vld [vmem:[%s12287_s5 + $0x4f0] ss:$8 sps:$4 sm:$0xff]   ;;  %v8790_v3 = vld [vmem:[%s12287_s5 + $0x504] ss:$8 sps:$4 sm:$0xff]  }
 0x15a   :  { %1115 = vmatpush1.bf16.msra.mxu0 %v8698_v7  ;;  %v1480_v7 = vpack.c.bf16 %v1439_v62, %v1433_v4  ;;  %v1705_v62 = vrot.slane %v1689_v49, 6  ;;  %v8892_v4 = vld [vmem:[%s12290_s9 + $0x134] ss:$8 sps:$4 sm:$0xff]   ;;  %v2672_v49 = vld [vmem:[#allocation4 + $0x48] sm:$0x3f] }
 0x15b   :  { %1661 = vmatpush1.bf16.msra.mxu1 %v8701_v8  ;;  %1116 = vmatprep.subr.bf16.mxu0 %v8706_v9  ;;  %v1710_v8 = vsel %vm109_vm0, %v1708_v58, %v1709_v59  ;;  %v8745_v9 = vld [vmem:[%s12287_s5 + $0x414] ss:$8 sps:$4 sm:$0xff]   ;;  %v1712_v58 = vrot.slane %v1695_v44, 6  ;;  %v1989_v59 = vrot.slane %v1968_v47, 7  ;;  %v8917_v44 = vld [vmem:[%s12290_s9 + $0x1b0] ss:$8 sps:$4 sm:$0xff]  }
 0x15c   :  { %1662 = vmatprep.subr.bf16.mxu1 %v8709_v10  ;;  %v1755_v10 = vpack.c.bf16 %v1716_v0, %v1710_v8  ;;  %v1706_v0 = vrot.slane %v1691_v50, 6  ;;  %v2668_v47 = vld [vmem:[#allocation4 + $0x18] sm:$0x3f] }
 0x15e   :  { %1117 = vmatpush1.bf16.msra.mxu0 %v8704_v11  ;;  %v8743_v11 = vld [vmem:[%s12287_s5 + $0x410] ss:$8 sps:$4 sm:$0xff]  }
 0x15f   :  { %1663 = vmatpush1.bf16.msra.mxu1 %v8707_v12  ;;  %1118 = vmatprep.subr.bf16.mxu0 %v8712_v13  ;;  %v8748_v12 = vld [vmem:[%s12287_s5 + $0x424] ss:$8 sps:$4 sm:$0xff]   ;;  %v8746_v13 = vld [vmem:[%s12287_s5 + $0x420] ss:$8 sps:$4 sm:$0xff]  }
 0x160   :  { %1664 = vmatprep.subr.bf16.mxu1 %v8715_v16  ;;  %v8751_v16 = vld [vmem:[%s12287_s5 + $0x434] ss:$8 sps:$4 sm:$0xff]  }
 0x162   :  { %1119 = vmatpush1.bf16.msra.mxu0 %v8710_v17  ;;  %v8749_v17 = vld [vmem:[%s12287_s5 + $0x430] ss:$8 sps:$4 sm:$0xff]  }
 0x163   :  { %1665 = vmatpush1.bf16.msra.mxu1 %v8713_v18  ;;  %1120 = vmatprep.subr.bf16.mxu0 %v8718_v19  ;;  %v8752_v18 = vld [vmem:[%s12287_s5 + $0x440] ss:$8 sps:$4 sm:$0xff]   ;;  %v8757_v19 = vld [vmem:[%s12287_s5 + $0x454] ss:$8 sps:$4 sm:$0xff]  }
 0x164   :  { %1666 = vmatprep.subr.bf16.mxu1 %v8721_v20  ;;  %v8755_v20 = vld [vmem:[%s12287_s5 + $0x450] ss:$8 sps:$4 sm:$0xff]  }
 0x166   :  { %1121 = vmatpush1.bf16.msra.mxu0 %v8716_v21  ;;  %v8760_v21 = vld [vmem:[%s12287_s5 + $0x464] ss:$8 sps:$4 sm:$0xff]  }
 0x167   :  { %1667 = vmatpush1.bf16.msra.mxu1 %v8719_v22  ;;  %1122 = vmatprep.subr.bf16.mxu0 %v8724_v23  ;;  %v8758_v22 = vld [vmem:[%s12287_s5 + $0x460] ss:$8 sps:$4 sm:$0xff]   ;;  %v8763_v23 = vld [vmem:[%s12287_s5 + $0x474] ss:$8 sps:$4 sm:$0xff]  }
 0x168   :  { %1668 = vmatprep.subr.bf16.mxu1 %v8727_v24  ;;  %v8761_v24 = vld [vmem:[%s12287_s5 + $0x470] ss:$8 sps:$4 sm:$0xff]  }
 0x16a   :  { %1123 = vmatpush1.bf16.msra.mxu0 %v8722_v27  ;;  %v8769_v27 = vld [vmem:[%s12287_s5 + $0x494] ss:$8 sps:$4 sm:$0xff]  }
 0x16b   :  { %1669 = vmatpush1.bf16.msra.mxu1 %v8725_v28  ;;  %1124 = vmatprep.subr.bf16.mxu0 %v8730_v29  ;;  %v8767_v28 = vld [vmem:[%s12287_s5 + $0x490] ss:$8 sps:$4 sm:$0xff]   ;;  %v8772_v29 = vld [vmem:[%s12287_s5 + $0x4a4] ss:$8 sps:$4 sm:$0xff]  }
 0x16c   :  { %1670 = vmatprep.subr.bf16.mxu1 %v8733_v30  ;;  %v8770_v30 = vld [vmem:[%s12287_s5 + $0x4a0] ss:$8 sps:$4 sm:$0xff]  }
 0x16e   :  { %1125 = vmatpush1.bf16.msra.mxu0 %v8728_v36  ;;  %v8778_v36 = vld [vmem:[%s12287_s5 + $0x4c4] ss:$8 sps:$4 sm:$0xff]  }
 0x16f   :  { %1671 = vmatpush1.bf16.msra.mxu1 %v8731_v39  ;;  %1126 = vmatprep.subr.bf16.mxu0 %v8736_v40  ;;  %v8781_v39 = vld [vmem:[%s12287_s5 + $0x4d4] ss:$8 sps:$4 sm:$0xff]   ;;  %v8872_v40 = vld [vmem:[%s12290_s9 + $0x100] ss:$8 sps:$4 sm:$0xff]  }
 0x170   :  { %1672 = vmatprep.subr.bf16.mxu1 %v8739_v42  ;;  %v8880_v42 = vld [vmem:[%s12290_s9 + $0x114] ss:$8 sps:$4 sm:$0xff]  }
 0x172   :  { %1127 = vmatpush1.bf16.msra.mxu0 %v8734_v53  ;;  %v1970_v53 = vld [vmem:[#allocation3 + $0x38] sm:$0x7f] }
 0x173   :  { %1673 = vmatpush1.bf16.msra.mxu1 %v8737_v54  ;;  %7513 = vmatprep.subr.msk.bf16.mxu0 %vm109_vm0, %v2526_v33  ;;  %v8886_v54 = vld [vmem:[%s12290_s9 + $0x124] ss:$8 sps:$4 sm:$0xff]   ;;  %v1990_v60 = vrot.slane %v1970_v53, 7  ;;  %v8805_v33 = vld [vmem:[%s12287_s5 + $0x554] ss:$8 sps:$4 sm:$0xff]   ;;  %v2691_v53 = vrot.slane %v2672_v49, 6 }
 0x174   :  { %1916 = vmatprep.subr.bf16.mxu1 %v8742_v57  ;;  %v1711_v57 = vrot.slane %v1693_v43, 6  ;;  %v8814_v43 = vld [vmem:[%s12287_s5 + $0x584] ss:$8 sps:$4 sm:$0xff]  }
 0x175   :  { %1129 = vmatmul.mubr.bf16.vlgmr.msra.gmra.mrb[4].mxu0 %v663_v6  ;;  %v1984_v6 = vrot.slane %v1966_v52, 7 }
 0x176   :  { %1675 = vmatmul.mubr.bf16.vlgmr.msra.gmra.mrb[4].mxu1 %v1480_v7  ;;  %2568 = vmatprep.mubr.bf16.mxu0 %v9676_v1  ;;  %v8754_v1 = vld [vmem:[%s12287_s5 + $0x444] ss:$8 sps:$4 sm:$0xff]   ;;  %v8890_v7 = vld [vmem:[%s12290_s9 + $0x130] ss:$8 sps:$4 sm:$0xff]   ;;  %v1713_v8 = vsel %vm109_vm0, %v1711_v57, %v1712_v58  ;;  %v8920_v57 = vld [vmem:[%s12290_s9 + $0x1c0] ss:$8 sps:$4 sm:$0xff]  }
 0x177   :  { %1917 = vmatpush1.bf16.msra.mxu1 %v8740_v5  ;;  %1948 = vmatprep.mubr.bf16.mxu1 %v1755_v10  ;;  %v1983_v5 = vrot.slane %v1964_v51, 7  ;;  %v1991_v10 = vsel %vm1979_vm6, %v1989_v59, %v1990_v60  ;;  %v2685_v51 = vrot.slane %v2668_v47, 6  ;;  %v8925_v59 = vld [vmem:[%s12290_s9 + $0x1d4] ss:$8 sps:$4 sm:$0xff]  }
 0x178   :  { %1918 = vmatprep.subr.bf16.mxu1 %v8745_v9  ;;  %2537 = vmatpush1.bf16.msra.mxu0 %v2531_v34  ;;  %v8788_v9 = vld [vmem:[%s12287_s5 + $0x500] ss:$8 sps:$4 sm:$0xff]   ;;  %v1965_v47 = vld [vmem:[#allocation3 + $0x10] sm:$0x7f] }
 0x179   :  { %2892 = vmatprep.subr.bf16.mxu0 %v8874_v14  ;;  %v8908_v34 = vld [vmem:[%s12290_s9 + $0x180] ss:$8 sps:$4 sm:$0xff]  }
 0x17a   :  { %v8914_v14 = vld [vmem:[%s12290_s9 + $0x1a0] ss:$8 sps:$4 sm:$0xff]  }
 0x17b   :  { %1919 = vmatpush1.bf16.msra.mxu1 %v8743_v11  ;;  %v8793_v11 = vld [vmem:[%s12287_s5 + $0x514] ss:$8 sps:$4 sm:$0xff]  }
 0x17c   :  { %1920 = vmatprep.subr.bf16.mxu1 %v8748_v12  ;;  %v1707_v12 = vsel %vm109_vm0, %v1705_v62, %v1706_v0  ;;  %v8815_v62 = vld [vmem:[%s12287_s5 + $0x590] ss:$8 sps:$4 sm:$0xff]   ;;  %v8820_v0 = vld [vmem:[%s12287_s5 + $0x5a4] ss:$8 sps:$4 sm:$0xff]  }
 0x17d   :  { %7514 = vmatmul.mubr.msk.bf16.vlgmr.msra.gmra.mrb[8].mxu0 %vm83_vm1, %v2505_v37  ;;  %v8808_v37 = vld [vmem:[%s12287_s5 + $0x564] ss:$8 sps:$4 sm:$0xff]  }
 0x17e   :  { %2893 = vmatpush1.bf16.msra.mxu0 %v8872_v40  ;;  %v8811_v40 = vld [vmem:[%s12287_s5 + $0x574] ss:$8 sps:$4 sm:$0xff]  }
 0x17f   :  { %1921 = vmatpush1.bf16.msra.mxu1 %v8746_v13  ;;  %2894 = vmatprep.subr.bf16.mxu0 %v8880_v42  ;;  %v8896_v13 = vld [vmem:[%s12290_s9 + $0x140] ss:$8 sps:$4 sm:$0xff]   ;;  %v8809_v42 = vld [vmem:[%s12287_s5 + $0x570] ss:$8 sps:$4 sm:$0xff]  }
 0x180   :  { %1922 = vmatprep.subr.bf16.mxu1 %v8751_v16  ;;  %v8898_v16 = vld [vmem:[%s12290_s9 + $0x144] ss:$8 sps:$4 sm:$0xff]  }
 0x182   :  { %2895 = vmatpush1.bf16.msra.mxu0 %v8878_v45  ;;  %v8922_v45 = vld [vmem:[%s12290_s9 + $0x1c4] ss:$8 sps:$4 sm:$0xff]  }
 0x183   :  { %1923 = vmatpush1.bf16.msra.mxu1 %v8749_v17  ;;  %2896 = vmatprep.subr.bf16.mxu0 %v8886_v54  ;;  %v1754_v17 = vpack.c.bf16 %v1713_v8, %v1707_v12  ;;  %v8812_v54 = vld [vmem:[%s12287_s5 + $0x580] ss:$8 sps:$4 sm:$0xff]  }
 0x184   :  { %1924 = vmatprep.subr.bf16.mxu1 %v8754_v1  ;;  %v1985_v1 = vsel %vm1979_vm6, %v1983_v5, %v1984_v6  ;;  %v2665_v5 = vld [vmem:[#allocation4] sm:$0xc0]  ;;  %v2667_v6 = vld [vmem:[#allocation4 + $0x10] sm:$0x3f]  ;;  %v2671_v8 = vld [vmem:[#allocation4 + $0x40] sm:$0x3f] }
 0x185   :  { %v2681_v12 = vrot.slane %v2665_v5, 6  ;;  %v8944_v5 = vld [vmem:[%s12290_s9 + $0x40] ss:$8 sps:$4 sm:$0xff]  }
 0x186   :  { %2897 = vmatpush1.bf16.msra.mxu0 %v8884_v55 }
 0x187   :  { %1925 = vmatpush1.bf16.msra.mxu1 %v8752_v18  ;;  %2898 = vmatprep.subr.bf16.mxu0 %v8892_v4  ;;  %v2030_v18 = vpack.c.bf16 %v1991_v10, %v1985_v1  ;;  %v8928_v4 = vld [vmem:[%s12290_s9 + $0x1e4] ss:$8 sps:$4 sm:$0xff]   ;;  %v8823_v10 = vld [vmem:[%s12287_s5 + $0x5b4] ss:$8 sps:$4 sm:$0xff]  }
 0x188   :  { %1926 = vmatprep.subr.bf16.mxu1 %v8757_v19  ;;  %v8901_v19 = vld [vmem:[%s12290_s9 + $0x154] ss:$8 sps:$4 sm:$0xff]  }
 0x189   :  { %v8931_v1 = vld [vmem:[%s12290_s9 + $0x1f4] ss:$8 sps:$4 sm:$0xff]  }
 0x18a   :  { %2899 = vmatpush1.bf16.msra.mxu0 %v8890_v7  ;;  %v2669_v7 = vld [vmem:[#allocation4 + $0x30] sm:$0xc0] }
 0x18b   :  { %1927 = vmatpush1.bf16.msra.mxu1 %v8755_v20  ;;  %2900 = vmatprep.subr.bf16.mxu0 %v8898_v16  ;;  %v8791_v20 = vld [vmem:[%s12287_s5 + $0x510] ss:$8 sps:$4 sm:$0xff]   ;;  %v2687_v16 = vrot.slane %v2669_v7, 6 }
 0x18c   :  { %1928 = vmatprep.subr.bf16.mxu1 %v8760_v21  ;;  %v8796_v21 = vld [vmem:[%s12287_s5 + $0x524] ss:$8 sps:$4 sm:$0xff]  }
 0x18e   :  { %2901 = vmatpush1.bf16.msra.mxu0 %v8896_v13  ;;  %v2682_v13 = vrot.slane %v2667_v6, 6  ;;  %v8949_v6 = vld [vmem:[%s12290_s9 + $0x54] ss:$8 sps:$4 sm:$0xff]  }
 0x18f   :  { %1929 = vmatpush1.bf16.msra.mxu1 %v8758_v22  ;;  %v8899_v22 = vld [vmem:[%s12290_s9 + $0x150] ss:$8 sps:$4 sm:$0xff]   ;;  %2902 = vmatprep.subr.bf16.mxu0 %v8901_v19  ;;  %v8826_v19 = vld [vmem:[%s12287_s5 + $0x5c4] ss:$8 sps:$4 sm:$0xff]  }
 0x190   :  { %1930 = vmatprep.subr.bf16.mxu1 %v8763_v23  ;;  %v8794_v23 = vld [vmem:[%s12287_s5 + $0x520] ss:$8 sps:$4 sm:$0xff]  }
 0x192   :  { %2903 = vmatpush1.bf16.msra.mxu0 %v8899_v22  ;;  %v2602_v22 = vld [vmem:[#allocation4 + $0x18] sm:$0xf] }
 0x193   :  { %1931 = vmatpush1.bf16.msra.mxu1 %v8761_v24  ;;  %v8904_v24 = vld [vmem:[%s12290_s9 + $0x164] ss:$8 sps:$4 sm:$0xff]  }
 0x194   :  { %1932 = vmatprep.subr.bf16.mxu1 %v8766_v25  ;;  %v8799_v25 = vld [vmem:[%s12287_s5 + $0x534] ss:$8 sps:$4 sm:$0xff]   ;;  %2904 = vmatprep.subr.bf16.mxu0 %v8904_v24 }
 0x197   :  { %1933 = vmatpush1.bf16.msra.mxu1 %v8764_v26  ;;  %v8902_v26 = vld [vmem:[%s12290_s9 + $0x160] ss:$8 sps:$4 sm:$0xff]  }
 0x198   :  { %1934 = vmatprep.subr.bf16.mxu1 %v8769_v27  ;;  %v8907_v27 = vld [vmem:[%s12290_s9 + $0x174] ss:$8 sps:$4 sm:$0xff]   ;;  %2905 = vmatpush1.bf16.msra.mxu0 %v8902_v26  ;;  %v2606_v26 = vld [vmem:[#allocation4 + $0x48] sm:$0xf] }
 0x199   :  { %2906 = vmatprep.subr.bf16.mxu0 %v8907_v27 }
 0x19b   :  { %1935 = vmatpush1.bf16.msra.mxu1 %v8767_v28  ;;  %v8797_v28 = vld [vmem:[%s12287_s5 + $0x530] ss:$8 sps:$4 sm:$0xff]  }
 0x19c   :  { %1936 = vmatprep.subr.bf16.mxu1 %v8772_v29  ;;  %v8802_v29 = vld [vmem:[%s12287_s5 + $0x544] ss:$8 sps:$4 sm:$0xff]  }
 0x19f   :  { %1937 = vmatpush1.bf16.msra.mxu1 %v8770_v30  ;;  %v8905_v30 = vld [vmem:[%s12290_s9 + $0x170] ss:$8 sps:$4 sm:$0xff]  }
 0x1a0   :  { %1938 = vmatprep.subr.bf16.mxu1 %v8775_v31  ;;  %v8910_v31 = vld [vmem:[%s12290_s9 + $0x184] ss:$8 sps:$4 sm:$0xff]   ;;  %2907 = vmatpush1.bf16.msra.mxu0 %v8905_v30 }
 0x1a1   :  { %2908 = vmatprep.subr.bf16.mxu0 %v8910_v31  ;;  %v2625_v31 = vrot.slane %v2606_v26, 4  ;;  %v8856_v26 = vld [vmem:[%s12287_s5 + $0x664] ss:$8 sps:$4 sm:$0xff]  }
 0x1a3   :  { %1939 = vmatpush1.bf16.msra.mxu1 %v8773_v35  ;;  %v8913_v35 = vld [vmem:[%s12290_s9 + $0x194] ss:$8 sps:$4 sm:$0xff]  }
 0x1a4   :  { %1940 = vmatprep.subr.bf16.mxu1 %v8778_v36  ;;  %v8803_v36 = vld [vmem:[%s12287_s5 + $0x550] ss:$8 sps:$4 sm:$0xff]   ;;  %2909 = vmatpush1.bf16.msra.mxu0 %v8908_v34 }
 0x1a5   :  { %2910 = vmatprep.subr.bf16.mxu0 %v8913_v35 }
 0x1a7   :  { %1941 = vmatpush1.bf16.msra.mxu1 %v8776_v38  ;;  %v8911_v38 = vld [vmem:[%s12290_s9 + $0x190] ss:$8 sps:$4 sm:$0xff]  }
 0x1a8   :  { %1942 = vmatprep.subr.bf16.mxu1 %v8781_v39  ;;  %v8806_v39 = vld [vmem:[%s12287_s5 + $0x560] ss:$8 sps:$4 sm:$0xff]   ;;  %2911 = vmatpush1.bf16.msra.mxu0 %v8911_v38  ;;  %v8937_v38 = vld [vmem:[%s12290_s9 + $0x14] ss:$8 sps:$4 sm:$0xff]  }
 0x1ab   :  { %1943 = vmatpush1.bf16.msra.mxu1 %v8779_v15  ;;  %v8916_v15 = vld [vmem:[%s12290_s9 + $0x1a4] ss:$8 sps:$4 sm:$0xff]  }
 0x1ac   :  { %1944 = vmatprep.subr.bf16.mxu1 %v8784_v41  ;;  %v8919_v41 = vld [vmem:[%s12290_s9 + $0x1b4] ss:$8 sps:$4 sm:$0xff]   ;;  %2912 = vmatprep.subr.bf16.mxu0 %v8916_v15  ;;  %v8935_v15 = vld [vmem:[%s12290_s9 + $0x10] ss:$8 sps:$4 sm:$0xff]  }
 0x1ad   :  { %2913 = vmatpush1.bf16.msra.mxu0 %v8914_v14  ;;  %v8832_v14 = vld [vmem:[%s12287_s5 + $0x5e4] ss:$8 sps:$4 sm:$0xff]  }
 0x1ae   :  { %2914 = vmatprep.subr.bf16.mxu0 %v8919_v41  ;;  %v8940_v41 = vld [vmem:[%s12290_s9 + $0x24] ss:$8 sps:$4 sm:$0xff]  }
 0x1af   :  { %1945 = vmatpush1.bf16.msra.mxu1 %v8782_v46  ;;  %v2666_v46 = vld [vmem:[#allocation4 + $0x8] sm:$0xc0] }
 0x1b0   :  { %1946 = vmatprep.subr.bf16.mxu1 %v8787_v48  ;;  %v2670_v48 = vld [vmem:[#allocation4 + $0x38] sm:$0xc0]  ;;  %v2684_v50 = vrot.slane %v2666_v46, 6 }
 0x1b1   :  { %v2690_v52 = vrot.slane %v2670_v48, 6  ;;  %2915 = vmatpush1.bf16.msra.mxu0 %v8917_v44  ;;  %v8830_v44 = vld [vmem:[%s12287_s5 + $0x5e0] ss:$8 sps:$4 sm:$0xff]   ;;  %v8835_v46 = vld [vmem:[%s12287_s5 + $0x5f4] ss:$8 sps:$4 sm:$0xff]  }
 0x1b2   :  { %v2686_v55 = vsel %vm109_vm0, %v2684_v50, %v2685_v51  ;;  %2916 = vmatprep.subr.bf16.mxu0 %v8922_v45  ;;  %v1963_v45 = vld [vmem:[#allocation3] sm:$0x80]  ;;  %v8938_v48 = vld [vmem:[%s12290_s9 + $0x20] ss:$8 sps:$4 sm:$0xff]   ;;  %v8943_v51 = vld [vmem:[%s12290_s9 + $0x34] ss:$8 sps:$4 sm:$0xff]  }
 0x1b3   :  { %1947 = vmatpush1.bf16.msra.mxu1 %v8785_v56  ;;  %v8817_v56 = vld [vmem:[%s12287_s5 + $0x594] ss:$8 sps:$4 sm:$0xff]   ;;  %v2692_v58 = vsel %vm109_vm0, %v2690_v52, %v2691_v53  ;;  %v8833_v52 = vld [vmem:[%s12287_s5 + $0x5f0] ss:$8 sps:$4 sm:$0xff]   ;;  %v1980_v53 = vrot.slane %v1963_v45, 7 }
 0x1b4   :  { %2191 = vmatprep.subr.bf16.mxu1 %v8790_v3  ;;  %v2731_v60 = vpack.c.bf16 %v2692_v58, %v2686_v55  ;;  %v8923_v3 = vld [vmem:[%s12290_s9 + $0x1d0] ss:$8 sps:$4 sm:$0xff]   ;;  %v8838_v55 = vld [vmem:[%s12287_s5 + $0x604] ss:$8 sps:$4 sm:$0xff]   ;;  %v2603_v45 = vld [vmem:[#allocation4 + $0x30] sm:$0xf0] }
 0x1b5   :  { %2917 = vmatpush1.bf16.msra.mxu0 %v8920_v57  ;;  %v8941_v57 = vld [vmem:[%s12290_s9 + $0x30] ss:$8 sps:$4 sm:$0xff]  }
 0x1b6   :  { %1949 = vmatmul.mubr.bf16.vlgmr.msra.gmra.mrb[4].mxu1 %v1754_v17  ;;  %2924 = vmatprep.mubr.bf16.mxu0 %v2731_v60  ;;  %v2688_v17 = vrot.slane %v2671_v8, 6  ;;  %v8946_v60 = vld [vmem:[%s12290_s9 + $0x44] ss:$8 sps:$4 sm:$0xff]   ;;  %v8839_v8 = vld [vmem:[%s12287_s5 + $0x610] ss:$8 sps:$4 sm:$0xff]  }
 0x1b7   :  { %2192 = vmatpush1.bf16.msra.mxu1 %v8788_v9  ;;  %2223 = vmatprep.mubr.bf16.mxu1 %v2030_v18  ;;  %v8818_v9 = vld [vmem:[%s12287_s5 + $0x5a0] ss:$8 sps:$4 sm:$0xff]   ;;  %v8821_v18 = vld [vmem:[%s12287_s5 + $0x5b0] ss:$8 sps:$4 sm:$0xff]  }
 0x1b8   :  { %2193 = vmatprep.subr.bf16.mxu1 %v8793_v11  ;;  %2918 = vmatprep.subr.bf16.mxu0 %v8925_v59  ;;  %v8926_v11 = vld [vmem:[%s12290_s9 + $0x1e0] ss:$8 sps:$4 sm:$0xff]   ;;  %v2689_v24 = vsel %vm109_vm0, %v2687_v16, %v2688_v17  ;;  %v8955_v17 = vld [vmem:[%s12290_s9 + $0x74] ss:$8 sps:$4 sm:$0xff]  }
 0x1b9   :  { %2919 = vmatpush1.bf16.msra.mxu0 %v8923_v3  ;;  %v8836_v59 = vld [vmem:[%s12287_s5 + $0x600] ss:$8 sps:$4 sm:$0xff]  }
 0x1ba   :  { %2920 = vmatprep.subr.bf16.mxu0 %v8928_v4  ;;  %v8950_v16 = vld [vmem:[%s12290_s9 + $0x60] ss:$8 sps:$4 sm:$0xff]  }
 0x1bb   :  { %2194 = vmatpush1.bf16.msra.mxu1 %v8791_v20  ;;  %v8929_v20 = vld [vmem:[%s12290_s9 + $0x1f0] ss:$8 sps:$4 sm:$0xff]  }
 0x1bc   :  { %2195 = vmatprep.subr.bf16.mxu1 %v8796_v21  ;;  %v2600_v21 = vld [vmem:[#allocation4 + $0x8] sm:$0xf0] }
 0x1bd   :  { %2921 = vmatpush1.bf16.msra.mxu0 %v8926_v11  ;;  %v2618_v27 = vrot.slane %v2600_v21, 4  ;;  %v8952_v11 = vld [vmem:[%s12290_s9 + $0x64] ss:$8 sps:$4 sm:$0xff]   ;;  %v8848_v21 = vld [vmem:[%s12287_s5 + $0x640] ss:$8 sps:$4 sm:$0xff]  }
 0x1be   :  { %2922 = vmatprep.subr.bf16.mxu0 %v8931_v1  ;;  %v8845_v1 = vld [vmem:[%s12287_s5 + $0x630] ss:$8 sps:$4 sm:$0xff]  }
 0x1bf   :  { %2196 = vmatpush1.bf16.msra.mxu1 %v8794_v23  ;;  %v2683_v23 = vsel %vm109_vm0, %v2681_v12, %v2682_v13  ;;  %v8842_v12 = vld [vmem:[%s12287_s5 + $0x620] ss:$8 sps:$4 sm:$0xff]   ;;  %v8847_v13 = vld [vmem:[%s12287_s5 + $0x634] ss:$8 sps:$4 sm:$0xff]  }
 0x1c0   :  { %2197 = vmatprep.subr.bf16.mxu1 %v8799_v25  ;;  %v2604_v25 = vld [vmem:[#allocation4 + $0x38] sm:$0xf0]  ;;  %v2730_v34 = vpack.c.bf16 %v2689_v24, %v2683_v23  ;;  %v8956_v23 = vld [vmem:[%s12290_s9 + $0x80] ss:$8 sps:$4 sm:$0xff]  }
 0x1c1   :  { %v2624_v30 = vrot.slane %v2604_v25, 4  ;;  %2923 = vmatpush1.bf16.msra.mxu0 %v8929_v20  ;;  %v8958_v20 = vld [vmem:[%s12290_s9 + $0x84] ss:$8 sps:$4 sm:$0xff]   ;;  %v8961_v24 = vld [vmem:[%s12290_s9 + $0x94] ss:$8 sps:$4 sm:$0xff]  }
 0x1c2   :  { %v8851_v25 = vld [vmem:[%s12287_s5 + $0x650] ss:$8 sps:$4 sm:$0xff]  }
 0x1c3   :  { %2198 = vmatpush1.bf16.msra.mxu1 %v8797_v28  ;;  %v2619_v28 = vrot.slane %v2602_v22, 4  ;;  %v2626_v35 = vsel %vm1155_vm3, %v2624_v30, %v2625_v31  ;;  %v8853_v22 = vld [vmem:[%s12287_s5 + $0x654] ss:$8 sps:$4 sm:$0xff]   ;;  %v8962_v31 = vld [vmem:[%s12290_s9 + $0xa0] ss:$8 sps:$4 sm:$0xff]  }
 0x1c4   :  { %2199 = vmatprep.subr.bf16.mxu1 %v8802_v29  ;;  %v8934_v29 = vld [vmem:[%s12290_s9 + $0x4] ss:$8 sps:$4 sm:$0xff]   ;;  %2925 = vmatmul.mubr.bf16.vlgmr.msra.gmra.mrb[12].mxu0 %v2730_v34  ;;  %v8859_v30 = vld [vmem:[%s12287_s5 + $0x674] ss:$8 sps:$4 sm:$0xff]  }
 0x1c5   :  { %3095 = vmatprep.subr.bf16.mxu0 %v8934_v29  ;;  %v8854_v29 = vld [vmem:[%s12287_s5 + $0x660] ss:$8 sps:$4 sm:$0xff]   ;;  %v8862_v34 = vld [vmem:[%s12287_s5 + $0x684] ss:$8 sps:$4 sm:$0xff]  }
 0x1c7   :  { %2200 = vmatpush1.bf16.msra.mxu1 %v8800_v32  ;;  %v2620_v32 = vsel %vm1155_vm3, %v2618_v27, %v2619_v28  ;;  %v8959_v27 = vld [vmem:[%s12290_s9 + $0x90] ss:$8 sps:$4 sm:$0xff]   ;;  %v8964_v28 = vld [vmem:[%s12290_s9 + $0xa4] ss:$8 sps:$4 sm:$0xff]  }
 0x1c8   :  { %2201 = vmatprep.subr.bf16.mxu1 %v8805_v33  ;;  %v8824_v33 = vld [vmem:[%s12287_s5 + $0x5c0] ss:$8 sps:$4 sm:$0xff]  }
 0x1cb   :  { %2202 = vmatpush1.bf16.msra.mxu1 %v8803_v36  ;;  %v8829_v36 = vld [vmem:[%s12287_s5 + $0x5d4] ss:$8 sps:$4 sm:$0xff]  }
 0x1cc   :  { %2203 = vmatprep.subr.bf16.mxu1 %v8808_v37  ;;  %v8932_v37 = vld [vmem:[%s12290_s9] ss:$8 sps:$4 sm:$0xff]  }
 0x1cd   :  { %3096 = vmatpush1.bf16.msra.mxu0 %v8932_v37  ;;  %v8860_v37 = vld [vmem:[%s12287_s5 + $0x680] ss:$8 sps:$4 sm:$0xff]  }
 0x1ce   :  { %3097 = vmatprep.subr.bf16.mxu0 %v8937_v38  ;;  %v8865_v38 = vld [vmem:[%s12287_s5 + $0x694] ss:$8 sps:$4 sm:$0xff]  }
 0x1cf   :  { %2204 = vmatpush1.bf16.msra.mxu1 %v8806_v39  ;;  %v2664_v39 = vpack.c.bf16 %v2626_v35, %v2620_v32  ;;  %v8967_v32 = vld [vmem:[%s12290_s9 + $0xb4] ss:$8 sps:$4 sm:$0xff]   ;;  %v8965_v35 = vld [vmem:[%s12290_s9 + $0xb0] ss:$8 sps:$4 sm:$0xff]  }
 0x1d0   :  { %2205 = vmatprep.subr.bf16.mxu1 %v8811_v40  ;;  %v8827_v40 = vld [vmem:[%s12287_s5 + $0x5d0] ss:$8 sps:$4 sm:$0xff]  }
 0x1d1   :  { %3127 = vmatprep.mubr.bf16.mxu0 %v2664_v39  ;;  %3098 = vmatpush1.bf16.msra.mxu0 %v8935_v15  ;;  %v8968_v39 = vld [vmem:[%s12290_s9 + $0xc0] ss:$8 sps:$4 sm:$0xff]   ;;  %v8868_v15 = vld [vmem:[%s12287_s5 + $0x6a4] ss:$8 sps:$4 sm:$0xff]  }
 0x1d2   :  { %3099 = vmatprep.subr.bf16.mxu0 %v8940_v41  ;;  %v8971_v41 = vld [vmem:[%s12290_s9 + $0xd0] ss:$8 sps:$4 sm:$0xff]  }
 0x1d3   :  { %2206 = vmatpush1.bf16.msra.mxu1 %v8809_v42  ;;  %v1967_v42 = vld [vmem:[#allocation3 + $0x20] sm:$0x80] }
 0x1d4   :  { %2207 = vmatprep.subr.bf16.mxu1 %v8814_v43  ;;  %v1969_v43 = vld [vmem:[#allocation3 + $0x30] sm:$0x7f]  ;;  %v1986_v49 = vrot.slane %v1967_v42, 7  ;;  %v2599_v42 = vld [vmem:[#allocation4] sm:$0xf0] }
 0x1d5   :  { %v1987_v50 = vrot.slane %v1969_v43, 7  ;;  %3100 = vmatpush1.bf16.msra.mxu0 %v8938_v48  ;;  %v8976_v43 = vld [vmem:[%s12290_s9 + $0xe4] ss:$8 sps:$4 sm:$0xff]   ;;  %v8871_v48 = vld [vmem:[%s12287_s5 + $0x6b4] ss:$8 sps:$4 sm:$0xff]  }
 0x1d6   :  { %3101 = vmatprep.subr.bf16.mxu0 %v8943_v51  ;;  %v2615_v51 = vrot.slane %v2599_v42, 4  ;;  %v9021_v42 = vld [vmem:[%s12290_s9 + $0x2d4] ss:$8 sps:$4 sm:$0xff]  }
 0x1d7   :  { %2208 = vmatpush1.bf16.msra.mxu1 %v8812_v54  ;;  %v1981_v54 = vrot.slane %v1965_v47, 7  ;;  %v1988_v58 = vsel %vm1979_vm6, %v1986_v49, %v1987_v50  ;;  %v8866_v47 = vld [vmem:[%s12287_s5 + $0x6a0] ss:$8 sps:$4 sm:$0xff]   ;;  %v8979_v50 = vld [vmem:[%s12290_s9 + $0xf4] ss:$8 sps:$4 sm:$0xff]  }
 0x1d8   :  { %2209 = vmatprep.subr.bf16.mxu1 %v8817_v56  ;;  %v2241_v56 = vld [vmem:[#allocation3 + $0x38] sm:$0xff]  ;;  %v8974_v49 = vld [vmem:[%s12290_s9 + $0xe0] ss:$8 sps:$4 sm:$0xff]  }
 0x1d9   :  { %v1982_v3 = vsel %vm1979_vm6, %v1980_v53, %v1981_v54  ;;  %3102 = vmatpush1.bf16.msra.mxu0 %v8941_v57  ;;  %v2621_v53 = vrot.slane %v2603_v45, 4  ;;  %v8977_v57 = vld [vmem:[%s12290_s9 + $0xf0] ss:$8 sps:$4 sm:$0xff]   ;;  %v9022_v45 = vld [vmem:[%s12290_s9 + $0x2e0] ss:$8 sps:$4 sm:$0xff]  }
 0x1da   :  { %v2029_v4 = vpack.c.bf16 %v1988_v58, %v1982_v3  ;;  %3103 = vmatprep.subr.bf16.mxu0 %v8946_v60  ;;  %v8982_v60 = vld [vmem:[%s12290_s9 + $0x204] ss:$8 sps:$4 sm:$0xff]   ;;  %v8883_v3 = vld [vmem:[%s12287_s5 + $0x6d4] ss:$8 sps:$4 sm:$0xff]  }
 0x1db   :  { %2210 = vmatpush1.bf16.msra.mxu1 %v8815_v62  ;;  %v2239_v62 = vld [vmem:[#allocation3 + $0x18] sm:$0xff] }
 0x1dc   :  { %2211 = vmatprep.subr.bf16.mxu1 %v8820_v0  ;;  %v8841_v0 = vld [vmem:[%s12287_s5 + $0x614] ss:$8 sps:$4 sm:$0xff]   ;;  %v2276_v7 = vpack.c.bf16 %v2241_v56, %v2239_v62  ;;  %v8877_v56 = vld [vmem:[%s12287_s5 + $0x6c4] ss:$8 sps:$4 sm:$0xff]   ;;  %v8875_v62 = vld [vmem:[%s12287_s5 + $0x6c0] ss:$8 sps:$4 sm:$0xff]  }
 0x1dd   :  { %3104 = vmatpush1.bf16.msra.mxu0 %v8944_v5  ;;  %v8985_v5 = vld [vmem:[%s12290_s9 + $0x214] ss:$8 sps:$4 sm:$0xff]  }
 0x1de   :  { %3105 = vmatprep.subr.bf16.mxu0 %v8949_v6  ;;  %v9668_v6 = vld [vmem:[#allocation3] sm:$0xff] }
 0x1df   :  { %2212 = vmatpush1.bf16.msra.mxu1 %v8818_v9  ;;  %v8844_v9 = vld [vmem:[%s12287_s5 + $0x624] ss:$8 sps:$4 sm:$0xff]  }
 0x1e0   :  { %2213 = vmatprep.subr.bf16.mxu1 %v8823_v10  ;;  %v8947_v10 = vld [vmem:[%s12290_s9 + $0x50] ss:$8 sps:$4 sm:$0xff]  }
 0x1e1   :  { %3106 = vmatpush1.bf16.msra.mxu0 %v8947_v10  ;;  %v8983_v10 = vld [vmem:[%s12290_s9 + $0x210] ss:$8 sps:$4 sm:$0xff]  }
 0x1e2   :  { %3107 = vmatprep.subr.bf16.mxu0 %v8952_v11  ;;  %v8988_v11 = vld [vmem:[%s12290_s9 + $0x224] ss:$8 sps:$4 sm:$0xff]  }
 0x1e3   :  { %2214 = vmatpush1.bf16.msra.mxu1 %v8821_v18  ;;  %v8850_v18 = vld [vmem:[%s12287_s5 + $0x644] ss:$8 sps:$4 sm:$0xff]  }
 0x1e4   :  { %2215 = vmatprep.subr.bf16.mxu1 %v8826_v19  ;;  %v8953_v19 = vld [vmem:[%s12290_s9 + $0x70] ss:$8 sps:$4 sm:$0xff]  }
 0x1e5   :  { %3108 = vmatpush1.bf16.msra.mxu0 %v8950_v16  ;;  %v8986_v16 = vld [vmem:[%s12290_s9 + $0x220] ss:$8 sps:$4 sm:$0xff]  }
 0x1e6   :  { %3109 = vmatprep.subr.bf16.mxu0 %v8955_v17  ;;  %v8991_v17 = vld [vmem:[%s12290_s9 + $0x234] ss:$8 sps:$4 sm:$0xff]  }
 0x1e7   :  { %2216 = vmatpush1.bf16.msra.mxu1 %v8824_v33  ;;  %v8857_v33 = vld [vmem:[%s12287_s5 + $0x670] ss:$8 sps:$4 sm:$0xff]  }
 0x1e8   :  { %2217 = vmatprep.subr.bf16.mxu1 %v8829_v36  ;;  %v8970_v36 = vld [vmem:[%s12290_s9 + $0xc4] ss:$8 sps:$4 sm:$0xff]  }
 0x1e9   :  { %3110 = vmatpush1.bf16.msra.mxu0 %v8953_v19  ;;  %v2240_v19 = vld [vmem:[#allocation3 + $0x30] sm:$0xff] }
 0x1ea   :  { %3111 = vmatprep.subr.bf16.mxu0 %v8958_v20  ;;  %v8994_v20 = vld [vmem:[%s12290_s9 + $0x244] ss:$8 sps:$4 sm:$0xff]  }
 0x1eb   :  { %2218 = vmatpush1.bf16.msra.mxu1 %v8827_v40  ;;  %v8973_v40 = vld [vmem:[%s12290_s9 + $0xd4] ss:$8 sps:$4 sm:$0xff]  }
 0x1ec   :  { %2219 = vmatprep.subr.bf16.mxu1 %v8832_v14  ;;  %v8863_v14 = vld [vmem:[%s12287_s5 + $0x690] ss:$8 sps:$4 sm:$0xff]  }
 0x1ed   :  { %3112 = vmatpush1.bf16.msra.mxu0 %v8956_v23  ;;  %v8992_v23 = vld [vmem:[%s12290_s9 + $0x240] ss:$8 sps:$4 sm:$0xff]  }
 0x1ee   :  { %3113 = vmatprep.subr.bf16.mxu0 %v8961_v24  ;;  %v8997_v24 = vld [vmem:[%s12290_s9 + $0x254] ss:$8 sps:$4 sm:$0xff]  }
 0x1ef   :  { %2220 = vmatpush1.bf16.msra.mxu1 %v8830_v44  ;;  %v2601_v44 = vld [vmem:[#allocation4 + $0x10] sm:$0xf] }
 0x1f0   :  { %2221 = vmatprep.subr.bf16.mxu1 %v8835_v46  ;;  %v2605_v46 = vld [vmem:[#allocation4 + $0x40] sm:$0xf] }
 0x1f1   :  { %3114 = vmatpush1.bf16.msra.mxu0 %v8959_v27  ;;  %v2622_v54 = vrot.slane %v2605_v46, 4  ;;  %v8998_v27 = vld [vmem:[%s12290_s9 + $0x260] ss:$8 sps:$4 sm:$0xff]   ;;  %v9027_v46 = vld [vmem:[%s12290_s9 + $0x2f4] ss:$8 sps:$4 sm:$0xff]  }
 0x1f2   :  { %3115 = vmatprep.subr.bf16.mxu0 %v8964_v28  ;;  %v9003_v28 = vld [vmem:[%s12290_s9 + $0x274] ss:$8 sps:$4 sm:$0xff]  }
 0x1f3   :  { %2222 = vmatpush1.bf16.msra.mxu1 %v8833_v52  ;;  %v2616_v52 = vrot.slane %v2601_v44, 4  ;;  %v9024_v44 = vld [vmem:[%s12290_s9 + $0x2e4] ss:$8 sps:$4 sm:$0xff]  }
 0x1f4   :  { %2437 = vmatprep.subr.bf16.mxu1 %v8838_v55  ;;  %v8869_v55 = vld [vmem:[%s12287_s5 + $0x6b0] ss:$8 sps:$4 sm:$0xff]  }
 0x1f5   :  { %3116 = vmatpush1.bf16.msra.mxu0 %v8962_v31  ;;  %v2617_v58 = vsel %vm1155_vm3, %v2615_v51, %v2616_v52  ;;  %v9004_v31 = vld [vmem:[%s12290_s9 + $0x280] ss:$8 sps:$4 sm:$0xff]   ;;  %v9031_v51 = vld [vmem:[%s12290_s9 + $0x310] ss:$8 sps:$4 sm:$0xff]   ;;  %v9036_v52 = vld [vmem:[%s12290_s9 + $0x324] ss:$8 sps:$4 sm:$0xff]  }
 0x1f6   :  { %2224 = vmatmul.mubr.bf16.vlgmr.msra.gmra.mrb[4].mxu1 %v2029_v4  ;;  %3117 = vmatprep.subr.bf16.mxu0 %v8967_v32  ;;  %v8980_v4 = vld [vmem:[%s12290_s9 + $0x200] ss:$8 sps:$4 sm:$0xff]   ;;  %v9009_v32 = vld [vmem:[%s12290_s9 + $0x294] ss:$8 sps:$4 sm:$0xff]  }
 0x1f7   :  { %2438 = vmatpush1.bf16.msra.mxu1 %v8836_v59  ;;  %2469 = vmatprep.mubr.bf16.mxu1 %v2276_v7  ;;  %v2623_v59 = vsel %vm1155_vm3, %v2621_v53, %v2622_v54  ;;  %v10761_v7 = vpack.c.bf16 %v9668_v6, %v9668_v6  ;;  %v9034_v53 = vld [vmem:[%s12290_s9 + $0x320] ss:$8 sps:$4 sm:$0xff]   ;;  %v9039_v54 = vld [vmem:[%s12290_s9 + $0x334] ss:$8 sps:$4 sm:$0xff]  }
 0x1f8   :  { %2439 = vmatprep.subr.bf16.mxu1 %v8841_v0  ;;  %v2663_v0 = vpack.c.bf16 %v2623_v59, %v2617_v58  ;;  %v9045_v58 = vld [vmem:[%s12290_s9 + $0x354] ss:$8 sps:$4 sm:$0xff]  }
 0x1f9   :  { %3118 = vmatpush1.bf16.msra.mxu0 %v8965_v35  ;;  %v9012_v35 = vld [vmem:[%s12290_s9 + $0x2a4] ss:$8 sps:$4 sm:$0xff]   ;;  %v9051_v6 = vld [vmem:[%s12290_s9 + $0x374] ss:$8 sps:$4 sm:$0xff]  }
 0x1fa   :  { %3119 = vmatprep.subr.bf16.mxu0 %v8970_v36 }
 0x1fb   :  { %2440 = vmatpush1.bf16.msra.mxu1 %v8839_v8  ;;  %v8881_v8 = vld [vmem:[%s12287_s5 + $0x6d0] ss:$8 sps:$4 sm:$0xff]  }
 0x1fc   :  { %2441 = vmatprep.subr.bf16.mxu1 %v8844_v9  ;;  %v8889_v9 = vld [vmem:[%s12287_s5 + $0x6e4] ss:$8 sps:$4 sm:$0xff]  }
 0x1fd   :  { %3120 = vmatpush1.bf16.msra.mxu0 %v8968_v39  ;;  %v9010_v39 = vld [vmem:[%s12290_s9 + $0x2a0] ss:$8 sps:$4 sm:$0xff]  }
 0x1fe   :  { %3121 = vmatprep.subr.bf16.mxu0 %v8973_v40  ;;  %v9015_v40 = vld [vmem:[%s12290_s9 + $0x2b4] ss:$8 sps:$4 sm:$0xff]  }
 0x1ff   :  { %2442 = vmatpush1.bf16.msra.mxu1 %v8842_v12  ;;  %v8887_v12 = vld [vmem:[%s12287_s5 + $0x6e0] ss:$8 sps:$4 sm:$0xff]  }
 0x200   :  { %2443 = vmatprep.subr.bf16.mxu1 %v8847_v13  ;;  %v8895_v13 = vld [vmem:[%s12287_s5 + $0x6f4] ss:$8 sps:$4 sm:$0xff]  }
 0x201   :  { %3122 = vmatpush1.bf16.msra.mxu0 %v8971_v41  ;;  %v9016_v41 = vld [vmem:[%s12290_s9 + $0x2c0] ss:$8 sps:$4 sm:$0xff]  }
 0x202   :  { %3123 = vmatprep.subr.bf16.mxu0 %v8976_v43  ;;  %v9019_v43 = vld [vmem:[%s12290_s9 + $0x2d0] ss:$8 sps:$4 sm:$0xff]  }
 0x203   :  { %2444 = vmatpush1.bf16.msra.mxu1 %v8845_v1  ;;  %v8893_v1 = vld [vmem:[%s12287_s5 + $0x6f0] ss:$8 sps:$4 sm:$0xff]  }
 0x204   :  { %2445 = vmatprep.subr.bf16.mxu1 %v8850_v18  ;;  %v8989_v18 = vld [vmem:[%s12290_s9 + $0x230] ss:$8 sps:$4 sm:$0xff]  }
 0x205   :  { %3124 = vmatpush1.bf16.msra.mxu0 %v8974_v49  ;;  %v9028_v49 = vld [vmem:[%s12290_s9 + $0x300] ss:$8 sps:$4 sm:$0xff]  }
 0x206   :  { %3125 = vmatprep.subr.bf16.mxu0 %v8979_v50  ;;  %v9033_v50 = vld [vmem:[%s12290_s9 + $0x314] ss:$8 sps:$4 sm:$0xff]  }
 0x207   :  { %2446 = vmatpush1.bf16.msra.mxu1 %v8848_v21  ;;  %v2238_v21 = vld [vmem:[#allocation3 + $0x10] sm:$0xff] }
 0x208   :  { %2447 = vmatprep.subr.bf16.mxu1 %v8853_v22  ;;  %v2275_v22 = vpack.c.bf16 %v2240_v19, %v2238_v21  ;;  %v9069_v19 = vld [vmem:[%s12290_s9 + $0x3d4] ss:$8 sps:$4 sm:$0xff]   ;;  %v9072_v21 = vld [vmem:[%s12290_s9 + $0x3e4] ss:$8 sps:$4 sm:$0xff]  }
 0x209   :  { %3126 = vmatpush1.bf16.msra.mxu0 %v8977_v57  ;;  %v9040_v57 = vld [vmem:[%s12290_s9 + $0x340] ss:$8 sps:$4 sm:$0xff]  }
 0x20a   :  { %3337 = vmatprep.subr.bf16.mxu0 %v8982_v60 }
 0x20b   :  { %2448 = vmatpush1.bf16.msra.mxu1 %v8851_v25  ;;  %v8995_v25 = vld [vmem:[%s12290_s9 + $0x250] ss:$8 sps:$4 sm:$0xff]  }
 0x20c   :  { %2449 = vmatprep.subr.bf16.mxu1 %v8856_v26  ;;  %3128 = vmatmul.mubr.bf16.vlgmr.msra.gmra.mrb[12].mxu0 %v2663_v0  ;;  %v9000_v26 = vld [vmem:[%s12290_s9 + $0x264] ss:$8 sps:$4 sm:$0xff]   ;;  %v9043_v0 = vld [vmem:[%s12290_s9 + $0x350] ss:$8 sps:$4 sm:$0xff]  }
 0x20d   :  { %3338 = vmatpush1.bf16.msra.mxu0 %v8980_v4  ;;  %3369 = vmatprep.mubr.bf16.mxu0 %v10761_v7  ;;  %v9048_v4 = vld [vmem:[%s12290_s9 + $0x364] ss:$8 sps:$4 sm:$0xff]  }
 0x20e   :  { %3339 = vmatprep.subr.bf16.mxu0 %v8985_v5  ;;  %v9046_v5 = vld [vmem:[%s12290_s9 + $0x360] ss:$8 sps:$4 sm:$0xff]  }
 0x20f   :  { %2450 = vmatpush1.bf16.msra.mxu1 %v8854_v29  ;;  %v9001_v29 = vld [vmem:[%s12290_s9 + $0x270] ss:$8 sps:$4 sm:$0xff]  }
 0x210   :  { %2451 = vmatprep.subr.bf16.mxu1 %v8859_v30  ;;  %v9006_v30 = vld [vmem:[%s12290_s9 + $0x284] ss:$8 sps:$4 sm:$0xff]  }
 0x211   :  { %3340 = vmatpush1.bf16.msra.mxu0 %v8983_v10  ;;  %v9057_v10 = vld [vmem:[%s12290_s9 + $0x394] ss:$8 sps:$4 sm:$0xff]  }
 0x212   :  { %3341 = vmatprep.subr.bf16.mxu0 %v8988_v11  ;;  %v9055_v11 = vld [vmem:[%s12290_s9 + $0x390] ss:$8 sps:$4 sm:$0xff]  }
 0x213   :  { %2452 = vmatpush1.bf16.msra.mxu1 %v8857_v33  ;;  %v9007_v33 = vld [vmem:[%s12290_s9 + $0x290] ss:$8 sps:$4 sm:$0xff]  }
 0x214   :  { %2453 = vmatprep.subr.bf16.mxu1 %v8862_v34 }
 0x215   :  { %3342 = vmatpush1.bf16.msra.mxu0 %v8986_v16  ;;  %v9063_v16 = vld [vmem:[%s12290_s9 + $0x3b4] ss:$8 sps:$4 sm:$0xff]  }
 0x216   :  { %3343 = vmatprep.subr.bf16.mxu0 %v8991_v17  ;;  %v9061_v17 = vld [vmem:[%s12290_s9 + $0x3b0] ss:$8 sps:$4 sm:$0xff]  }
 0x217   :  { %2454 = vmatpush1.bf16.msra.mxu1 %v8860_v37 }
 0x218   :  { %2455 = vmatprep.subr.bf16.mxu1 %v8865_v38 }
 0x219   :  { %3344 = vmatpush1.bf16.msra.mxu0 %v8989_v18  ;;  %v9064_v18 = vld [vmem:[%s12290_s9 + $0x3c0] ss:$8 sps:$4 sm:$0xff]  }
 0x21a   :  { %3345 = vmatprep.subr.bf16.mxu0 %v8994_v20  ;;  %v9067_v20 = vld [vmem:[%s12290_s9 + $0x3d0] ss:$8 sps:$4 sm:$0xff]  }
 0x21b   :  { %2456 = vmatpush1.bf16.msra.mxu1 %v8863_v14  ;;  %v9013_v14 = vld [vmem:[%s12290_s9 + $0x2b0] ss:$8 sps:$4 sm:$0xff]  }
 0x21c   :  { %2457 = vmatprep.subr.bf16.mxu1 %v8868_v15  ;;  %v9018_v15 = vld [vmem:[%s12290_s9 + $0x2c4] ss:$8 sps:$4 sm:$0xff]  }
 0x21d   :  { %3346 = vmatpush1.bf16.msra.mxu0 %v8992_v23  ;;  %v9075_v23 = vld [vmem:[%s12290_s9 + $0x3f4] ss:$8 sps:$4 sm:$0xff]  }
 0x21e   :  { %3347 = vmatprep.subr.bf16.mxu0 %v8997_v24  ;;  %v9073_v24 = vld [vmem:[%s12290_s9 + $0x3f0] ss:$8 sps:$4 sm:$0xff]  }
 0x21f   :  { %2458 = vmatpush1.bf16.msra.mxu1 %v8866_v47  ;;  %v9025_v47 = vld [vmem:[%s12290_s9 + $0x2f0] ss:$8 sps:$4 sm:$0xff]  }
 0x220   :  { %2459 = vmatprep.subr.bf16.mxu1 %v8871_v48  ;;  %v9030_v48 = vld [vmem:[%s12290_s9 + $0x304] ss:$8 sps:$4 sm:$0xff]  }
 0x221   :  { %3348 = vmatpush1.bf16.msra.mxu0 %v8995_v25  ;;  %v9078_v25 = vld [vmem:[%s12290_s9 + $0x404] ss:$8 sps:$4 sm:$0xff]  }
 0x222   :  { %3349 = vmatprep.subr.bf16.mxu0 %v9000_v26  ;;  %v2484_v26 = vld [vmem:[%s12291_s6] sm:$0x3] }
 0x223   :  { %2460 = vmatpush1.bf16.msra.mxu1 %v8869_v55  ;;  %v9037_v55 = vld [vmem:[%s12290_s9 + $0x330] ss:$8 sps:$4 sm:$0xff]  }
 0x224   :  { %2461 = vmatprep.subr.bf16.mxu1 %v8877_v56  ;;  %v9042_v56 = vld [vmem:[%s12290_s9 + $0x344] ss:$8 sps:$4 sm:$0xff]  }
 0x225   :  { %3350 = vmatpush1.bf16.msra.mxu0 %v8998_v27  ;;  %v2506_v27 = vld [vmem:[%s12292_s8] sm:$0x3] }
 0x226   :  { %3351 = vmatprep.subr.bf16.mxu0 %v9003_v28  ;;  %v2489_v28 = vrot.slane %v2484_v26, %v10048_v63 }
 0x227   :  { %2462 = vmatpush1.bf16.msra.mxu1 %v8875_v62 }
 0x228   :  { %2463 = vmatprep.subr.bf16.mxu1 %v8883_v3 }
 0x229   :  { %3352 = vmatpush1.bf16.msra.mxu0 %v9001_v29 }
 0x22a   :  { %3353 = vmatprep.subr.bf16.mxu0 %v9006_v30  ;;  %v2493_v30 = vrot.slane %v2484_v26, %v10053_v2 }
 0x22b   :  { %2464 = vmatpush1.bf16.msra.mxu1 %v8881_v8  ;;  %v9054_v8 = vld [vmem:[%s12290_s9 + $0x384] ss:$8 sps:$4 sm:$0xff]  }
 0x22c   :  { %2465 = vmatprep.subr.bf16.mxu1 %v8889_v9  ;;  %v9052_v9 = vld [vmem:[%s12290_s9 + $0x380] ss:$8 sps:$4 sm:$0xff]  }
 0x22d   :  { %3354 = vmatpush1.bf16.msra.mxu0 %v9004_v31  ;;  %v2511_v31 = vrot.slane %v2506_v27, %v10048_v63 }
 0x22e   :  { %3355 = vmatprep.subr.bf16.mxu0 %v9009_v32 }
 0x22f   :  { %2466 = vmatpush1.bf16.msra.mxu1 %v8887_v12  ;;  %v9060_v12 = vld [vmem:[%s12290_s9 + $0x3a4] ss:$8 sps:$4 sm:$0xff]  }
 0x230   :  { %2467 = vmatprep.subr.bf16.mxu1 %v8895_v13  ;;  %v9058_v13 = vld [vmem:[%s12290_s9 + $0x3a0] ss:$8 sps:$4 sm:$0xff]  }
 0x231   :  { %3356 = vmatpush1.bf16.msra.mxu0 %v9007_v33 }
 0x232   :  { %3357 = vmatprep.subr.bf16.mxu0 %v9012_v35  ;;  %v2515_v35 = vrot.slane %v2506_v27, %v10053_v2 }
 0x233   :  { %2468 = vmatpush1.bf16.msra.mxu1 %v8893_v1  ;;  %v9066_v1 = vld [vmem:[%s12290_s9 + $0x3c4] ss:$8 sps:$4 sm:$0xff]  }
 0x235   :  { %3358 = vmatpush1.bf16.msra.mxu0 %v9010_v39 }
 0x236   :  { %2470 = vmatmul.mubr.bf16.vlgmr.msra.gmra.mrb[4].mxu1 %v2275_v22  ;;  %3359 = vmatprep.subr.bf16.mxu0 %v9015_v40  ;;  %v9070_v22 = vld [vmem:[%s12290_s9 + $0x3e0] ss:$8 sps:$4 sm:$0xff]  }
 0x239   :  { %3360 = vmatpush1.bf16.msra.mxu0 %v9013_v14 }
 0x23a   :  { %3361 = vmatprep.subr.bf16.mxu0 %v9018_v15 }
 0x23d   :  { %3362 = vmatpush1.bf16.msra.mxu0 %v9016_v41 }
 0x23e   :  { %3363 = vmatprep.subr.bf16.mxu0 %v9021_v42 }
 0x241   :  { %3364 = vmatpush1.bf16.msra.mxu0 %v9019_v43 }
 0x242   :  { %3365 = vmatprep.subr.bf16.mxu0 %v9024_v44 }
 0x245   :  { %3366 = vmatpush1.bf16.msra.mxu0 %v9022_v45 }
 0x246   :  { %3367 = vmatprep.subr.bf16.mxu0 %v9027_v46 }
 0x248   :  { %v10830_v34 = vpop.f32.mrb[4].mxu0 }
 0x249   :  { %v10835_v36 = vpop.f32.mrb[5].mxu0  ;;  %3368 = vmatpush1.bf16.msra.mxu0 %v9025_v47 }
 0x24a   :  { %v10837_v37 = vpop.f32.mrb[6].mxu0  ;;  %3611 = vmatprep.subr.bf16.mxu0 %v9030_v48 }
 0x24b   :  { %v10839_v38 = vpop.f32.mrb[7].mxu0 }
 0x24c   :  { %3370 = vmatmul.mubr.bf16.vlgmr.msra.gmra.mrb[12].mxu0 %v10761_v7  ;;  %v9049_v7 = vld [vmem:[%s12290_s9 + $0x370] ss:$8 sps:$4 sm:$0xff]  }
 0x24d   :  { %3612 = vmatpush1.bf16.msra.mxu0 %v9028_v49 }
 0x24e   :  { %3613 = vmatprep.subr.bf16.mxu0 %v9033_v50 }
 0x250   :  { %v10908_v59 = vpop.f32.mrb[8].mxu0 }
 0x251   :  { %3614 = vmatpush1.bf16.msra.mxu0 %v9031_v51  ;;  %v10910_v60 = vpop.f32.mrb[9].mxu0  ;;  %v2571_v44 = vadd.f32 %v10908_v59, %v2511_v31  ;;  %v3388_v59 = vld [vmem:[#allocation4 + $0x40] sm:$0xfc] }
 0x252   :  { %3615 = vmatprep.subr.bf16.mxu0 %v9036_v52  ;;  %v10912_v62 = vpop.f32.mrb[10].mxu0  ;;  %v2573_v47 = vadd.f32 %v10910_v60, %v2515_v35  ;;  %v3389_v60 = vld [vmem:[#allocation4 + $0x48] sm:$0xfc] }
 0x253   :  { %v10917_v3 = vpop.f32.mrb[11].mxu0  ;;  %v2575_v49 = vadd.f32 %v10912_v62, %v2511_v31  ;;  %v3384_v62 = vld [vmem:[#allocation4 + $0x10] sm:$0xfc] }
 0x254   :  { %v2577_v51 = vadd.f32 %v10917_v3, %v2515_v35  ;;  %v9079_v35 = vld [vmem:[%s12290_s9 + $0x410] ss:$8 sps:$4 sm:$0xff]  }
 0x255   :  { %3616 = vmatpush1.bf16.msra.mxu0 %v9034_v53 }
 0x256   :  { %3617 = vmatprep.subr.bf16.mxu0 %v9039_v54 }
 0x259   :  { %3618 = vmatpush1.bf16.msra.mxu0 %v9037_v55 }
 0x25a   :  { %3619 = vmatprep.subr.bf16.mxu0 %v9042_v56 }
 0x25d   :  { %3620 = vmatpush1.bf16.msra.mxu0 %v9040_v57 }
 0x25e   :  { %3621 = vmatprep.subr.bf16.mxu0 %v9045_v58  ;;  %v3385_v58 = vld [vmem:[#allocation4 + $0x18] sm:$0xfc] }
 0x25f   :  { %v3403_v3 = vrot.slane %v3385_v58, 2  ;;  %v9109_v58 = vld [vmem:[%s12290_s9 + $0x4b0] ss:$8 sps:$4 sm:$0xff]  }
 0x261   :  { %3622 = vmatpush1.bf16.msra.mxu0 %v9043_v0  ;;  %v3663_v0 = vld [vmem:[#allocation4 + $0x48] sm:$0xf0] }
 0x262   :  { %3623 = vmatprep.subr.bf16.mxu0 %v9048_v4 }
 0x265   :  { %3624 = vmatpush1.bf16.msra.mxu0 %v9046_v5  ;;  %v3406_v5 = vrot.slane %v3388_v59, 2  ;;  %v9114_v59 = vld [vmem:[%s12290_s9 + $0x4c4] ss:$8 sps:$4 sm:$0xff]  }
 0x266   :  { %3625 = vmatprep.subr.bf16.mxu0 %v9051_v6 }
 0x269   :  { %3626 = vmatpush1.bf16.msra.mxu0 %v9049_v7  ;;  %v3659_v7 = vld [vmem:[#allocation4 + $0x18] sm:$0xf0] }
 0x26a   :  { %3627 = vmatprep.subr.bf16.mxu0 %v9054_v8 }
 0x26d   :  { %3628 = vmatpush1.bf16.msra.mxu0 %v9052_v9 }
 0x26e   :  { %3629 = vmatprep.subr.bf16.mxu0 %v9057_v10  ;;  %v3409_v10 = vrot.slane %v3389_v60, 2  ;;  %v9211_v60 = vld [vmem:[%s12293_s11 + $0x110] ss:$8 sps:$4 sm:$0xff]  }
 0x271   :  { %3630 = vmatpush1.bf16.msra.mxu0 %v9055_v11 }
 0x272   :  { %3631 = vmatprep.subr.bf16.mxu0 %v9060_v12  ;;  %v3400_v12 = vrot.slane %v3384_v62, 2  ;;  %v9213_v62 = vld [vmem:[%s12293_s11 + $0x114] ss:$8 sps:$4 sm:$0xff]  }
 0x275   :  { %3632 = vmatpush1.bf16.msra.mxu0 %v9058_v13  ;;  %v3683_v13 = vrot.slane %v3663_v0, 4  ;;  %v9112_v0 = vld [vmem:[%s12290_s9 + $0x4c0] ss:$8 sps:$4 sm:$0xff]  }
 0x276   :  { %3633 = vmatprep.subr.bf16.mxu0 %v9063_v16 }
 0x279   :  { %3634 = vmatpush1.bf16.msra.mxu0 %v9061_v17 }
 0x27a   :  { %3635 = vmatprep.subr.bf16.mxu0 %v9066_v1 }
 0x27d   :  { %3636 = vmatpush1.bf16.msra.mxu0 %v9064_v18 }
 0x27e   :  { %3637 = vmatprep.subr.bf16.mxu0 %v9069_v19 }
 0x281   :  { %3638 = vmatpush1.bf16.msra.mxu0 %v9067_v20  ;;  %v3677_v20 = vrot.slane %v3659_v7, 4  ;;  %v9120_v7 = vld [vmem:[%s12290_s9 + $0x4e4] ss:$8 sps:$4 sm:$0xff]  }
 0x282   :  { %3639 = vmatprep.subr.bf16.mxu0 %v9072_v21 }
 0x285   :  { %3640 = vmatpush1.bf16.msra.mxu0 %v9070_v22 }
 0x286   :  { %3641 = vmatprep.subr.bf16.mxu0 %v9075_v23 }
 0x289   :  { %3642 = vmatpush1.bf16.msra.mxu0 %v9073_v24 }
 0x28a   :  { %3885 = vmatprep.subr.bf16.mxu0 %v9078_v25 }
 0x309   :  { %v2471_v29 = vpop.f32.mrb[4].mxu1 }
 0x30a   :  { %v8454_v32 = vadd.f32 %v2471_v29, %v10830_v34  ;;  %v2473_v33 = vpop.f32.mrb[5].mxu1 }
 0x30b   :  { %v8455_v39 = vadd.f32 %v2473_v33, %v10835_v36  ;;  %v2475_v40 = vpop.f32.mrb[6].mxu1 }
 0x30c   :  { %v2496_v14 = vadd.f32 %v8454_v32, %v2489_v28  ;;  %v8456_v15 = vadd.f32 %v2475_v40, %v10837_v37  ;;  %v2477_v41 = vpop.f32.mrb[7].mxu1  ;;  %v9081_v32 = vld [vmem:[%s12290_s9 + $0x414] ss:$8 sps:$4 sm:$0xff]   ;;  %v9082_v40 = vld [vmem:[%s12290_s9 + $0x420] ss:$8 sps:$4 sm:$0xff]  }
 0x30d   :  { %v2497_v42 = vadd.f32 %v8455_v39, %v2493_v30  ;;  %v8457_v43 = vadd.f32 %v2477_v41, %v10839_v38  ;;  %v9084_v39 = vld [vmem:[%s12290_s9 + $0x424] ss:$8 sps:$4 sm:$0xff]  }
 0x30e   :  { %v2500_v45 = vmax.f32 %v2496_v14, 0.0  ;;  %v2498_v46 = vadd.f32 %v8456_v15, %v2489_v28  ;;  %v9076_v28 = vld [vmem:[%s12290_s9 + $0x400] ss:$8 sps:$4 sm:$0xff]   ;;  %v9087_v14 = vld [vmem:[%s12290_s9 + $0x434] ss:$8 sps:$4 sm:$0xff]  }
 0x30f   :  { %v2501_v34 = vmax.f32 %v2497_v42, 0.0  ;;  %v2499_v48 = vadd.f32 %v8457_v43, %v2493_v30  ;;  %v9085_v15 = vld [vmem:[%s12290_s9 + $0x430] ss:$8 sps:$4 sm:$0xff]   ;;  %v9090_v41 = vld [vmem:[%s12290_s9 + $0x444] ss:$8 sps:$4 sm:$0xff]  }
 0x310   :  { %v2579_v50 = vadd.f32 %v2571_v44, %v2500_v45  ;;  %v2502_v36 = vmax.f32 %v2498_v46, 0.0  ;;  %v9088_v42 = vld [vmem:[%s12290_s9 + $0x440] ss:$8 sps:$4 sm:$0xff]   ;;  %v9093_v43 = vld [vmem:[%s12290_s9 + $0x454] ss:$8 sps:$4 sm:$0xff]  }
 0x311   :  { %v11000_v52 = vadd.f32 %v2573_v47, %v2501_v34  ;;  %v2503_v37 = vmax.f32 %v2499_v48, 0.0  ;;  %v9091_v44 = vld [vmem:[%s12290_s9 + $0x450] ss:$8 sps:$4 sm:$0xff]   ;;  %v9096_v45 = vld [vmem:[%s12290_s9 + $0x464] ss:$8 sps:$4 sm:$0xff]  }
 0x312   :  { %v2583_v53 = vmax.f32 %v2579_v50, 0.0  ;;  %v2581_v54 = vadd.f32 %v2575_v49, %v2502_v36  ;;  %v9094_v46 = vld [vmem:[%s12290_s9 + $0x460] ss:$8 sps:$4 sm:$0xff]   ;;  %v9099_v47 = vld [vmem:[%s12290_s9 + $0x474] ss:$8 sps:$4 sm:$0xff]  }
 0x313   :  { %v2584_v38 = vmax.f32 %v11000_v52, 0.0  ;;  %v11003_v55 = vadd.f32 %v2577_v51, %v2503_v37  ;;  %v9097_v34 = vld [vmem:[%s12290_s9 + $0x470] ss:$8 sps:$4 sm:$0xff]   ;;  %v9102_v48 = vld [vmem:[%s12290_s9 + $0x484] ss:$8 sps:$4 sm:$0xff]  }
 0x314   :  { %2595 = vst [vmem:[#allocation4 + $0x20] sm:$0xff] %v2583_v53  ;;  %v2585_v56 = vmax.f32 %v2581_v54, 0.0  ;;  %v9100_v49 = vld [vmem:[%s12290_s9 + $0x480] ss:$8 sps:$4 sm:$0xff]   ;;  %v9105_v50 = vld [vmem:[%s12290_s9 + $0x494] ss:$8 sps:$4 sm:$0xff]  }
 0x315   :  { %2596 = vst [vmem:[#allocation4 + $0x28] sm:$0xff] %v2584_v38  ;;  %v2586_v57 = vmax.f32 %v11003_v55, 0.0  ;;  %v9103_v36 = vld [vmem:[%s12290_s9 + $0x490] ss:$8 sps:$4 sm:$0xff]   ;;  %v9108_v51 = vld [vmem:[%s12290_s9 + $0x4a4] ss:$8 sps:$4 sm:$0xff]  }
 0x316   :  { %2597 = vst [vmem:[#allocation4 + $0x50] sm:$0xff] %v2585_v56  ;;  %v9106_v37 = vld [vmem:[%s12290_s9 + $0x4a0] ss:$8 sps:$4 sm:$0xff]   ;;  %v9111_v53 = vld [vmem:[%s12290_s9 + $0x4b4] ss:$8 sps:$4 sm:$0xff]  }
 0x317   :  { %2598 = vst [vmem:[#allocation4 + $0x58] sm:$0xff] %v2586_v57  ;;  %v9205_v54 = vld [vmem:[%s12293_s11 + $0x100] ss:$8 sps:$4 sm:$0xff]   ;;  %v9207_v56 = vld [vmem:[%s12293_s11 + $0x104] ss:$8 sps:$4 sm:$0xff]  }
 0x318   :  { %4777 = vmatprep.subr.bf16.mxu1 %v9207_v56  ;;  %v4555_v56 = vld [vmem:[#allocation5 + $0x38] sm:$0xc0]  ;;  %v9180_v52 = vld [vmem:[%s12290_s9 + $0x624] ss:$8 sps:$4 sm:$0xff]   ;;  %v9289_v55 = vld [vmem:[%s12293_s11 + $0x70] ss:$8 sps:$4 sm:$0xff]  }
 0x319   :  { %4778 = vmatpush1.bf16.msra.mxu1 %v9205_v54  ;;  %v4553_v54 = vld [vmem:[#allocation5 + $0x18] sm:$0x3f] }
 0x31a   :  { %4779 = vmatprep.subr.bf16.mxu1 %v9213_v62  ;;  %v4570_v62 = vrot.slane %v4553_v54, 6 }
 0x31b   :  { %v3386_v4 = vld [vmem:[#allocation4 + $0x20] sm:$0x3] }
 0x31c   :  { %v3387_v6 = vld [vmem:[#allocation4 + $0x28] sm:$0x3]  ;;  %v3401_v17 = vrot.slane %v3386_v4, 2 }
 0x31d   :  { %v3661_v8 = vld [vmem:[#allocation4 + $0x28] sm:$0xf]  ;;  %v3404_v9 = vrot.slane %v3387_v6, 2  ;;  %v3390_v11 = vld [vmem:[#allocation4 + $0x50] sm:$0x3]  ;;  %4780 = vmatpush1.bf16.msra.mxu1 %v9211_v60 }
 0x31e   :  { %v3391_v16 = vld [vmem:[#allocation4 + $0x58] sm:$0x3]  ;;  %v3407_v1 = vrot.slane %v3390_v11, 2  ;;  %v3678_v21 = vrot.slane %v3661_v8, 4  ;;  %v3402_v29 = vsel %vm614_vm4, %v3400_v12, %v3401_v17  ;;  %v9217_v4 = vld [vmem:[%s12293_s11 + $0x120] ss:$8 sps:$4 sm:$0xff]  }
 0x31f   :  { %v3665_v18 = vld [vmem:[#allocation4 + $0x58] sm:$0xf]  ;;  %v3410_v19 = vrot.slane %v3391_v16, 2  ;;  %v3405_v24 = vsel %vm614_vm4, %v3403_v3, %v3404_v9  ;;  %v9117_v3 = vld [vmem:[%s12290_s9 + $0x4d4] ss:$8 sps:$4 sm:$0xff]  }
 0x320   :  { %v3684_v22 = vrot.slane %v3665_v18, 4  ;;  %v3408_v23 = vsel %vm614_vm4, %v3406_v5, %v3407_v1  ;;  %v3679_v31 = vsel %vm1155_vm3, %v3677_v20, %v3678_v21  ;;  %v9219_v5 = vld [vmem:[%s12293_s11 + $0x124] ss:$8 sps:$4 sm:$0xff]   ;;  %v9115_v6 = vld [vmem:[%s12290_s9 + $0x4d0] ss:$8 sps:$4 sm:$0xff]  }
 0x321   :  { %v3411_v25 = vsel %vm614_vm4, %v3409_v10, %v3410_v19  ;;  %v3449_v30 = vpack.c.bf16 %v3408_v23, %v3402_v29  ;;  %4781 = vmatprep.subr.bf16.mxu1 %v9219_v5  ;;  %v3658_v8 = vld [vmem:[#allocation4 + $0x10] sm:$0xf0]  ;;  %v3662_v9 = vld [vmem:[#allocation4 + $0x40] sm:$0xf0]  ;;  %v3664_v10 = vld [vmem:[#allocation4 + $0x50] sm:$0xf] }
 0x322   :  { %v3685_v26 = vsel %vm1155_vm3, %v3683_v13, %v3684_v22  ;;  %v3450_v27 = vpack.c.bf16 %v3411_v25, %v3405_v24  ;;  %v9223_v11 = vld [vmem:[%s12293_s11 + $0x130] ss:$8 sps:$4 sm:$0xff]   ;;  %v9225_v12 = vld [vmem:[%s12293_s11 + $0x134] ss:$8 sps:$4 sm:$0xff]   ;;  %v9118_v13 = vld [vmem:[%s12290_s9 + $0x4e0] ss:$8 sps:$4 sm:$0xff]   ;;  %4782 = vmatpush1.bf16.msra.mxu1 %v9217_v4 }
 0x323   :  { %v3724_v33 = vpack.c.bf16 %v3685_v26, %v3679_v31  ;;  %v3933_v16 = vld [vmem:[#allocation4 + $0x18] sm:$0xc0]  ;;  %v3937_v17 = vld [vmem:[#allocation4 + $0x48] sm:$0xc0]  ;;  %v3660_v18 = vld [vmem:[#allocation4 + $0x20] sm:$0xf]  ;;  %4783 = vmatprep.subr.bf16.mxu1 %v9225_v12 }
 0x324   :  { %3643 = vmatprep.mubr.bf16.mxu0 %v3450_v27  ;;  %v9123_v1 = vld [vmem:[%s12290_s9 + $0x4f4] ss:$8 sps:$4 sm:$0xff]   ;;  %v3935_v19 = vld [vmem:[#allocation4 + $0x28] sm:$0x3f]  ;;  %v3674_v23 = vrot.slane %v3658_v8, 4  ;;  %v3680_v24 = vrot.slane %v3662_v9, 4 }
 0x325   :  { %3644 = vmatmul.mubr.bf16.vlgmr.msra.gmra.mrb[12].mxu0 %v3449_v30  ;;  %v3939_v20 = vld [vmem:[#allocation4 + $0x58] sm:$0x3f]  ;;  %v9229_v21 = vld [vmem:[%s12293_s11 + $0x140] ss:$8 sps:$4 sm:$0xff]   ;;  %v9231_v22 = vld [vmem:[%s12293_s11 + $0x144] ss:$8 sps:$4 sm:$0xff]  }
 0x326   :  { %3886 = vmatpush1.bf16.msra.mxu0 %v9076_v28  ;;  %3917 = vmatprep.mubr.bf16.mxu0 %v3724_v33  ;;  %v3681_v25 = vrot.slane %v3664_v10, 4  ;;  %v3951_v26 = vrot.slane %v3933_v16, 6  ;;  %v3957_v27 = vrot.slane %v3937_v17, 6  ;;  %v3958_v28 = vrot.slane %v3939_v20, 6  ;;  %v9121_v29 = vld [vmem:[%s12290_s9 + $0x4f0] ss:$8 sps:$4 sm:$0xff]  }
 0x327   :  { %3887 = vmatprep.subr.bf16.mxu0 %v9081_v32  ;;  %4784 = vmatpush1.bf16.msra.mxu1 %v9223_v11  ;;  %v3675_v30 = vrot.slane %v3660_v18, 4  ;;  %v9126_v31 = vld [vmem:[%s12290_s9 + $0x504] ss:$8 sps:$4 sm:$0xff]   ;;  %v3952_v32 = vrot.slane %v3935_v19, 6  ;;  %v9235_v33 = vld [vmem:[%s12293_s11 + $0x150] ss:$8 sps:$4 sm:$0xff]  }
 0x328   :  { %4785 = vmatprep.subr.bf16.mxu1 %v9231_v22  ;;  %v9133_v4 = vld [vmem:[%s12290_s9 + $0x530] ss:$8 sps:$4 sm:$0xff]   ;;  %v9138_v5 = vld [vmem:[%s12290_s9 + $0x544] ss:$8 sps:$4 sm:$0xff]   ;;  %v9136_v11 = vld [vmem:[%s12290_s9 + $0x540] ss:$8 sps:$4 sm:$0xff]  }
 0x329   :  { %v9247_v8 = vld [vmem:[%s12293_s11 + $0x190] ss:$8 sps:$4 sm:$0xff]   ;;  %v9252_v10 = vld [vmem:[%s12293_s11 + $0x1a4] ss:$8 sps:$4 sm:$0xff]   ;;  %v9141_v12 = vld [vmem:[%s12290_s9 + $0x554] ss:$8 sps:$4 sm:$0xff]  }
 0x32a   :  { %3888 = vmatpush1.bf16.msra.mxu0 %v9079_v35  ;;  %v9237_v35 = vld [vmem:[%s12293_s11 + $0x154] ss:$8 sps:$4 sm:$0xff]   ;;  %v9139_v17 = vld [vmem:[%s12290_s9 + $0x550] ss:$8 sps:$4 sm:$0xff]   ;;  %v9258_v19 = vld [vmem:[%s12293_s11 + $0x1c4] ss:$8 sps:$4 sm:$0xff]  }
 0x32b   :  { %3889 = vmatprep.subr.bf16.mxu0 %v9084_v39  ;;  %v3682_v39 = vsel %vm1155_vm3, %v3680_v24, %v3681_v25  ;;  %4786 = vmatpush1.bf16.msra.mxu1 %v9229_v21  ;;  %v9255_v16 = vld [vmem:[%s12293_s11 + $0x1b4] ss:$8 sps:$4 sm:$0xff]   ;;  %v9253_v18 = vld [vmem:[%s12293_s11 + $0x1b0] ss:$8 sps:$4 sm:$0xff]   ;;  %v9142_v20 = vld [vmem:[%s12290_s9 + $0x560] ss:$8 sps:$4 sm:$0xff]  }
 0x32c   :  { %4787 = vmatprep.subr.bf16.mxu1 %v9237_v35  ;;  %v9147_v21 = vld [vmem:[%s12290_s9 + $0x574] ss:$8 sps:$4 sm:$0xff]   ;;  %v9256_v22 = vld [vmem:[%s12293_s11 + $0x1c0] ss:$8 sps:$4 sm:$0xff]   ;;  %v9145_v24 = vld [vmem:[%s12290_s9 + $0x570] ss:$8 sps:$4 sm:$0xff]  }
 0x32d   :  { %v9150_v25 = vld [vmem:[%s12290_s9 + $0x584] ss:$8 sps:$4 sm:$0xff]  }
 0x32e   :  { %3890 = vmatpush1.bf16.msra.mxu0 %v9082_v40  ;;  %v9124_v40 = vld [vmem:[%s12290_s9 + $0x500] ss:$8 sps:$4 sm:$0xff]   ;;  %v4485_v35 = vld [vmem:[#allocation5 + $0x8] sm:$0xf0] }
 0x32f   :  { %3891 = vmatprep.subr.bf16.mxu0 %v9087_v14  ;;  %v3959_v14 = vsel %vm109_vm0, %v3957_v27, %v3958_v28  ;;  %4788 = vmatpush1.bf16.msra.mxu1 %v9235_v33  ;;  %v9264_v27 = vld [vmem:[%s12293_s11 + $0x1e4] ss:$8 sps:$4 sm:$0xff]  }
 0x330   :  { %v4550_v28 = vld [vmem:[#allocation5] sm:$0xc0]  ;;  %v4556_v33 = vld [vmem:[#allocation5 + $0x40] sm:$0x3f] }
 0x332   :  { %3892 = vmatpush1.bf16.msra.mxu0 %v9085_v15  ;;  %v9129_v15 = vld [vmem:[%s12290_s9 + $0x514] ss:$8 sps:$4 sm:$0xff]  }
 0x333   :  { %3893 = vmatprep.subr.bf16.mxu0 %v9090_v41  ;;  %v3676_v41 = vsel %vm1155_vm3, %v3674_v23, %v3675_v30  ;;  %v9261_v23 = vld [vmem:[%s12293_s11 + $0x1d4] ss:$8 sps:$4 sm:$0xff]  }
 0x334   :  { %v4552_v30 = vld [vmem:[#allocation5 + $0x10] sm:$0x3f] }
 0x336   :  { %3894 = vmatpush1.bf16.msra.mxu0 %v9088_v42  ;;  %v3723_v42 = vpack.c.bf16 %v3682_v39, %v3676_v41  ;;  %v4487_v39 = vld [vmem:[#allocation5 + $0x18] sm:$0xf]  ;;  %v9267_v41 = vld [vmem:[%s12293_s11 + $0x1f4] ss:$8 sps:$4 sm:$0xff]  }
 0x337   :  { %3895 = vmatprep.subr.bf16.mxu0 %v9093_v43  ;;  %v3953_v43 = vsel %vm109_vm0, %v3951_v26, %v3952_v32  ;;  %v9259_v26 = vld [vmem:[%s12293_s11 + $0x1d0] ss:$8 sps:$4 sm:$0xff]   ;;  %v9153_v32 = vld [vmem:[%s12290_s9 + $0x594] ss:$8 sps:$4 sm:$0xff]  }
 0x33a   :  { %3896 = vmatpush1.bf16.msra.mxu0 %v9091_v44  ;;  %v3998_v44 = vpack.c.bf16 %v3959_v14, %v3953_v43  ;;  %v4491_v14 = vld [vmem:[#allocation5 + $0x48] sm:$0xf]  ;;  %v4567_v43 = vrot.slane %v4552_v30, 6 }
 0x33b   :  { %3897 = vmatprep.subr.bf16.mxu0 %v9096_v45  ;;  %v9238_v45 = vld [vmem:[%s12293_s11 + $0x160] ss:$8 sps:$4 sm:$0xff]  }
 0x33e   :  { %3898 = vmatpush1.bf16.msra.mxu0 %v9094_v46  ;;  %v9240_v46 = vld [vmem:[%s12293_s11 + $0x164] ss:$8 sps:$4 sm:$0xff]  }
 0x33f   :  { %3899 = vmatprep.subr.bf16.mxu0 %v9099_v47  ;;  %v9127_v47 = vld [vmem:[%s12290_s9 + $0x510] ss:$8 sps:$4 sm:$0xff]   ;;  %4789 = vmatprep.subr.bf16.mxu1 %v9240_v46  ;;  %v4503_v46 = vrot.slane %v4485_v35, 4  ;;  %v9288_v35 = vld [vmem:[%s12293_s11 + $0x64] ss:$8 sps:$4 sm:$0xff]  }
 0x340   :  { %4790 = vmatpush1.bf16.msra.mxu1 %v9238_v45  ;;  %v4573_v45 = vrot.slane %v4556_v33, 6  ;;  %v9283_v33 = vld [vmem:[%s12293_s11 + $0x50] ss:$8 sps:$4 sm:$0xff]  }
 0x342   :  { %3900 = vmatpush1.bf16.msra.mxu0 %v9097_v34  ;;  %v9243_v34 = vld [vmem:[%s12293_s11 + $0x174] ss:$8 sps:$4 sm:$0xff]  }
 0x343   :  { %3901 = vmatprep.subr.bf16.mxu0 %v9102_v48  ;;  %v9132_v48 = vld [vmem:[%s12290_s9 + $0x524] ss:$8 sps:$4 sm:$0xff]   ;;  %4791 = vmatprep.subr.bf16.mxu1 %v9243_v34 }
 0x346   :  { %3902 = vmatpush1.bf16.msra.mxu0 %v9100_v49  ;;  %v9241_v49 = vld [vmem:[%s12293_s11 + $0x170] ss:$8 sps:$4 sm:$0xff]  }
 0x347   :  { %3903 = vmatprep.subr.bf16.mxu0 %v9105_v50  ;;  %v9246_v50 = vld [vmem:[%s12293_s11 + $0x184] ss:$8 sps:$4 sm:$0xff]   ;;  %4792 = vmatpush1.bf16.msra.mxu1 %v9241_v49  ;;  %v9151_v49 = vld [vmem:[%s12290_s9 + $0x590] ss:$8 sps:$4 sm:$0xff]  }
 0x348   :  { %4793 = vmatprep.subr.bf16.mxu1 %v9246_v50  ;;  %v9156_v50 = vld [vmem:[%s12290_s9 + $0x5a4] ss:$8 sps:$4 sm:$0xff]  }
 0x34a   :  { %3904 = vmatpush1.bf16.msra.mxu0 %v9103_v36  ;;  %v9130_v36 = vld [vmem:[%s12290_s9 + $0x520] ss:$8 sps:$4 sm:$0xff]  }
 0x34b   :  { %3905 = vmatprep.subr.bf16.mxu0 %v9108_v51  ;;  %v9135_v51 = vld [vmem:[%s12290_s9 + $0x534] ss:$8 sps:$4 sm:$0xff]  }
 0x34e   :  { %3906 = vmatpush1.bf16.msra.mxu0 %v9106_v37  ;;  %v9244_v37 = vld [vmem:[%s12293_s11 + $0x180] ss:$8 sps:$4 sm:$0xff]  }
 0x34f   :  { %3907 = vmatprep.subr.bf16.mxu0 %v9111_v53  ;;  %v4551_v53 = vld [vmem:[#allocation5 + $0x8] sm:$0xc0]  ;;  %4794 = vmatpush1.bf16.msra.mxu1 %v9244_v37 }
 0x350   :  { %v4569_v60 = vrot.slane %v4551_v53, 6  ;;  %v9270_v53 = vld [vmem:[%s12293_s11 + $0x4] ss:$8 sps:$4 sm:$0xff]  }
 0x352   :  { %3908 = vmatpush1.bf16.msra.mxu0 %v9109_v58  ;;  %v4557_v58 = vld [vmem:[#allocation5 + $0x48] sm:$0x3f] }
 0x353   :  { %3909 = vmatprep.subr.bf16.mxu0 %v9114_v59  ;;  %v9249_v59 = vld [vmem:[%s12293_s11 + $0x194] ss:$8 sps:$4 sm:$0xff]  }
 0x354   :  { %4795 = vmatprep.subr.bf16.mxu1 %v9249_v59  ;;  %v9159_v59 = vld [vmem:[%s12290_s9 + $0x5b4] ss:$8 sps:$4 sm:$0xff]  }
 0x355   :  { %4796 = vmatpush1.bf16.msra.mxu1 %v9247_v8  ;;  %v9160_v8 = vld [vmem:[%s12290_s9 + $0x5c0] ss:$8 sps:$4 sm:$0xff]  }
 0x356   :  { %3910 = vmatpush1.bf16.msra.mxu0 %v9112_v0  ;;  %v4575_v0 = vrot.slane %v4555_v56, 6  ;;  %4797 = vmatprep.subr.bf16.mxu1 %v9252_v10  ;;  %v9274_v10 = vld [vmem:[%s12293_s11 + $0x20] ss:$8 sps:$4 sm:$0xff]  }
 0x357   :  { %3911 = vmatprep.subr.bf16.mxu0 %v9117_v3  ;;  %v4576_v3 = vrot.slane %v4557_v58, 6  ;;  %v9154_v58 = vld [vmem:[%s12290_s9 + $0x5a0] ss:$8 sps:$4 sm:$0xff]  }
 0x35a   :  { %3912 = vmatpush1.bf16.msra.mxu0 %v9115_v6  ;;  %v4571_v6 = vsel %vm109_vm0, %v4569_v60, %v4570_v62  ;;  %v9268_v62 = vld [vmem:[%s12293_s11] ss:$8 sps:$4 sm:$0xff]  }
 0x35b   :  { %3913 = vmatprep.subr.bf16.mxu0 %v9120_v7  ;;  %v4577_v7 = vsel %vm109_vm0, %v4575_v0, %v4576_v3  ;;  %v9273_v3 = vld [vmem:[%s12293_s11 + $0x14] ss:$8 sps:$4 sm:$0xff]  }
 0x35c   :  { %v4616_v9 = vpack.c.bf16 %v4577_v7, %v4571_v6  ;;  %v9271_v6 = vld [vmem:[%s12293_s11 + $0x10] ss:$8 sps:$4 sm:$0xff]   ;;  %v9276_v7 = vld [vmem:[%s12293_s11 + $0x24] ss:$8 sps:$4 sm:$0xff]  }
 0x35e   :  { %3914 = vmatpush1.bf16.msra.mxu0 %v9118_v13  ;;  %4809 = vmatprep.mubr.bf16.mxu1 %v4616_v9  ;;  %v9250_v13 = vld [vmem:[%s12293_s11 + $0x1a0] ss:$8 sps:$4 sm:$0xff]   ;;  %v9165_v9 = vld [vmem:[%s12290_s9 + $0x5d4] ss:$8 sps:$4 sm:$0xff]  }
 0x35f   :  { %3915 = vmatprep.subr.bf16.mxu0 %v9123_v1  ;;  %v9144_v1 = vld [vmem:[%s12290_s9 + $0x564] ss:$8 sps:$4 sm:$0xff]   ;;  %4798 = vmatpush1.bf16.msra.mxu1 %v9250_v13 }
 0x360   :  { %4799 = vmatprep.subr.bf16.mxu1 %v9255_v16  ;;  %v9168_v13 = vld [vmem:[%s12290_s9 + $0x5e4] ss:$8 sps:$4 sm:$0xff]  }
 0x361   :  { %v3936_v16 = vld [vmem:[#allocation4 + $0x40] sm:$0xc0] }
 0x362   :  { %3916 = vmatpush1.bf16.msra.mxu0 %v9121_v29  ;;  %v9148_v29 = vld [vmem:[%s12290_s9 + $0x580] ss:$8 sps:$4 sm:$0xff]  }
 0x363   :  { %4159 = vmatprep.subr.bf16.mxu0 %v9126_v31  ;;  %4800 = vmatpush1.bf16.msra.mxu1 %v9253_v18  ;;  %v4554_v31 = vld [vmem:[#allocation5 + $0x30] sm:$0xc0]  ;;  %v9282_v18 = vld [vmem:[%s12293_s11 + $0x44] ss:$8 sps:$4 sm:$0xff]  }
 0x364   :  { %4801 = vmatprep.subr.bf16.mxu1 %v9258_v19  ;;  %v9166_v19 = vld [vmem:[%s12290_s9 + $0x5e0] ss:$8 sps:$4 sm:$0xff]  }
 0x365   :  { %3918 = vmatmul.mubr.bf16.vlgmr.msra.gmra.mrb[12].mxu0 %v3723_v42  ;;  %v4566_v42 = vrot.slane %v4550_v28, 6  ;;  %v9285_v28 = vld [vmem:[%s12293_s11 + $0x54] ss:$8 sps:$4 sm:$0xff]  }
 0x366   :  { %4160 = vmatpush1.bf16.msra.mxu0 %v9124_v40  ;;  %4191 = vmatprep.mubr.bf16.mxu0 %v3998_v44  ;;  %v4489_v40 = vld [vmem:[#allocation5 + $0x38] sm:$0xf0]  ;;  %v4572_v44 = vrot.slane %v4554_v31, 6 }
 0x367   :  { %4161 = vmatprep.subr.bf16.mxu0 %v9129_v15  ;;  %4802 = vmatpush1.bf16.msra.mxu1 %v9256_v22  ;;  %v9262_v15 = vld [vmem:[%s12293_s11 + $0x1e0] ss:$8 sps:$4 sm:$0xff]   ;;  %v4509_v34 = vrot.slane %v4489_v40, 4 }
 0x368   :  { %4803 = vmatprep.subr.bf16.mxu1 %v9261_v23  ;;  %v4574_v37 = vsel %vm109_vm0, %v4572_v44, %v4573_v45  ;;  %v3934_v22 = vld [vmem:[#allocation4 + $0x20] sm:$0x3f]  ;;  %v9169_v23 = vld [vmem:[%s12290_s9 + $0x5f0] ss:$8 sps:$4 sm:$0xff]   ;;  %v9183_v44 = vld [vmem:[%s12290_s9 + $0x634] ss:$8 sps:$4 sm:$0xff]  }
 0x369   :  { %v3949_v30 = vrot.slane %v3934_v22, 6  ;;  %v9181_v45 = vld [vmem:[%s12290_s9 + $0x630] ss:$8 sps:$4 sm:$0xff]  }
 0x36a   :  { %4162 = vmatpush1.bf16.msra.mxu0 %v9127_v47  ;;  %v4504_v47 = vrot.slane %v4487_v39, 4  ;;  %v9177_v39 = vld [vmem:[%s12290_s9 + $0x614] ss:$8 sps:$4 sm:$0xff]   ;;  %v9313_v22 = vld [vmem:[%s12293_s11 + $0xf0] ss:$8 sps:$4 sm:$0xff]  }
 0x36b   :  { %4163 = vmatprep.subr.bf16.mxu0 %v9132_v48  ;;  %4804 = vmatpush1.bf16.msra.mxu1 %v9259_v26  ;;  %v4510_v48 = vrot.slane %v4491_v14, 4  ;;  %v9280_v26 = vld [vmem:[%s12293_s11 + $0x40] ss:$8 sps:$4 sm:$0xff]  }
 0x36c   :  { %4805 = vmatprep.subr.bf16.mxu1 %v9264_v27  ;;  %v4505_v54 = vsel %vm1155_vm3, %v4503_v46, %v4504_v47  ;;  %v9174_v27 = vld [vmem:[%s12290_s9 + $0x604] ss:$8 sps:$4 sm:$0xff]   ;;  %v9292_v46 = vld [vmem:[%s12293_s11 + $0x80] ss:$8 sps:$4 sm:$0xff]   ;;  %v9297_v47 = vld [vmem:[%s12293_s11 + $0x94] ss:$8 sps:$4 sm:$0xff]  }
 0x36d   :  { %v4511_v56 = vsel %vm1155_vm3, %v4509_v34, %v4510_v48  ;;  %v9186_v34 = vld [vmem:[%s12290_s9 + $0x644] ss:$8 sps:$4 sm:$0xff]   ;;  %v9184_v48 = vld [vmem:[%s12290_s9 + $0x640] ss:$8 sps:$4 sm:$0xff]  }
 0x36e   :  { %4164 = vmatpush1.bf16.msra.mxu0 %v9130_v36  ;;  %v9265_v36 = vld [vmem:[%s12293_s11 + $0x1f0] ss:$8 sps:$4 sm:$0xff]   ;;  %v4549_v0 = vpack.c.bf16 %v4511_v56, %v4505_v54  ;;  %v9192_v54 = vld [vmem:[%s12290_s9 + $0x664] ss:$8 sps:$4 sm:$0xff]  }
 0x36f   :  { %4165 = vmatprep.subr.bf16.mxu0 %v9135_v51  ;;  %4806 = vmatpush1.bf16.msra.mxu1 %v9262_v15  ;;  %v4568_v51 = vsel %vm109_vm0, %v4566_v42, %v4567_v43  ;;  %v4244_v15 = vpack.c.bf16 %v2586_v57, %v2584_v38  ;;  %v9286_v42 = vld [vmem:[%s12293_s11 + $0x60] ss:$8 sps:$4 sm:$0xff]   ;;  %v9291_v43 = vld [vmem:[%s12293_s11 + $0x74] ss:$8 sps:$4 sm:$0xff]   ;;  %v9294_v57 = vld [vmem:[%s12293_s11 + $0x84] ss:$8 sps:$4 sm:$0xff]  }
 0x370   :  { %4807 = vmatprep.subr.bf16.mxu1 %v9267_v41  ;;  %v4615_v60 = vpack.c.bf16 %v4574_v37, %v4568_v51  ;;  %v9175_v41 = vld [vmem:[%s12290_s9 + $0x610] ss:$8 sps:$4 sm:$0xff]   ;;  %v9178_v38 = vld [vmem:[%s12290_s9 + $0x620] ss:$8 sps:$4 sm:$0xff]  }
 0x371   :  { %v9187_v51 = vld [vmem:[%s12290_s9 + $0x650] ss:$8 sps:$4 sm:$0xff]   ;;  %v9298_v37 = vld [vmem:[%s12293_s11 + $0xa0] ss:$8 sps:$4 sm:$0xff]  }
 0x372   :  { %4166 = vmatpush1.bf16.msra.mxu0 %v9133_v4  ;;  %v9157_v4 = vld [vmem:[%s12290_s9 + $0x5b0] ss:$8 sps:$4 sm:$0xff]  }
 0x373   :  { %4167 = vmatprep.subr.bf16.mxu0 %v9138_v5  ;;  %4808 = vmatpush1.bf16.msra.mxu1 %v9265_v36  ;;  %v9162_v5 = vld [vmem:[%s12290_s9 + $0x5c4] ss:$8 sps:$4 sm:$0xff]   ;;  %v9189_v36 = vld [vmem:[%s12290_s9 + $0x654] ss:$8 sps:$4 sm:$0xff]   ;;  %v9301_v56 = vld [vmem:[%s12293_s11 + $0xb0] ss:$8 sps:$4 sm:$0xff]  }
 0x374   :  { %4980 = vmatprep.subr.bf16.mxu1 %v9270_v53  ;;  %v9303_v53 = vld [vmem:[%s12293_s11 + $0xb4] ss:$8 sps:$4 sm:$0xff]  }
 0x376   :  { %4168 = vmatpush1.bf16.msra.mxu0 %v9136_v11  ;;  %4810 = vmatmul.mubr.bf16.vlgmr.msra.gmra.mrb[8].mxu1 %v4615_v60  ;;  %v9279_v11 = vld [vmem:[%s12293_s11 + $0x34] ss:$8 sps:$4 sm:$0xff]  }
 0x377   :  { %4169 = vmatprep.subr.bf16.mxu0 %v9141_v12  ;;  %4981 = vmatpush1.bf16.msra.mxu1 %v9268_v62  ;;  %v9163_v12 = vld [vmem:[%s12290_s9 + $0x5d0] ss:$8 sps:$4 sm:$0xff]   ;;  %v9195_v60 = vld [vmem:[%s12290_s9 + $0x674] ss:$8 sps:$4 sm:$0xff]   ;;  %v9304_v62 = vld [vmem:[%s12293_s11 + $0xc0] ss:$8 sps:$4 sm:$0xff]  }
 0x378   :  { %5012 = vmatprep.mubr.bf16.mxu1 %v4549_v0  ;;  %4982 = vmatprep.subr.bf16.mxu1 %v9273_v3  ;;  %v9309_v0 = vld [vmem:[%s12293_s11 + $0xd4] ss:$8 sps:$4 sm:$0xff]   ;;  %v9193_v3 = vld [vmem:[%s12290_s9 + $0x670] ss:$8 sps:$4 sm:$0xff]  }
 0x37a   :  { %4170 = vmatpush1.bf16.msra.mxu0 %v9139_v17  ;;  %v3938_v17 = vld [vmem:[#allocation4 + $0x50] sm:$0x3f] }
 0x37b   :  { %4171 = vmatprep.subr.bf16.mxu0 %v9144_v1  ;;  %4983 = vmatpush1.bf16.msra.mxu1 %v9271_v6  ;;  %v9277_v1 = vld [vmem:[%s12293_s11 + $0x30] ss:$8 sps:$4 sm:$0xff]   ;;  %v4484_v6 = vld [vmem:[#allocation5] sm:$0xf0] }
 0x37c   :  { %4984 = vmatprep.subr.bf16.mxu1 %v9276_v7  ;;  %v9312_v7 = vld [vmem:[%s12293_s11 + $0xe4] ss:$8 sps:$4 sm:$0xff]  }
 0x37e   :  { %4172 = vmatpush1.bf16.msra.mxu0 %v9142_v20  ;;  %v3932_v20 = vld [vmem:[#allocation4 + $0x10] sm:$0xc0] }
 0x37f   :  { %4173 = vmatprep.subr.bf16.mxu0 %v9147_v21  ;;  %4985 = vmatpush1.bf16.msra.mxu1 %v9274_v10  ;;  %v9171_v21 = vld [vmem:[%s12290_s9 + $0x5f4] ss:$8 sps:$4 sm:$0xff]   ;;  %v4490_v10 = vld [vmem:[#allocation5 + $0x40] sm:$0xf] }
 0x380   :  { %4986 = vmatprep.subr.bf16.mxu1 %v9279_v11  ;;  %v9196_v11 = vld [vmem:[%s12290_s9 + $0x680] ss:$8 sps:$4 sm:$0xff]  }
 0x382   :  { %4174 = vmatpush1.bf16.msra.mxu0 %v9145_v24  ;;  %v3954_v24 = vrot.slane %v3936_v16, 6  ;;  %v9315_v16 = vld [vmem:[%s12293_s11 + $0xf4] ss:$8 sps:$4 sm:$0xff]  }
 0x383   :  { %4175 = vmatprep.subr.bf16.mxu0 %v9150_v25  ;;  %v3955_v25 = vrot.slane %v3938_v17, 6  ;;  %4987 = vmatpush1.bf16.msra.mxu1 %v9277_v1  ;;  %v4500_v17 = vrot.slane %v4484_v6, 4  ;;  %v9199_v1 = vld [vmem:[%s12290_s9 + $0x690] ss:$8 sps:$4 sm:$0xff]   ;;  %v9357_v6 = vld [vmem:[%s12293_s11 + $0x2d4] ss:$8 sps:$4 sm:$0xff]  }
 0x384   :  { %4988 = vmatprep.subr.bf16.mxu1 %v9282_v18 }
 0x385   :  { %v3956_v31 = vsel %vm109_vm0, %v3954_v24, %v3955_v25  ;;  %v9318_v25 = vld [vmem:[%s12293_s11 + $0x204] ss:$8 sps:$4 sm:$0xff]  }
 0x386   :  { %4176 = vmatpush1.bf16.msra.mxu0 %v9148_v29  ;;  %v3948_v29 = vrot.slane %v3932_v20, 6  ;;  %v4507_v20 = vrot.slane %v4490_v10, 4  ;;  %v9363_v10 = vld [vmem:[%s12293_s11 + $0x2f4] ss:$8 sps:$4 sm:$0xff]  }
 0x387   :  { %4177 = vmatprep.subr.bf16.mxu0 %v9153_v32  ;;  %v9172_v32 = vld [vmem:[%s12290_s9 + $0x600] ss:$8 sps:$4 sm:$0xff]   ;;  %4989 = vmatpush1.bf16.msra.mxu1 %v9280_v26 }
 0x388   :  { %4990 = vmatprep.subr.bf16.mxu1 %v9285_v28  ;;  %v3950_v40 = vsel %vm109_vm0, %v3948_v29, %v3949_v30  ;;  %v9202_v26 = vld [vmem:[%s12290_s9 + $0x6a0] ss:$8 sps:$4 sm:$0xff]  }
 0x389   :  { %v3997_v14 = vpack.c.bf16 %v3956_v31, %v3950_v40  ;;  %v9316_v29 = vld [vmem:[%s12293_s11 + $0x200] ss:$8 sps:$4 sm:$0xff]   ;;  %v9324_v40 = vld [vmem:[%s12293_s11 + $0x224] ss:$8 sps:$4 sm:$0xff]  }
 0x38a   :  { %4178 = vmatpush1.bf16.msra.mxu0 %v9151_v49  ;;  %v9295_v49 = vld [vmem:[%s12293_s11 + $0x90] ss:$8 sps:$4 sm:$0xff]   ;;  %v9669_v30 = vld [vmem:[#allocation3] sm:$0xff] }
 0x38b   :  { %4179 = vmatprep.subr.bf16.mxu0 %v9156_v50  ;;  %4991 = vmatpush1.bf16.msra.mxu1 %v9283_v33  ;;  %v9300_v50 = vld [vmem:[%s12293_s11 + $0xa4] ss:$8 sps:$4 sm:$0xff]   ;;  %v11490_v31 = vpack.c.bf16 %v9669_v30, %v9669_v30  ;;  %v9208_v33 = vld [vmem:[%s12290_s9 + $0x6b0] ss:$8 sps:$4 sm:$0xff]   ;;  %v9388_v30 = vld [vmem:[%s12293_s11 + $0x380] ss:$8 sps:$4 sm:$0xff]  }
 0x38c   :  { %4992 = vmatprep.subr.bf16.mxu1 %v9288_v35  ;;  %v9216_v35 = vld [vmem:[%s12290_s9 + $0x6c4] ss:$8 sps:$4 sm:$0xff]  }
 0x38e   :  { %4180 = vmatpush1.bf16.msra.mxu0 %v9154_v58  ;;  %v9306_v58 = vld [vmem:[%s12293_s11 + $0xc4] ss:$8 sps:$4 sm:$0xff]  }
 0x38f   :  { %4181 = vmatprep.subr.bf16.mxu0 %v9159_v59  ;;  %4993 = vmatpush1.bf16.msra.mxu1 %v9286_v42  ;;  %v9190_v59 = vld [vmem:[%s12290_s9 + $0x660] ss:$8 sps:$4 sm:$0xff]   ;;  %v9327_v42 = vld [vmem:[%s12293_s11 + $0x234] ss:$8 sps:$4 sm:$0xff]  }
 0x390   :  { %4994 = vmatprep.subr.bf16.mxu1 %v9291_v43  ;;  %v9220_v43 = vld [vmem:[%s12290_s9 + $0x6d0] ss:$8 sps:$4 sm:$0xff]  }
 0x392   :  { %4182 = vmatpush1.bf16.msra.mxu0 %v9157_v4  ;;  %v9198_v4 = vld [vmem:[%s12290_s9 + $0x684] ss:$8 sps:$4 sm:$0xff]  }
 0x393   :  { %4183 = vmatprep.subr.bf16.mxu0 %v9162_v5  ;;  %4995 = vmatpush1.bf16.msra.mxu1 %v9289_v55  ;;  %v9307_v5 = vld [vmem:[%s12293_s11 + $0xd0] ss:$8 sps:$4 sm:$0xff]   ;;  %v9330_v55 = vld [vmem:[%s12293_s11 + $0x244] ss:$8 sps:$4 sm:$0xff]  }
 0x394   :  { %4996 = vmatprep.subr.bf16.mxu1 %v9294_v57  ;;  %v9226_v57 = vld [vmem:[%s12290_s9 + $0x6e0] ss:$8 sps:$4 sm:$0xff]  }
 0x396   :  { %4184 = vmatpush1.bf16.msra.mxu0 %v9160_v8  ;;  %v4486_v8 = vld [vmem:[#allocation5 + $0x10] sm:$0xf] }
 0x397   :  { %4185 = vmatprep.subr.bf16.mxu0 %v9165_v9  ;;  %4997 = vmatpush1.bf16.msra.mxu1 %v9292_v46  ;;  %v4488_v9 = vld [vmem:[#allocation5 + $0x30] sm:$0xf0]  ;;  %v4501_v18 = vrot.slane %v4486_v8, 4  ;;  %v9360_v8 = vld [vmem:[%s12293_s11 + $0x2e4] ss:$8 sps:$4 sm:$0xff]  }
 0x398   :  { %4998 = vmatprep.subr.bf16.mxu1 %v9297_v47  ;;  %v9333_v46 = vld [vmem:[%s12293_s11 + $0x254] ss:$8 sps:$4 sm:$0xff]   ;;  %v9232_v47 = vld [vmem:[%s12290_s9 + $0x6f0] ss:$8 sps:$4 sm:$0xff]  }
 0x39a   :  { %4186 = vmatpush1.bf16.msra.mxu0 %v9163_v12  ;;  %v9201_v12 = vld [vmem:[%s12290_s9 + $0x694] ss:$8 sps:$4 sm:$0xff]  }
 0x39b   :  { %4187 = vmatprep.subr.bf16.mxu0 %v9168_v13  ;;  %4999 = vmatpush1.bf16.msra.mxu1 %v9295_v49  ;;  %v9310_v13 = vld [vmem:[%s12293_s11 + $0xe0] ss:$8 sps:$4 sm:$0xff]  }
 0x39c   :  { %5000 = vmatprep.subr.bf16.mxu1 %v9300_v50  ;;  %v9670_v49 = vld [vmem:[#allocation4 + $0x20] sm:$0xff]  ;;  %v9671_v50 = vld [vmem:[#allocation4 + $0x50] sm:$0xff] }
 0x39e   :  { %4188 = vmatpush1.bf16.msra.mxu0 %v9166_v19  ;;  %v4506_v19 = vrot.slane %v4488_v9, 4  ;;  %v9358_v9 = vld [vmem:[%s12293_s11 + $0x2e0] ss:$8 sps:$4 sm:$0xff]  }
 0x39f   :  { %4189 = vmatprep.subr.bf16.mxu0 %v9171_v21  ;;  %5001 = vmatpush1.bf16.msra.mxu1 %v9298_v37  ;;  %v9204_v21 = vld [vmem:[%s12290_s9 + $0x6a4] ss:$8 sps:$4 sm:$0xff]   ;;  %v9339_v37 = vld [vmem:[%s12293_s11 + $0x274] ss:$8 sps:$4 sm:$0xff]  }
 0x3a0   :  { %5002 = vmatprep.subr.bf16.mxu1 %v9303_v53  ;;  %v4508_v24 = vsel %vm1155_vm3, %v4506_v19, %v4507_v20  ;;  %v9337_v53 = vld [vmem:[%s12293_s11 + $0x270] ss:$8 sps:$4 sm:$0xff]   ;;  %v9375_v19 = vld [vmem:[%s12293_s11 + $0x334] ss:$8 sps:$4 sm:$0xff]  }
 0x3a1   :  { %v9373_v20 = vld [vmem:[%s12293_s11 + $0x330] ss:$8 sps:$4 sm:$0xff]  }
 0x3a2   :  { %4190 = vmatpush1.bf16.msra.mxu0 %v9169_v23  ;;  %v4502_v23 = vsel %vm1155_vm3, %v4500_v17, %v4501_v18  ;;  %v9367_v17 = vld [vmem:[%s12293_s11 + $0x310] ss:$8 sps:$4 sm:$0xff]   ;;  %v9370_v18 = vld [vmem:[%s12293_s11 + $0x320] ss:$8 sps:$4 sm:$0xff]  }
 0x3a3   :  { %4405 = vmatprep.subr.bf16.mxu0 %v9174_v27  ;;  %5003 = vmatpush1.bf16.msra.mxu1 %v9301_v56  ;;  %v9210_v27 = vld [vmem:[%s12290_s9 + $0x6b4] ss:$8 sps:$4 sm:$0xff]   ;;  %v4548_v28 = vpack.c.bf16 %v4508_v24, %v4502_v23  ;;  %v9340_v56 = vld [vmem:[%s12293_s11 + $0x280] ss:$8 sps:$4 sm:$0xff]   ;;  %v9379_v24 = vld [vmem:[%s12293_s11 + $0x350] ss:$8 sps:$4 sm:$0xff]  }
 0x3a4   :  { %5004 = vmatprep.subr.bf16.mxu1 %v9306_v58  ;;  %v9345_v58 = vld [vmem:[%s12293_s11 + $0x294] ss:$8 sps:$4 sm:$0xff]  }
 0x3a5   :  { %4192 = vmatmul.mubr.bf16.vlgmr.msra.gmra.mrb[12].mxu0 %v3997_v14  ;;  %v9214_v14 = vld [vmem:[%s12290_s9 + $0x6c0] ss:$8 sps:$4 sm:$0xff]   ;;  %v9381_v23 = vld [vmem:[%s12293_s11 + $0x354] ss:$8 sps:$4 sm:$0xff]  }
 0x3a6   :  { %4406 = vmatpush1.bf16.msra.mxu0 %v9172_v32  ;;  %4437 = vmatprep.mubr.bf16.mxu0 %v4244_v15  ;;  %v9321_v32 = vld [vmem:[%s12293_s11 + $0x214] ss:$8 sps:$4 sm:$0xff]  }
 0x3a7   :  { %4407 = vmatprep.subr.bf16.mxu0 %v9177_v39  ;;  %5005 = vmatpush1.bf16.msra.mxu1 %v9304_v62  ;;  %v9319_v39 = vld [vmem:[%s12293_s11 + $0x210] ss:$8 sps:$4 sm:$0xff]   ;;  %v9222_v15 = vld [vmem:[%s12290_s9 + $0x6d4] ss:$8 sps:$4 sm:$0xff]   ;;  %v9346_v62 = vld [vmem:[%s12293_s11 + $0x2a0] ss:$8 sps:$4 sm:$0xff]  }
 0x3a8   :  { %5006 = vmatprep.subr.bf16.mxu1 %v9309_v0  ;;  %v9351_v0 = vld [vmem:[%s12293_s11 + $0x2b4] ss:$8 sps:$4 sm:$0xff]  }
 0x3aa   :  { %4408 = vmatpush1.bf16.msra.mxu0 %v9175_v41  ;;  %v9322_v41 = vld [vmem:[%s12293_s11 + $0x220] ss:$8 sps:$4 sm:$0xff]  }
 0x3ab   :  { %4409 = vmatprep.subr.bf16.mxu0 %v9180_v52  ;;  %5007 = vmatpush1.bf16.msra.mxu1 %v9307_v5  ;;  %v9228_v52 = vld [vmem:[%s12290_s9 + $0x6e4] ss:$8 sps:$4 sm:$0xff]   ;;  %v9352_v5 = vld [vmem:[%s12293_s11 + $0x2c0] ss:$8 sps:$4 sm:$0xff]  }
 0x3ac   :  { %5008 = vmatprep.subr.bf16.mxu1 %v9312_v7  ;;  %v9355_v7 = vld [vmem:[%s12293_s11 + $0x2d0] ss:$8 sps:$4 sm:$0xff]  }
 0x3ae   :  { %4410 = vmatpush1.bf16.msra.mxu0 %v9178_v38  ;;  %v9325_v38 = vld [vmem:[%s12293_s11 + $0x230] ss:$8 sps:$4 sm:$0xff]  }
 0x3af   :  { %4411 = vmatprep.subr.bf16.mxu0 %v9183_v44  ;;  %5009 = vmatpush1.bf16.msra.mxu1 %v9310_v13  ;;  %v9234_v44 = vld [vmem:[%s12290_s9 + $0x6f4] ss:$8 sps:$4 sm:$0xff]   ;;  %v9364_v13 = vld [vmem:[%s12293_s11 + $0x300] ss:$8 sps:$4 sm:$0xff]  }
 0x3b0   :  { %5010 = vmatprep.subr.bf16.mxu1 %v9315_v16  ;;  %v9369_v16 = vld [vmem:[%s12293_s11 + $0x314] ss:$8 sps:$4 sm:$0xff]  }
 0x3b2   :  { %4412 = vmatpush1.bf16.msra.mxu0 %v9181_v45  ;;  %v9328_v45 = vld [vmem:[%s12293_s11 + $0x240] ss:$8 sps:$4 sm:$0xff]  }
 0x3b3   :  { %4413 = vmatprep.subr.bf16.mxu0 %v9186_v34  ;;  %5011 = vmatpush1.bf16.msra.mxu1 %v9313_v22  ;;  %v9331_v34 = vld [vmem:[%s12293_s11 + $0x250] ss:$8 sps:$4 sm:$0xff]   ;;  %v9376_v22 = vld [vmem:[%s12293_s11 + $0x340] ss:$8 sps:$4 sm:$0xff]  }
 0x3b4   :  { %5222 = vmatprep.subr.bf16.mxu1 %v9318_v25  ;;  %v9384_v25 = vld [vmem:[%s12293_s11 + $0x364] ss:$8 sps:$4 sm:$0xff]  }
 0x3b6   :  { %4414 = vmatpush1.bf16.msra.mxu0 %v9184_v48  ;;  %5013 = vmatmul.mubr.bf16.vlgmr.msra.gmra.mrb[8].mxu1 %v4548_v28  ;;  %v9336_v48 = vld [vmem:[%s12293_s11 + $0x264] ss:$8 sps:$4 sm:$0xff]   ;;  %v9385_v28 = vld [vmem:[%s12293_s11 + $0x370] ss:$8 sps:$4 sm:$0xff]  }
 0x3b7   :  { %4415 = vmatprep.subr.bf16.mxu0 %v9189_v36  ;;  %5223 = vmatpush1.bf16.msra.mxu1 %v9316_v29  ;;  %v4243_v36 = vpack.c.bf16 %v9671_v50, %v9670_v49  ;;  %v9390_v29 = vld [vmem:[%s12293_s11 + $0x384] ss:$8 sps:$4 sm:$0xff]  }
 0x3b8   :  { %5254 = vmatprep.mubr.bf16.mxu1 %v11490_v31  ;;  %5224 = vmatprep.subr.bf16.mxu1 %v9321_v32  ;;  %v9391_v32 = vld [vmem:[%s12293_s11 + $0x390] ss:$8 sps:$4 sm:$0xff]  }
 0x3ba   :  { %4416 = vmatpush1.bf16.msra.mxu0 %v9187_v51  ;;  %v9334_v51 = vld [vmem:[%s12293_s11 + $0x260] ss:$8 sps:$4 sm:$0xff]  }
 0x3bb   :  { %4417 = vmatprep.subr.bf16.mxu0 %v9192_v54  ;;  %5225 = vmatpush1.bf16.msra.mxu1 %v9319_v39  ;;  %v9342_v54 = vld [vmem:[%s12293_s11 + $0x284] ss:$8 sps:$4 sm:$0xff]   ;;  %v9397_v39 = vld [vmem:[%s12293_s11 + $0x3b0] ss:$8 sps:$4 sm:$0xff]  }
 0x3bc   :  { %5226 = vmatprep.subr.bf16.mxu1 %v9324_v40  ;;  %v9399_v40 = vld [vmem:[%s12293_s11 + $0x3b4] ss:$8 sps:$4 sm:$0xff]  }
 0x3be   :  { %4418 = vmatpush1.bf16.msra.mxu0 %v9190_v59  ;;  %v9343_v59 = vld [vmem:[%s12293_s11 + $0x290] ss:$8 sps:$4 sm:$0xff]  }
 0x3bf   :  { %4419 = vmatprep.subr.bf16.mxu0 %v9195_v60  ;;  %5227 = vmatpush1.bf16.msra.mxu1 %v9322_v41  ;;  %v9348_v60 = vld [vmem:[%s12293_s11 + $0x2a4] ss:$8 sps:$4 sm:$0xff]   ;;  %v9405_v41 = vld [vmem:[%s12293_s11 + $0x3d4] ss:$8 sps:$4 sm:$0xff]  }
 0x3c0   :  { %5228 = vmatprep.subr.bf16.mxu1 %v9327_v42  ;;  %v9403_v42 = vld [vmem:[%s12293_s11 + $0x3d0] ss:$8 sps:$4 sm:$0xff]  }
 0x3c2   :  { %4420 = vmatpush1.bf16.msra.mxu0 %v9193_v3  ;;  %v9349_v3 = vld [vmem:[%s12293_s11 + $0x2b0] ss:$8 sps:$4 sm:$0xff]  }
 0x3c3   :  { %4421 = vmatprep.subr.bf16.mxu0 %v9198_v4  ;;  %5229 = vmatpush1.bf16.msra.mxu1 %v9325_v38  ;;  %v9354_v4 = vld [vmem:[%s12293_s11 + $0x2c4] ss:$8 sps:$4 sm:$0xff]   ;;  %v9411_v38 = vld [vmem:[%s12293_s11 + $0x3f4] ss:$8 sps:$4 sm:$0xff]  }
 0x3c4   :  { %5230 = vmatprep.subr.bf16.mxu1 %v9330_v55  ;;  %v9409_v55 = vld [vmem:[%s12293_s11 + $0x3f0] ss:$8 sps:$4 sm:$0xff]  }
 0x3c6   :  { %4422 = vmatpush1.bf16.msra.mxu0 %v9196_v11  ;;  %v9361_v11 = vld [vmem:[%s12293_s11 + $0x2f0] ss:$8 sps:$4 sm:$0xff]  }
 0x3c7   :  { %4423 = vmatprep.subr.bf16.mxu0 %v9201_v12  ;;  %5231 = vmatpush1.bf16.msra.mxu1 %v9328_v45  ;;  %v9366_v12 = vld [vmem:[%s12293_s11 + $0x304] ss:$8 sps:$4 sm:$0xff]  }
 0x3c8   :  { %5232 = vmatprep.subr.bf16.mxu1 %v9333_v46 }
 0x3ca   :  { %4424 = vmatpush1.bf16.msra.mxu0 %v9199_v1  ;;  %v9372_v1 = vld [vmem:[%s12293_s11 + $0x324] ss:$8 sps:$4 sm:$0xff]  }
 0x3cb   :  { %4425 = vmatprep.subr.bf16.mxu0 %v9204_v21  ;;  %5233 = vmatpush1.bf16.msra.mxu1 %v9331_v34  ;;  %v9378_v21 = vld [vmem:[%s12293_s11 + $0x344] ss:$8 sps:$4 sm:$0xff]  }
 0x3cc   :  { %5234 = vmatprep.subr.bf16.mxu1 %v9336_v48 }
 0x3ce   :  { %4426 = vmatpush1.bf16.msra.mxu0 %v9202_v26  ;;  %v9382_v26 = vld [vmem:[%s12293_s11 + $0x360] ss:$8 sps:$4 sm:$0xff]  }
 0x3cf   :  { %4427 = vmatprep.subr.bf16.mxu0 %v9210_v27  ;;  %5235 = vmatpush1.bf16.msra.mxu1 %v9334_v51  ;;  %v9387_v27 = vld [vmem:[%s12293_s11 + $0x374] ss:$8 sps:$4 sm:$0xff]  }
 0x3d0   :  { %5236 = vmatprep.subr.bf16.mxu1 %v9339_v37 }
 0x3d2   :  { %4428 = vmatpush1.bf16.msra.mxu0 %v9208_v33  ;;  %v9396_v33 = vld [vmem:[%s12293_s11 + $0x3a4] ss:$8 sps:$4 sm:$0xff]  }
 0x3d3   :  { %4429 = vmatprep.subr.bf16.mxu0 %v9216_v35  ;;  %5237 = vmatpush1.bf16.msra.mxu1 %v9337_v53  ;;  %v9394_v35 = vld [vmem:[%s12293_s11 + $0x3a0] ss:$8 sps:$4 sm:$0xff]  }
 0x3d4   :  { %5238 = vmatprep.subr.bf16.mxu1 %v9342_v54 }
 0x3d6   :  { %4430 = vmatpush1.bf16.msra.mxu0 %v9214_v14  ;;  %v9402_v14 = vld [vmem:[%s12293_s11 + $0x3c4] ss:$8 sps:$4 sm:$0xff]  }
 0x3d7   :  { %4431 = vmatprep.subr.bf16.mxu0 %v9222_v15  ;;  %5239 = vmatpush1.bf16.msra.mxu1 %v9340_v56  ;;  %v9400_v15 = vld [vmem:[%s12293_s11 + $0x3c0] ss:$8 sps:$4 sm:$0xff]  }
 0x3d8   :  { %5240 = vmatprep.subr.bf16.mxu1 %v9345_v58 }
 0x3da   :  { %4432 = vmatpush1.bf16.msra.mxu0 %v9220_v43  ;;  %v9408_v43 = vld [vmem:[%s12293_s11 + $0x3e4] ss:$8 sps:$4 sm:$0xff]  }
 0x3db   :  { %4433 = vmatprep.subr.bf16.mxu0 %v9228_v52  ;;  %5241 = vmatpush1.bf16.msra.mxu1 %v9343_v59  ;;  %v9406_v52 = vld [vmem:[%s12293_s11 + $0x3e0] ss:$8 sps:$4 sm:$0xff]  }
 0x3dc   :  { %5242 = vmatprep.subr.bf16.mxu1 %v9348_v60 }
 0x3de   :  { %4434 = vmatpush1.bf16.msra.mxu0 %v9226_v57  ;;  %v9414_v57 = vld [vmem:[%s12293_s11 + $0x404] ss:$8 sps:$4 sm:$0xff]  }
 0x3df   :  { %4435 = vmatprep.subr.bf16.mxu0 %v9234_v44  ;;  %5243 = vmatpush1.bf16.msra.mxu1 %v9346_v62  ;;  %v4452_v44 = vld [vmem:[%s12294_s10] sm:$0x3]  ;;  %v5270_v62 = vld [vmem:[#allocation5 + $0x18] sm:$0xfc] }
 0x3e0   :  { %5244 = vmatprep.subr.bf16.mxu1 %v9351_v0  ;;  %v4457_v45 = vrot.slane %v4452_v44, %v10048_v63  ;;  %v4461_v46 = vrot.slane %v4452_v44, %v10053_v2  ;;  %v5273_v0 = vld [vmem:[#allocation5 + $0x40] sm:$0xfc] }
 0x3e1   :  { %v9432_v44 = vld [vmem:[%s12293_s11 + $0x464] ss:$8 sps:$4 sm:$0xff]  }
 0x3e2   :  { %4436 = vmatpush1.bf16.msra.mxu0 %v9232_v47 }
 0x3e3   :  { %5245 = vmatpush1.bf16.msra.mxu1 %v9349_v3  ;;  %v5274_v3 = vld [vmem:[#allocation5 + $0x48] sm:$0xfc] }
 0x3e4   :  { %5246 = vmatprep.subr.bf16.mxu1 %v9354_v4  ;;  %v5269_v4 = vld [vmem:[#allocation5 + $0x10] sm:$0xfc] }
 0x3e5   :  { %4438 = vmatmul.mubr.bf16.vlgmr.msra.gmra.mrb[12].mxu0 %v4243_v36 }
 0x3e7   :  { %5247 = vmatpush1.bf16.msra.mxu1 %v9352_v5  ;;  %v5548_v5 = vld [vmem:[#allocation5 + $0x48] sm:$0xf0] }
 0x3e8   :  { %5248 = vmatprep.subr.bf16.mxu1 %v9357_v6  ;;  %v5288_v6 = vrot.slane %v5270_v62, 2  ;;  %v9451_v62 = vld [vmem:[%s12293_s11 + $0x4d0] ss:$8 sps:$4 sm:$0xff]  }
 0x3eb   :  { %5249 = vmatpush1.bf16.msra.mxu1 %v9355_v7 }
 0x3ec   :  { %5250 = vmatprep.subr.bf16.mxu1 %v9360_v8  ;;  %v5291_v8 = vrot.slane %v5273_v0, 2  ;;  %v9456_v0 = vld [vmem:[%s12293_s11 + $0x4e4] ss:$8 sps:$4 sm:$0xff]  }
 0x3ef   :  { %5251 = vmatpush1.bf16.msra.mxu1 %v9358_v9 }
 0x3f0   :  { %5252 = vmatprep.subr.bf16.mxu1 %v9363_v10  ;;  %v5544_v10 = vld [vmem:[#allocation5 + $0x18] sm:$0xf0] }
 0x3f3   :  { %5253 = vmatpush1.bf16.msra.mxu1 %v9361_v11 }
 0x3f4   :  { %5496 = vmatprep.subr.bf16.mxu1 %v9366_v12 }
 0x3f6   :  { %5255 = vmatmul.mubr.bf16.vlgmr.msra.gmra.mrb[8].mxu1 %v11490_v31  ;;  %v9393_v31 = vld [vmem:[%s12293_s11 + $0x394] ss:$8 sps:$4 sm:$0xff]  }
 0x3f7   :  { %5497 = vmatpush1.bf16.msra.mxu1 %v9364_v13  ;;  %v5294_v13 = vrot.slane %v5274_v3, 2  ;;  %v5547_v3 = vld [vmem:[#allocation5 + $0x40] sm:$0xf0] }
 0x3f8   :  { %5498 = vmatprep.subr.bf16.mxu1 %v9369_v16 }
 0x3fb   :  { %5499 = vmatpush1.bf16.msra.mxu1 %v9367_v17  ;;  %v5285_v17 = vrot.slane %v5269_v4, 2 }
 0x3fc   :  { %5500 = vmatprep.subr.bf16.mxu1 %v9372_v1  ;;  %v5568_v1 = vrot.slane %v5548_v5, 4  ;;  %v9454_v5 = vld [vmem:[%s12293_s11 + $0x4e0] ss:$8 sps:$4 sm:$0xff]  }
 0x3ff   :  { %5501 = vmatpush1.bf16.msra.mxu1 %v9370_v18 }
 0x400   :  { %5502 = vmatprep.subr.bf16.mxu1 %v9375_v19 }
 0x403   :  { %5503 = vmatpush1.bf16.msra.mxu1 %v9373_v20 }
 0x404   :  { %5504 = vmatprep.subr.bf16.mxu1 %v9378_v21 }
 0x407   :  { %5505 = vmatpush1.bf16.msra.mxu1 %v9376_v22 }
 0x408   :  { %5506 = vmatprep.subr.bf16.mxu1 %v9381_v23  ;;  %v5562_v23 = vrot.slane %v5544_v10, 4 }
 0x40b   :  { %5507 = vmatpush1.bf16.msra.mxu1 %v9379_v24 }
 0x40c   :  { %5508 = vmatprep.subr.bf16.mxu1 %v9384_v25 }
 0x40f   :  { %5509 = vmatpush1.bf16.msra.mxu1 %v9382_v26 }
 0x410   :  { %5510 = vmatprep.subr.bf16.mxu1 %v9387_v27 }
 0x413   :  { %5511 = vmatpush1.bf16.msra.mxu1 %v9385_v28 }
 0x414   :  { %5512 = vmatprep.subr.bf16.mxu1 %v9390_v29 }
 0x417   :  { %5513 = vmatpush1.bf16.msra.mxu1 %v9388_v30 }
 0x418   :  { %5514 = vmatprep.subr.bf16.mxu1 %v9393_v31  ;;  %v9412_v31 = vld [vmem:[%s12293_s11 + $0x400] ss:$8 sps:$4 sm:$0xff]  }
 0x41b   :  { %5515 = vmatpush1.bf16.msra.mxu1 %v9391_v32 }
 0x41c   :  { %5516 = vmatprep.subr.bf16.mxu1 %v9396_v33 }
 0x41f   :  { %5517 = vmatpush1.bf16.msra.mxu1 %v9394_v35 }
 0x420   :  { %5518 = vmatprep.subr.bf16.mxu1 %v9399_v40 }
 0x423   :  { %5519 = vmatpush1.bf16.msra.mxu1 %v9397_v39  ;;  %v9417_v39 = vld [vmem:[%s12293_s11 + $0x414] ss:$8 sps:$4 sm:$0xff]  }
 0x424   :  { %5520 = vmatprep.subr.bf16.mxu1 %v9402_v14  ;;  %v9415_v14 = vld [vmem:[%s12293_s11 + $0x410] ss:$8 sps:$4 sm:$0xff]  }
 0x427   :  { %5521 = vmatpush1.bf16.msra.mxu1 %v9400_v15  ;;  %v9420_v15 = vld [vmem:[%s12293_s11 + $0x424] ss:$8 sps:$4 sm:$0xff]  }
 0x428   :  { %5522 = vmatprep.subr.bf16.mxu1 %v9405_v41  ;;  %v9418_v41 = vld [vmem:[%s12293_s11 + $0x420] ss:$8 sps:$4 sm:$0xff]  }
 0x42b   :  { %5523 = vmatpush1.bf16.msra.mxu1 %v9403_v42  ;;  %v9423_v42 = vld [vmem:[%s12293_s11 + $0x434] ss:$8 sps:$4 sm:$0xff]  }
 0x42c   :  { %5524 = vmatprep.subr.bf16.mxu1 %v9408_v43  ;;  %v9421_v43 = vld [vmem:[%s12293_s11 + $0x430] ss:$8 sps:$4 sm:$0xff]  }
 0x42f   :  { %5525 = vmatpush1.bf16.msra.mxu1 %v9406_v52  ;;  %v9426_v52 = vld [vmem:[%s12293_s11 + $0x444] ss:$8 sps:$4 sm:$0xff]  }
 0x430   :  { %5526 = vmatprep.subr.bf16.mxu1 %v9411_v38  ;;  %v9424_v38 = vld [vmem:[%s12293_s11 + $0x440] ss:$8 sps:$4 sm:$0xff]  }
 0x433   :  { %5527 = vmatpush1.bf16.msra.mxu1 %v9409_v55  ;;  %v9429_v55 = vld [vmem:[%s12293_s11 + $0x454] ss:$8 sps:$4 sm:$0xff]  }
 0x434   :  { %5770 = vmatprep.subr.bf16.mxu1 %v9414_v57  ;;  %v9427_v57 = vld [vmem:[%s12293_s11 + $0x450] ss:$8 sps:$4 sm:$0xff]  }
 0x4b8   :  { %v4439_v47 = vpop.f32.mrb[12].mxu0 }
 0x4b9   :  { %v4464_v34 = vadd.f32 %v4457_v45, %v4439_v47  ;;  %v4441_v48 = vpop.f32.mrb[13].mxu0  ;;  %v9433_v47 = vld [vmem:[%s12293_s11 + $0x470] ss:$8 sps:$4 sm:$0xff]  }
 0x4ba   :  { %v4465_v49 = vadd.f32 %v4461_v46, %v4441_v48  ;;  %v4443_v50 = vpop.f32.mrb[14].mxu0  ;;  %v9436_v48 = vld [vmem:[%s12293_s11 + $0x480] ss:$8 sps:$4 sm:$0xff]  }
 0x4bb   :  { %v4468_v36 = vmax.f32 %v4464_v34, 0.0  ;;  %v4466_v51 = vadd.f32 %v4457_v45, %v4443_v50  ;;  %v4445_v37 = vpop.f32.mrb[15].mxu0  ;;  %v9430_v45 = vld [vmem:[%s12293_s11 + $0x460] ss:$8 sps:$4 sm:$0xff]   ;;  %v9438_v34 = vld [vmem:[%s12293_s11 + $0x484] ss:$8 sps:$4 sm:$0xff]  }
 0x4bc   :  { %v4469_v53 = vmax.f32 %v4465_v49, 0.0  ;;  %v4467_v54 = vadd.f32 %v4461_v46, %v4445_v37  ;;  %v9435_v46 = vld [vmem:[%s12293_s11 + $0x474] ss:$8 sps:$4 sm:$0xff]   ;;  %v9439_v50 = vld [vmem:[%s12293_s11 + $0x490] ss:$8 sps:$4 sm:$0xff]  }
 0x4bd   :  { %4480 = vst [vmem:[#allocation5 + $0x20] sm:$0xff] %v4468_v36  ;;  %v4470_v56 = vmax.f32 %v4466_v51, 0.0  ;;  %v9441_v49 = vld [vmem:[%s12293_s11 + $0x494] ss:$8 sps:$4 sm:$0xff]   ;;  %v9442_v51 = vld [vmem:[%s12293_s11 + $0x4a0] ss:$8 sps:$4 sm:$0xff]  }
 0x4be   :  { %4481 = vst [vmem:[#allocation5 + $0x28] sm:$0xff] %v4469_v53  ;;  %v4471_v58 = vmax.f32 %v4467_v54, 0.0  ;;  %v9447_v37 = vld [vmem:[%s12293_s11 + $0x4b4] ss:$8 sps:$4 sm:$0xff]   ;;  %v9450_v54 = vld [vmem:[%s12293_s11 + $0x4c4] ss:$8 sps:$4 sm:$0xff]  }
 0x4bf   :  { %4482 = vst [vmem:[#allocation5 + $0x50] sm:$0xff] %v4470_v56  ;;  %v11715_v59 = vpack.c.bf16 %v4470_v56, %v4468_v36  ;;  %v9444_v36 = vld [vmem:[%s12293_s11 + $0x4a4] ss:$8 sps:$4 sm:$0xff]   ;;  %v9448_v56 = vld [vmem:[%s12293_s11 + $0x4c0] ss:$8 sps:$4 sm:$0xff]  }
 0x4c0   :  { %4483 = vst [vmem:[#allocation5 + $0x58] sm:$0xff] %v4471_v58  ;;  %v11717_v60 = vpack.c.bf16 %v4471_v58, %v4469_v53  ;;  %v9445_v53 = vld [vmem:[%s12293_s11 + $0x4b0] ss:$8 sps:$4 sm:$0xff]   ;;  %v9453_v58 = vld [vmem:[%s12293_s11 + $0x4d4] ss:$8 sps:$4 sm:$0xff]  }
 0x4c4   :  { %v5271_v7 = vld [vmem:[#allocation5 + $0x20] sm:$0x3] }
 0x4c5   :  { %v5272_v9 = vld [vmem:[#allocation5 + $0x28] sm:$0x3]  ;;  %v5286_v19 = vrot.slane %v5271_v7, 2  ;;  %v5545_v10 = vld [vmem:[#allocation5 + $0x20] sm:$0xf] }
 0x4c6   :  { %v5546_v11 = vld [vmem:[#allocation5 + $0x28] sm:$0xf]  ;;  %v5289_v12 = vrot.slane %v5272_v9, 2  ;;  %v5275_v16 = vld [vmem:[#allocation5 + $0x50] sm:$0x3] }
 0x4c7   :  { %v5276_v18 = vld [vmem:[#allocation5 + $0x58] sm:$0x3]  ;;  %v5292_v20 = vrot.slane %v5275_v16, 2  ;;  %v5563_v24 = vrot.slane %v5546_v11, 4  ;;  %v5287_v32 = vsel %vm614_vm4, %v5285_v17, %v5286_v19  ;;  %v5549_v4 = vld [vmem:[#allocation5 + $0x50] sm:$0xf] }
 0x4c8   :  { %v5550_v21 = vld [vmem:[#allocation5 + $0x58] sm:$0xf]  ;;  %v5295_v22 = vrot.slane %v5276_v18, 2  ;;  %v5290_v27 = vsel %vm614_vm4, %v5288_v6, %v5289_v12  ;;  %v5822_v6 = vld [vmem:[#allocation5 + $0x48] sm:$0xc0]  ;;  %v5565_v11 = vrot.slane %v5547_v3, 4 }
 0x4c9   :  { %v5569_v25 = vrot.slane %v5550_v21, 4  ;;  %v5293_v26 = vsel %vm614_vm4, %v5291_v8, %v5292_v20  ;;  %v5564_v35 = vsel %vm1155_vm3, %v5562_v23, %v5563_v24  ;;  %v5824_v7 = vld [vmem:[#allocation5 + $0x58] sm:$0x3f]  ;;  %v5543_v9 = vld [vmem:[#allocation5 + $0x10] sm:$0xf0]  ;;  %v5566_v12 = vrot.slane %v5549_v4, 4 }
 0x4ca   :  { %v5296_v28 = vsel %vm614_vm4, %v5294_v13, %v5295_v22  ;;  %v5334_v33 = vpack.c.bf16 %v5293_v26, %v5287_v32  ;;  %v9459_v8 = vld [vmem:[%s12293_s11 + $0x4f4] ss:$8 sps:$4 sm:$0xff]   ;;  %v5820_v16 = vld [vmem:[#allocation5 + $0x28] sm:$0x3f]  ;;  %v5842_v17 = vrot.slane %v5822_v6, 6  ;;  %v5559_v19 = vrot.slane %v5543_v9, 4 }
 0x4cb   :  { %v5570_v29 = vsel %vm1155_vm3, %v5568_v1, %v5569_v25  ;;  %v5335_v30 = vpack.c.bf16 %v5296_v28, %v5290_v27  ;;  %v5818_v13 = vld [vmem:[#allocation5 + $0x18] sm:$0xc0]  ;;  %v5843_v1 = vrot.slane %v5824_v7, 6  ;;  %v9457_v18 = vld [vmem:[%s12293_s11 + $0x4f0] ss:$8 sps:$4 sm:$0xff]   ;;  %v5560_v20 = vrot.slane %v5545_v10, 4 }
 0x4cc   :  { %v5609_v40 = vpack.c.bf16 %v5570_v29, %v5564_v35  ;;  %v9462_v21 = vld [vmem:[%s12293_s11 + $0x504] ss:$8 sps:$4 sm:$0xff]   ;;  %v5836_v22 = vrot.slane %v5818_v13, 6  ;;  %v5837_v23 = vrot.slane %v5820_v16, 6  ;;  %v5567_v24 = vsel %vm1155_vm3, %v5565_v11, %v5566_v12  ;;  %v9460_v27 = vld [vmem:[%s12293_s11 + $0x500] ss:$8 sps:$4 sm:$0xff]  }
 0x4cd   :  { %5528 = vmatprep.mubr.bf16.mxu1 %v5335_v30  ;;  %v5844_v25 = vsel %vm109_vm0, %v5842_v17, %v5843_v1  ;;  %v5561_v26 = vsel %vm1155_vm3, %v5559_v19, %v5560_v20  ;;  %v9465_v30 = vld [vmem:[%s12293_s11 + $0x514] ss:$8 sps:$4 sm:$0xff]   ;;  %v9463_v32 = vld [vmem:[%s12293_s11 + $0x510] ss:$8 sps:$4 sm:$0xff]   ;;  %v9556_v35 = vld [vmem:[%s12295_s13] ss:$8 sps:$4 sm:$0xff]  }
 0x4ce   :  { %5529 = vmatmul.mubr.bf16.vlgmr.msra.gmra.mrb[8].mxu1 %v5334_v33  ;;  %v5608_v28 = vpack.c.bf16 %v5567_v24, %v5561_v26  ;;  %v5838_v29 = vsel %vm109_vm0, %v5836_v22, %v5837_v23  ;;  %v9468_v33 = vld [vmem:[%s12293_s11 + $0x524] ss:$8 sps:$4 sm:$0xff]   ;;  %v9489_v3 = vld [vmem:[%s12293_s11 + $0x594] ss:$8 sps:$4 sm:$0xff]   ;;  %v9580_v6 = vld [vmem:[%s12295_s13 + $0x80] ss:$8 sps:$4 sm:$0xff]  }
 0x4cf   :  { %5771 = vmatpush1.bf16.msra.mxu1 %v9412_v31  ;;  %5802 = vmatprep.mubr.bf16.mxu1 %v5609_v40  ;;  %v5883_v31 = vpack.c.bf16 %v5844_v25, %v5838_v29  ;;  %v9561_v40 = vld [vmem:[%s12295_s13 + $0x14] ss:$8 sps:$4 sm:$0xff]   ;;  %v9582_v4 = vld [vmem:[%s12295_s13 + $0x84] ss:$8 sps:$4 sm:$0xff]   ;;  %v9490_v9 = vld [vmem:[%s12293_s11 + $0x5a0] ss:$8 sps:$4 sm:$0xff]  }
 0x4d0   :  { %5772 = vmatprep.subr.bf16.mxu1 %v9417_v39  ;;  %v9558_v39 = vld [vmem:[%s12295_s13 + $0x4] ss:$8 sps:$4 sm:$0xff]   ;;  %v9583_v10 = vld [vmem:[%s12295_s13 + $0x90] ss:$8 sps:$4 sm:$0xff]   ;;  %v9495_v11 = vld [vmem:[%s12293_s11 + $0x5b4] ss:$8 sps:$4 sm:$0xff]  }
 0x4d1   :  { %6571 = vmatprep.subr.bf16.mxu0 %v9558_v39  ;;  %v9492_v7 = vld [vmem:[%s12293_s11 + $0x5a4] ss:$8 sps:$4 sm:$0xff]   ;;  %v9493_v13 = vld [vmem:[%s12293_s11 + $0x5b0] ss:$8 sps:$4 sm:$0xff]   ;;  %v9586_v16 = vld [vmem:[%s12295_s13 + $0xa0] ss:$8 sps:$4 sm:$0xff]  }
 0x4d2   :  { %6572 = vmatpush1.bf16.msra.mxu0 %v9556_v35  ;;  %v9588_v12 = vld [vmem:[%s12295_s13 + $0xa4] ss:$8 sps:$4 sm:$0xff]   ;;  %v9591_v1 = vld [vmem:[%s12295_s13 + $0xb4] ss:$8 sps:$4 sm:$0xff]   ;;  %v9589_v19 = vld [vmem:[%s12295_s13 + $0xb0] ss:$8 sps:$4 sm:$0xff]  }
 0x4d3   :  { %5773 = vmatpush1.bf16.msra.mxu1 %v9415_v14  ;;  %v9466_v14 = vld [vmem:[%s12293_s11 + $0x520] ss:$8 sps:$4 sm:$0xff]   ;;  %6573 = vmatprep.subr.bf16.mxu0 %v9561_v40  ;;  %v9498_v17 = vld [vmem:[%s12293_s11 + $0x5c4] ss:$8 sps:$4 sm:$0xff]   ;;  %v9501_v20 = vld [vmem:[%s12293_s11 + $0x5d4] ss:$8 sps:$4 sm:$0xff]  }
 0x4d4   :  { %5774 = vmatprep.subr.bf16.mxu1 %v9420_v15  ;;  %v9471_v15 = vld [vmem:[%s12293_s11 + $0x534] ss:$8 sps:$4 sm:$0xff]   ;;  %v9499_v22 = vld [vmem:[%s12293_s11 + $0x5d0] ss:$8 sps:$4 sm:$0xff]   ;;  %v9592_v23 = vld [vmem:[%s12295_s13 + $0xc0] ss:$8 sps:$4 sm:$0xff]  }
 0x4d5   :  { %v9504_v24 = vld [vmem:[%s12293_s11 + $0x5e4] ss:$8 sps:$4 sm:$0xff]   ;;  %v5823_v26 = vld [vmem:[#allocation5 + $0x50] sm:$0x3f]  ;;  %v5817_v29 = vld [vmem:[#allocation5 + $0x10] sm:$0xc0] }
 0x4d6   :  { %v5821_v25 = vld [vmem:[#allocation5 + $0x40] sm:$0xc0]  ;;  %v5833_v35 = vrot.slane %v5817_v29, 6 }
 0x4d7   :  { %5775 = vmatpush1.bf16.msra.mxu1 %v9418_v41  ;;  %v9559_v41 = vld [vmem:[%s12295_s13 + $0x10] ss:$8 sps:$4 sm:$0xff]   ;;  %v9510_v40 = vld [vmem:[%s12293_s11 + $0x604] ss:$8 sps:$4 sm:$0xff]  }
 0x4d8   :  { %5776 = vmatprep.subr.bf16.mxu1 %v9423_v42  ;;  %v9564_v42 = vld [vmem:[%s12295_s13 + $0x24] ss:$8 sps:$4 sm:$0xff]   ;;  %6574 = vmatpush1.bf16.msra.mxu0 %v9559_v41  ;;  %v9508_v41 = vld [vmem:[%s12293_s11 + $0x600] ss:$8 sps:$4 sm:$0xff]  }
 0x4d9   :  { %6575 = vmatprep.subr.bf16.mxu0 %v9564_v42 }
 0x4db   :  { %5777 = vmatpush1.bf16.msra.mxu1 %v9421_v43  ;;  %v9469_v43 = vld [vmem:[%s12293_s11 + $0x530] ss:$8 sps:$4 sm:$0xff]  }
 0x4dc   :  { %5778 = vmatprep.subr.bf16.mxu1 %v9426_v52  ;;  %v9474_v52 = vld [vmem:[%s12293_s11 + $0x544] ss:$8 sps:$4 sm:$0xff]  }
 0x4df   :  { %5779 = vmatpush1.bf16.msra.mxu1 %v9424_v38  ;;  %v9562_v38 = vld [vmem:[%s12295_s13 + $0x20] ss:$8 sps:$4 sm:$0xff]  }
 0x4e0   :  { %5780 = vmatprep.subr.bf16.mxu1 %v9429_v55  ;;  %v9567_v55 = vld [vmem:[%s12295_s13 + $0x34] ss:$8 sps:$4 sm:$0xff]   ;;  %6576 = vmatpush1.bf16.msra.mxu0 %v9562_v38  ;;  %v9516_v38 = vld [vmem:[%s12293_s11 + $0x624] ss:$8 sps:$4 sm:$0xff]  }
 0x4e1   :  { %6577 = vmatprep.subr.bf16.mxu0 %v9567_v55  ;;  %v9514_v55 = vld [vmem:[%s12293_s11 + $0x620] ss:$8 sps:$4 sm:$0xff]  }
 0x4e3   :  { %5781 = vmatpush1.bf16.msra.mxu1 %v9427_v57  ;;  %v9472_v57 = vld [vmem:[%s12293_s11 + $0x540] ss:$8 sps:$4 sm:$0xff]  }
 0x4e4   :  { %5782 = vmatprep.subr.bf16.mxu1 %v9432_v44  ;;  %v9477_v44 = vld [vmem:[%s12293_s11 + $0x554] ss:$8 sps:$4 sm:$0xff]  }
 0x4e7   :  { %5783 = vmatpush1.bf16.msra.mxu1 %v9430_v45  ;;  %v9565_v45 = vld [vmem:[%s12295_s13 + $0x30] ss:$8 sps:$4 sm:$0xff]  }
 0x4e8   :  { %5784 = vmatprep.subr.bf16.mxu1 %v9435_v46  ;;  %v9570_v46 = vld [vmem:[%s12295_s13 + $0x44] ss:$8 sps:$4 sm:$0xff]   ;;  %6578 = vmatpush1.bf16.msra.mxu0 %v9565_v45  ;;  %v9520_v45 = vld [vmem:[%s12293_s11 + $0x640] ss:$8 sps:$4 sm:$0xff]  }
 0x4e9   :  { %6579 = vmatprep.subr.bf16.mxu0 %v9570_v46  ;;  %v9525_v46 = vld [vmem:[%s12293_s11 + $0x654] ss:$8 sps:$4 sm:$0xff]  }
 0x4eb   :  { %5785 = vmatpush1.bf16.msra.mxu1 %v9433_v47  ;;  %v9475_v47 = vld [vmem:[%s12293_s11 + $0x550] ss:$8 sps:$4 sm:$0xff]  }
 0x4ec   :  { %5786 = vmatprep.subr.bf16.mxu1 %v9438_v34  ;;  %v9480_v34 = vld [vmem:[%s12293_s11 + $0x564] ss:$8 sps:$4 sm:$0xff]  }
 0x4ef   :  { %5787 = vmatpush1.bf16.msra.mxu1 %v9436_v48  ;;  %v9568_v48 = vld [vmem:[%s12295_s13 + $0x40] ss:$8 sps:$4 sm:$0xff]  }
 0x4f0   :  { %5788 = vmatprep.subr.bf16.mxu1 %v9441_v49  ;;  %v9573_v49 = vld [vmem:[%s12295_s13 + $0x54] ss:$8 sps:$4 sm:$0xff]   ;;  %6580 = vmatpush1.bf16.msra.mxu0 %v9568_v48  ;;  %v9526_v48 = vld [vmem:[%s12293_s11 + $0x660] ss:$8 sps:$4 sm:$0xff]  }
 0x4f1   :  { %6581 = vmatprep.subr.bf16.mxu0 %v9573_v49  ;;  %v9531_v49 = vld [vmem:[%s12293_s11 + $0x674] ss:$8 sps:$4 sm:$0xff]  }
 0x4f3   :  { %5789 = vmatpush1.bf16.msra.mxu1 %v9439_v50  ;;  %v9478_v50 = vld [vmem:[%s12293_s11 + $0x560] ss:$8 sps:$4 sm:$0xff]  }
 0x4f4   :  { %5790 = vmatprep.subr.bf16.mxu1 %v9444_v36  ;;  %v9571_v36 = vld [vmem:[%s12295_s13 + $0x50] ss:$8 sps:$4 sm:$0xff]  }
 0x4f5   :  { %6582 = vmatpush1.bf16.msra.mxu0 %v9571_v36  ;;  %v9534_v36 = vld [vmem:[%s12293_s11 + $0x684] ss:$8 sps:$4 sm:$0xff]  }
 0x4f7   :  { %5791 = vmatpush1.bf16.msra.mxu1 %v9442_v51  ;;  %v9483_v51 = vld [vmem:[%s12293_s11 + $0x574] ss:$8 sps:$4 sm:$0xff]  }
 0x4f8   :  { %5792 = vmatprep.subr.bf16.mxu1 %v9447_v37  ;;  %v9576_v37 = vld [vmem:[%s12295_s13 + $0x64] ss:$8 sps:$4 sm:$0xff]  }
 0x4f9   :  { %6583 = vmatprep.subr.bf16.mxu0 %v9576_v37  ;;  %v9537_v37 = vld [vmem:[%s12293_s11 + $0x694] ss:$8 sps:$4 sm:$0xff]  }
 0x4fb   :  { %5793 = vmatpush1.bf16.msra.mxu1 %v9445_v53  ;;  %v9481_v53 = vld [vmem:[%s12293_s11 + $0x570] ss:$8 sps:$4 sm:$0xff]  }
 0x4fc   :  { %5794 = vmatprep.subr.bf16.mxu1 %v9450_v54  ;;  %v9574_v54 = vld [vmem:[%s12295_s13 + $0x60] ss:$8 sps:$4 sm:$0xff]  }
 0x4fd   :  { %6584 = vmatpush1.bf16.msra.mxu0 %v9574_v54  ;;  %v9540_v54 = vld [vmem:[%s12293_s11 + $0x6a4] ss:$8 sps:$4 sm:$0xff]  }
 0x4ff   :  { %5795 = vmatpush1.bf16.msra.mxu1 %v9448_v56  ;;  %v9486_v56 = vld [vmem:[%s12293_s11 + $0x584] ss:$8 sps:$4 sm:$0xff]  }
 0x500   :  { %5796 = vmatprep.subr.bf16.mxu1 %v9453_v58  ;;  %v9579_v58 = vld [vmem:[%s12295_s13 + $0x74] ss:$8 sps:$4 sm:$0xff]  }
 0x501   :  { %6585 = vmatprep.subr.bf16.mxu0 %v9579_v58  ;;  %v9543_v58 = vld [vmem:[%s12293_s11 + $0x6b4] ss:$8 sps:$4 sm:$0xff]  }
 0x503   :  { %5797 = vmatpush1.bf16.msra.mxu1 %v9451_v62  ;;  %v9484_v62 = vld [vmem:[%s12293_s11 + $0x580] ss:$8 sps:$4 sm:$0xff]  }
 0x504   :  { %5798 = vmatprep.subr.bf16.mxu1 %v9456_v0  ;;  %v9577_v0 = vld [vmem:[%s12295_s13 + $0x70] ss:$8 sps:$4 sm:$0xff]  }
 0x505   :  { %6586 = vmatpush1.bf16.msra.mxu0 %v9577_v0  ;;  %v9546_v0 = vld [vmem:[%s12293_s11 + $0x6c4] ss:$8 sps:$4 sm:$0xff]  }
 0x506   :  { %6587 = vmatprep.subr.bf16.mxu0 %v9582_v4  ;;  %v9549_v4 = vld [vmem:[%s12293_s11 + $0x6d4] ss:$8 sps:$4 sm:$0xff]  }
 0x507   :  { %5799 = vmatpush1.bf16.msra.mxu1 %v9454_v5  ;;  %v9487_v5 = vld [vmem:[%s12293_s11 + $0x590] ss:$8 sps:$4 sm:$0xff]  }
 0x508   :  { %5800 = vmatprep.subr.bf16.mxu1 %v9459_v8  ;;  %v9585_v8 = vld [vmem:[%s12295_s13 + $0x94] ss:$8 sps:$4 sm:$0xff]  }
 0x509   :  { %6588 = vmatpush1.bf16.msra.mxu0 %v9580_v6  ;;  %v9552_v6 = vld [vmem:[%s12293_s11 + $0x6e4] ss:$8 sps:$4 sm:$0xff]  }
 0x50a   :  { %6589 = vmatprep.subr.bf16.mxu0 %v9585_v8  ;;  %v9555_v8 = vld [vmem:[%s12293_s11 + $0x6f4] ss:$8 sps:$4 sm:$0xff]  }
 0x50b   :  { %5801 = vmatpush1.bf16.msra.mxu1 %v9457_v18  ;;  %v9496_v18 = vld [vmem:[%s12293_s11 + $0x5c0] ss:$8 sps:$4 sm:$0xff]  }
 0x50c   :  { %6044 = vmatprep.subr.bf16.mxu1 %v9462_v21  ;;  %v9594_v21 = vld [vmem:[%s12295_s13 + $0xc4] ss:$8 sps:$4 sm:$0xff]  }
 0x50d   :  { %6590 = vmatpush1.bf16.msra.mxu0 %v9583_v10  ;;  %v9595_v10 = vld [vmem:[%s12295_s13 + $0xd0] ss:$8 sps:$4 sm:$0xff]  }
 0x50e   :  { %5803 = vmatmul.mubr.bf16.vlgmr.msra.gmra.mrb[8].mxu1 %v5608_v28  ;;  %6591 = vmatprep.subr.bf16.mxu0 %v9588_v12  ;;  %v9507_v28 = vld [vmem:[%s12293_s11 + $0x5f4] ss:$8 sps:$4 sm:$0xff]   ;;  %v9600_v12 = vld [vmem:[%s12295_s13 + $0xe4] ss:$8 sps:$4 sm:$0xff]  }
 0x50f   :  { %6045 = vmatpush1.bf16.msra.mxu1 %v9460_v27  ;;  %6076 = vmatprep.mubr.bf16.mxu1 %v5883_v31  ;;  %v9502_v27 = vld [vmem:[%s12293_s11 + $0x5e0] ss:$8 sps:$4 sm:$0xff]   ;;  %v5839_v31 = vrot.slane %v5821_v25, 6 }
 0x510   :  { %6046 = vmatprep.subr.bf16.mxu1 %v9465_v30  ;;  %v5819_v30 = vld [vmem:[#allocation5 + $0x20] sm:$0x3f] }
 0x511   :  { %6592 = vmatpush1.bf16.msra.mxu0 %v9586_v16  ;;  %v5834_v39 = vrot.slane %v5819_v30, 6  ;;  %v9601_v16 = vld [vmem:[%s12295_s13 + $0xf0] ss:$8 sps:$4 sm:$0xff]   ;;  %v9672_v30 = vld [vmem:[#allocation4 + $0x20] sm:$0xff] }
 0x512   :  { %6593 = vmatprep.subr.bf16.mxu0 %v9591_v1  ;;  %v6337_v1 = vld [vmem:[%s12297_s12] sm:$0x3] }
 0x513   :  { %6047 = vmatpush1.bf16.msra.mxu1 %v9463_v32  ;;  %v5840_v32 = vrot.slane %v5823_v26, 6 }
 0x514   :  { %6048 = vmatprep.subr.bf16.mxu1 %v9468_v33  ;;  %v9505_v33 = vld [vmem:[%s12293_s11 + $0x5f0] ss:$8 sps:$4 sm:$0xff]  }
 0x515   :  { %6594 = vmatpush1.bf16.msra.mxu0 %v9589_v19  ;;  %v6346_v19 = vrot.slane %v6337_v1, %v10053_v2 }
 0x516   :  { %6595 = vmatprep.subr.bf16.mxu0 %v9594_v21 }
 0x517   :  { %6049 = vmatpush1.bf16.msra.mxu1 %v9466_v14  ;;  %v5841_v14 = vsel %vm109_vm0, %v5839_v31, %v5840_v32 }
 0x518   :  { %6050 = vmatprep.subr.bf16.mxu1 %v9471_v15  ;;  %v5835_v15 = vsel %vm109_vm0, %v5833_v35, %v5834_v39 }
 0x519   :  { %6596 = vmatpush1.bf16.msra.mxu0 %v9592_v23  ;;  %v5882_v42 = vpack.c.bf16 %v5841_v14, %v5835_v15  ;;  %v9675_v15 = vld [vmem:[#allocation4 + $0x58] sm:$0xff] }
 0x51b   :  { %6051 = vmatpush1.bf16.msra.mxu1 %v9469_v43  ;;  %v9513_v43 = vld [vmem:[%s12293_s11 + $0x614] ss:$8 sps:$4 sm:$0xff]  }
 0x51c   :  { %6052 = vmatprep.subr.bf16.mxu1 %v9474_v52  ;;  %v9511_v52 = vld [vmem:[%s12293_s11 + $0x610] ss:$8 sps:$4 sm:$0xff]  }
 0x51f   :  { %6053 = vmatpush1.bf16.msra.mxu1 %v9472_v57  ;;  %v9519_v57 = vld [vmem:[%s12293_s11 + $0x634] ss:$8 sps:$4 sm:$0xff]  }
 0x520   :  { %6054 = vmatprep.subr.bf16.mxu1 %v9477_v44  ;;  %v9522_v44 = vld [vmem:[%s12293_s11 + $0x644] ss:$8 sps:$4 sm:$0xff]  }
 0x523   :  { %6055 = vmatpush1.bf16.msra.mxu1 %v9475_v47  ;;  %v9523_v47 = vld [vmem:[%s12293_s11 + $0x650] ss:$8 sps:$4 sm:$0xff]  }
 0x524   :  { %6056 = vmatprep.subr.bf16.mxu1 %v9480_v34  ;;  %v9528_v34 = vld [vmem:[%s12293_s11 + $0x664] ss:$8 sps:$4 sm:$0xff]  }
 0x527   :  { %6057 = vmatpush1.bf16.msra.mxu1 %v9478_v50  ;;  %v9529_v50 = vld [vmem:[%s12293_s11 + $0x670] ss:$8 sps:$4 sm:$0xff]  }
 0x528   :  { %6058 = vmatprep.subr.bf16.mxu1 %v9483_v51  ;;  %v9532_v51 = vld [vmem:[%s12293_s11 + $0x680] ss:$8 sps:$4 sm:$0xff]  }
 0x52b   :  { %6059 = vmatpush1.bf16.msra.mxu1 %v9481_v53  ;;  %v9535_v53 = vld [vmem:[%s12293_s11 + $0x690] ss:$8 sps:$4 sm:$0xff]  }
 0x52c   :  { %6060 = vmatprep.subr.bf16.mxu1 %v9486_v56  ;;  %v9538_v56 = vld [vmem:[%s12293_s11 + $0x6a0] ss:$8 sps:$4 sm:$0xff]  }
 0x52f   :  { %6061 = vmatpush1.bf16.msra.mxu1 %v9484_v62  ;;  %v9541_v62 = vld [vmem:[%s12293_s11 + $0x6b0] ss:$8 sps:$4 sm:$0xff]  }
 0x530   :  { %6062 = vmatprep.subr.bf16.mxu1 %v9489_v3  ;;  %v9544_v3 = vld [vmem:[%s12293_s11 + $0x6c0] ss:$8 sps:$4 sm:$0xff]  }
 0x533   :  { %6063 = vmatpush1.bf16.msra.mxu1 %v9487_v5  ;;  %v9547_v5 = vld [vmem:[%s12293_s11 + $0x6d0] ss:$8 sps:$4 sm:$0xff]  }
 0x534   :  { %6064 = vmatprep.subr.bf16.mxu1 %v9492_v7  ;;  %v9550_v7 = vld [vmem:[%s12293_s11 + $0x6e0] ss:$8 sps:$4 sm:$0xff]  }
 0x537   :  { %6065 = vmatpush1.bf16.msra.mxu1 %v9490_v9  ;;  %v9553_v9 = vld [vmem:[%s12293_s11 + $0x6f0] ss:$8 sps:$4 sm:$0xff]  }
 0x538   :  { %6066 = vmatprep.subr.bf16.mxu1 %v9495_v11  ;;  %v9597_v11 = vld [vmem:[%s12295_s13 + $0xd4] ss:$8 sps:$4 sm:$0xff]  }
 0x539   :  { %6597 = vmatprep.subr.bf16.mxu0 %v9597_v11  ;;  %v9643_v11 = vld [vmem:[%s12296_s15 + $0xd0] ss:$8 sps:$4 sm:$0xff]  }
 0x53a   :  { %6598 = vmatpush1.bf16.msra.mxu0 %v9595_v10  ;;  %v9645_v10 = vld [vmem:[%s12296_s15 + $0xd4] ss:$8 sps:$4 sm:$0xff]  }
 0x53b   :  { %6067 = vmatpush1.bf16.msra.mxu1 %v9493_v13  ;;  %v9598_v13 = vld [vmem:[%s12295_s13 + $0xe0] ss:$8 sps:$4 sm:$0xff]   ;;  %6599 = vmatprep.subr.bf16.mxu0 %v9600_v12 }
 0x53c   :  { %6068 = vmatprep.subr.bf16.mxu1 %v9498_v17  ;;  %v9606_v17 = vld [vmem:[%s12296_s15 + $0x4] ss:$8 sps:$4 sm:$0xff]   ;;  %v9646_v12 = vld [vmem:[%s12296_s15 + $0xe0] ss:$8 sps:$4 sm:$0xff]  }
 0x53e   :  { %6600 = vmatpush1.bf16.msra.mxu0 %v9598_v13  ;;  %v9648_v13 = vld [vmem:[%s12296_s15 + $0xe4] ss:$8 sps:$4 sm:$0xff]  }
 0x53f   :  { %6069 = vmatpush1.bf16.msra.mxu1 %v9496_v18  ;;  %v6342_v18 = vrot.slane %v6337_v1, %v10048_v63  ;;  %v6399_v1 = vld [vmem:[%s12299_s14] sm:$0x3] }
 0x540   :  { %6070 = vmatprep.subr.bf16.mxu1 %v9501_v20 }
 0x543   :  { %6071 = vmatpush1.bf16.msra.mxu1 %v9499_v22 }
 0x544   :  { %6072 = vmatprep.subr.bf16.mxu1 %v9504_v24 }
 0x547   :  { %6073 = vmatpush1.bf16.msra.mxu1 %v9502_v27 }
 0x548   :  { %6074 = vmatprep.subr.bf16.mxu1 %v9507_v28 }
 0x54b   :  { %6075 = vmatpush1.bf16.msra.mxu1 %v9505_v33  ;;  %v9673_v33 = vld [vmem:[#allocation4 + $0x28] sm:$0xff] }
 0x54c   :  { %6290 = vmatprep.subr.bf16.mxu1 %v9510_v40  ;;  %v9674_v40 = vld [vmem:[#allocation4 + $0x50] sm:$0xff] }
 0x54e   :  { %6077 = vmatmul.mubr.bf16.vlgmr.msra.gmra.mrb[8].mxu1 %v5882_v42 }
 0x54f   :  { %6291 = vmatpush1.bf16.msra.mxu1 %v9508_v41  ;;  %6322 = vmatprep.mubr.bf16.mxu1 %v11717_v60  ;;  %v9517_v60 = vld [vmem:[%s12293_s11 + $0x630] ss:$8 sps:$4 sm:$0xff]  }
 0x550   :  { %6292 = vmatprep.subr.bf16.mxu1 %v9513_v43 }
 0x553   :  { %6293 = vmatpush1.bf16.msra.mxu1 %v9511_v52 }
 0x554   :  { %6294 = vmatprep.subr.bf16.mxu1 %v9516_v38 }
 0x557   :  { %6295 = vmatpush1.bf16.msra.mxu1 %v9514_v55 }
 0x558   :  { %6296 = vmatprep.subr.bf16.mxu1 %v9519_v57 }
 0x55b   :  { %6297 = vmatpush1.bf16.msra.mxu1 %v9517_v60  ;;  %v9604_v60 = vld [vmem:[%s12296_s15] ss:$8 sps:$4 sm:$0xff]  }
 0x55c   :  { %6298 = vmatprep.subr.bf16.mxu1 %v9522_v44  ;;  %v9609_v44 = vld [vmem:[%s12296_s15 + $0x14] ss:$8 sps:$4 sm:$0xff]  }
 0x55f   :  { %6299 = vmatpush1.bf16.msra.mxu1 %v9520_v45  ;;  %v9607_v45 = vld [vmem:[%s12296_s15 + $0x10] ss:$8 sps:$4 sm:$0xff]  }
 0x560   :  { %6300 = vmatprep.subr.bf16.mxu1 %v9525_v46  ;;  %v9612_v46 = vld [vmem:[%s12296_s15 + $0x24] ss:$8 sps:$4 sm:$0xff]  }
 0x563   :  { %6301 = vmatpush1.bf16.msra.mxu1 %v9523_v47  ;;  %v9610_v47 = vld [vmem:[%s12296_s15 + $0x20] ss:$8 sps:$4 sm:$0xff]  }
 0x564   :  { %6302 = vmatprep.subr.bf16.mxu1 %v9528_v34  ;;  %v9615_v34 = vld [vmem:[%s12296_s15 + $0x34] ss:$8 sps:$4 sm:$0xff]  }
 0x567   :  { %6303 = vmatpush1.bf16.msra.mxu1 %v9526_v48  ;;  %v9613_v48 = vld [vmem:[%s12296_s15 + $0x30] ss:$8 sps:$4 sm:$0xff]  }
 0x568   :  { %6304 = vmatprep.subr.bf16.mxu1 %v9531_v49  ;;  %v9618_v49 = vld [vmem:[%s12296_s15 + $0x44] ss:$8 sps:$4 sm:$0xff]  }
 0x56b   :  { %6305 = vmatpush1.bf16.msra.mxu1 %v9529_v50  ;;  %v9616_v50 = vld [vmem:[%s12296_s15 + $0x40] ss:$8 sps:$4 sm:$0xff]  }
 0x56c   :  { %6306 = vmatprep.subr.bf16.mxu1 %v9534_v36  ;;  %v9621_v36 = vld [vmem:[%s12296_s15 + $0x54] ss:$8 sps:$4 sm:$0xff]  }
 0x56f   :  { %6307 = vmatpush1.bf16.msra.mxu1 %v9532_v51  ;;  %v9619_v51 = vld [vmem:[%s12296_s15 + $0x50] ss:$8 sps:$4 sm:$0xff]  }
 0x570   :  { %6308 = vmatprep.subr.bf16.mxu1 %v9537_v37  ;;  %v9624_v37 = vld [vmem:[%s12296_s15 + $0x64] ss:$8 sps:$4 sm:$0xff]  }
 0x573   :  { %6309 = vmatpush1.bf16.msra.mxu1 %v9535_v53  ;;  %v9622_v53 = vld [vmem:[%s12296_s15 + $0x60] ss:$8 sps:$4 sm:$0xff]  }
 0x574   :  { %6310 = vmatprep.subr.bf16.mxu1 %v9540_v54  ;;  %v9627_v54 = vld [vmem:[%s12296_s15 + $0x74] ss:$8 sps:$4 sm:$0xff]  }
 0x577   :  { %6311 = vmatpush1.bf16.msra.mxu1 %v9538_v56  ;;  %v9625_v56 = vld [vmem:[%s12296_s15 + $0x70] ss:$8 sps:$4 sm:$0xff]  }
 0x578   :  { %6312 = vmatprep.subr.bf16.mxu1 %v9543_v58  ;;  %v9630_v58 = vld [vmem:[%s12296_s15 + $0x84] ss:$8 sps:$4 sm:$0xff]  }
 0x57b   :  { %6313 = vmatpush1.bf16.msra.mxu1 %v9541_v62  ;;  %v9628_v62 = vld [vmem:[%s12296_s15 + $0x80] ss:$8 sps:$4 sm:$0xff]  }
 0x57c   :  { %6314 = vmatprep.subr.bf16.mxu1 %v9546_v0  ;;  %v9633_v0 = vld [vmem:[%s12296_s15 + $0x94] ss:$8 sps:$4 sm:$0xff]  }
 0x57f   :  { %6315 = vmatpush1.bf16.msra.mxu1 %v9544_v3  ;;  %v9631_v3 = vld [vmem:[%s12296_s15 + $0x90] ss:$8 sps:$4 sm:$0xff]  }
 0x580   :  { %6316 = vmatprep.subr.bf16.mxu1 %v9549_v4  ;;  %v9636_v4 = vld [vmem:[%s12296_s15 + $0xa4] ss:$8 sps:$4 sm:$0xff]  }
 0x583   :  { %6317 = vmatpush1.bf16.msra.mxu1 %v9547_v5  ;;  %v9634_v5 = vld [vmem:[%s12296_s15 + $0xa0] ss:$8 sps:$4 sm:$0xff]  }
 0x584   :  { %6318 = vmatprep.subr.bf16.mxu1 %v9552_v6  ;;  %v9639_v6 = vld [vmem:[%s12296_s15 + $0xb4] ss:$8 sps:$4 sm:$0xff]  }
 0x587   :  { %6319 = vmatpush1.bf16.msra.mxu1 %v9550_v7  ;;  %v9637_v7 = vld [vmem:[%s12296_s15 + $0xb0] ss:$8 sps:$4 sm:$0xff]  }
 0x588   :  { %6320 = vmatprep.subr.bf16.mxu1 %v9555_v8  ;;  %v9642_v8 = vld [vmem:[%s12296_s15 + $0xc4] ss:$8 sps:$4 sm:$0xff]  }
 0x58b   :  { %6321 = vmatpush1.bf16.msra.mxu1 %v9553_v9  ;;  %v9640_v9 = vld [vmem:[%s12296_s15 + $0xc0] ss:$8 sps:$4 sm:$0xff]  }
 0x58e   :  { %6323 = vmatmul.mubr.bf16.vlgmr.msra.gmra.mrb[8].mxu1 %v11715_v59  ;;  %v9603_v59 = vld [vmem:[%s12295_s13 + $0xf4] ss:$8 sps:$4 sm:$0xff]  }
 0x58f   :  { %6601 = vmatprep.subr.bf16.mxu0 %v9603_v59  ;;  %v9651_v59 = vld [vmem:[%s12296_s15 + $0xf4] ss:$8 sps:$4 sm:$0xff]  }
 0x590   :  { %6602 = vmatpush1.bf16.msra.mxu0 %v9601_v16  ;;  %v9649_v16 = vld [vmem:[%s12296_s15 + $0xf0] ss:$8 sps:$4 sm:$0xff]  }
 0x591   :  { %6824 = vmatprep.subr.bf16.mxu0 %v9606_v17  ;;  %v9652_v17 = vld [vmem:[%s12298_s17 + $0x40] sm:$0xff]  }
 0x661   :  { %v6324_v20 = vpop.f32.mrb[8].mxu1 }
 0x662   :  { %v6349_v21 = vadd.f32 %v6342_v18, %v6324_v20  ;;  %v6326_v22 = vpop.f32.mrb[9].mxu1 }
 0x663   :  { %v6350_v23 = vadd.f32 %v6346_v19, %v6326_v22  ;;  %v6328_v24 = vpop.f32.mrb[10].mxu1 }
 0x664   :  { %v6353_v25 = vmax.f32 %v6349_v21, 0.0  ;;  %v6351_v26 = vadd.f32 %v6342_v18, %v6328_v24  ;;  %v6330_v27 = vpop.f32.mrb[11].mxu1  ;;  %v6404_v18 = vrot.slane %v6399_v1, %v10048_v63 }
 0x665   :  { %v6354_v28 = vmax.f32 %v6350_v23, 0.0  ;;  %v6352_v29 = vadd.f32 %v6346_v19, %v6330_v27  ;;  %v6408_v19 = vrot.slane %v6399_v1, %v10053_v2 }
 0x666   :  { %v6357_v31 = vadd.f32 %v9672_v30, %v6353_v25  ;;  %v6355_v32 = vmax.f32 %v6351_v26, 0.0 }
 0x667   :  { %v6358_v35 = vadd.f32 %v9673_v33, %v6354_v28  ;;  %v6356_v39 = vmax.f32 %v6352_v29, 0.0 }
 0x668   :  { %v6359_v14 = vadd.f32 %v9674_v40, %v6355_v32  ;;  %v6361_v42 = vmax.f32 %v6357_v31, 0.0  ;;  %v9655_v40 = vld [vmem:[%s12298_s17 + $0x8] sm:$0xff]  }
 0x669   :  { %v6360_v41 = vadd.f32 %v9675_v15, %v6356_v39  ;;  %v6362_v52 = vmax.f32 %v6358_v35, 0.0  ;;  %v9653_v35 = vld [vmem:[%s12298_s17] sm:$0xff]   ;;  %v9654_v39 = vld [vmem:[%s12298_s17 + $0x48] sm:$0xff]   ;;  %v9657_v15 = vld [vmem:[%s12298_s17 + $0x10] sm:$0xff]  }
 0x66a   :  { %v6363_v43 = vmax.f32 %v6359_v14, 0.0  ;;  %v9656_v14 = vld [vmem:[%s12298_s17 + $0x50] sm:$0xff]  }
 0x66b   :  { %v6364_v38 = vmax.f32 %v6360_v41, 0.0  ;;  %v9658_v41 = vld [vmem:[%s12298_s17 + $0x58] sm:$0xff]  }
 0x66c   :  { %v6397_v55 = vpack.c.bf16 %v6363_v43, %v6361_v42  ;;  %v9659_v42 = vld [vmem:[%s12298_s17 + $0x18] sm:$0xff]   ;;  %v9660_v43 = vld [vmem:[%s12298_s17 + $0x60] sm:$0xff]  }
 0x66d   :  { %v6398_v57 = vpack.c.bf16 %v6364_v38, %v6362_v52  ;;  %v9661_v52 = vld [vmem:[%s12298_s17 + $0x20] sm:$0xff]   ;;  %v9662_v38 = vld [vmem:[%s12298_s17 + $0x68] sm:$0xff]  }
 0x66f   :  { %6603 = vmatprep.mubr.bf16.mxu0 %v6398_v57  ;;  %v9664_v57 = vld [vmem:[%s12298_s17 + $0x70] sm:$0xff]  }
 0x670   :  { %6604 = vmatmul.mubr.bf16.vlgmr.msra.gmra.mrb[16].mxu0 %v6397_v55  ;;  %v9663_v55 = vld [vmem:[%s12298_s17 + $0x28] sm:$0xff]  }
 0x671   :  { %6825 = vmatpush1.bf16.msra.mxu0 %v9604_v60  ;;  %v9665_v60 = vld [vmem:[%s12298_s17 + $0x30] sm:$0xff]  }
 0x672   :  { %6826 = vmatprep.subr.bf16.mxu0 %v9609_v44  ;;  %v9666_v44 = vld [vmem:[%s12298_s17 + $0x78] sm:$0xff]  }
 0x675   :  { %6827 = vmatpush1.bf16.msra.mxu0 %v9607_v45  ;;  %v9667_v45 = vld [vmem:[%s12298_s17 + $0x38] sm:$0xff]  }
 0x676   :  { %6828 = vmatprep.subr.bf16.mxu0 %v9612_v46  ;;  %v6652_v46 = vld [vmem:[%s12300_s16] sm:$0x3] }
 0x679   :  { %6829 = vmatpush1.bf16.msra.mxu0 %v9610_v47  ;;  %v6657_v47 = vrot.slane %v6652_v46, %v10048_v63  ;;  %v8411_v63 = vld [vmem:[%s12301_s18] ss:$0 sm:$0xff] }
 0x67a   :  { %6830 = vmatprep.subr.bf16.mxu0 %v9615_v34  ;;  %v6661_v34 = vrot.slane %v6652_v46, %v10053_v2 }
 0x67d   :  { %6831 = vmatpush1.bf16.msra.mxu0 %v9613_v48 }
 0x67e   :  { %6832 = vmatprep.subr.bf16.mxu0 %v9618_v49 }
 0x681   :  { %6833 = vmatpush1.bf16.msra.mxu0 %v9616_v50 }
 0x682   :  { %6834 = vmatprep.subr.bf16.mxu0 %v9621_v36 }
 0x685   :  { %6835 = vmatpush1.bf16.msra.mxu0 %v9619_v51 }
 0x686   :  { %6836 = vmatprep.subr.bf16.mxu0 %v9624_v37 }
 0x689   :  { %6837 = vmatpush1.bf16.msra.mxu0 %v9622_v53 }
 0x68a   :  { %6838 = vmatprep.subr.bf16.mxu0 %v9627_v54 }
 0x68d   :  { %6839 = vmatpush1.bf16.msra.mxu0 %v9625_v56 }
 0x68e   :  { %6840 = vmatprep.subr.bf16.mxu0 %v9630_v58 }
 0x691   :  { %6841 = vmatpush1.bf16.msra.mxu0 %v9628_v62 }
 0x692   :  { %6842 = vmatprep.subr.bf16.mxu0 %v9633_v0 }
 0x695   :  { %6843 = vmatpush1.bf16.msra.mxu0 %v9631_v3 }
 0x696   :  { %6844 = vmatprep.subr.bf16.mxu0 %v9636_v4 }
 0x699   :  { %6845 = vmatpush1.bf16.msra.mxu0 %v9634_v5 }
 0x69a   :  { %6846 = vmatprep.subr.bf16.mxu0 %v9639_v6 }
 0x69d   :  { %6847 = vmatpush1.bf16.msra.mxu0 %v9637_v7 }
 0x69e   :  { %6848 = vmatprep.subr.bf16.mxu0 %v9642_v8 }
 0x6a1   :  { %6849 = vmatpush1.bf16.msra.mxu0 %v9640_v9 }
 0x6a2   :  { %6850 = vmatprep.subr.bf16.mxu0 %v9645_v10 }
 0x6a5   :  { %6851 = vmatpush1.bf16.msra.mxu0 %v9643_v11  ;;  %v7056_v11 = vand.u32 127, %v572_v61 }
 0x6a6   :  { %6852 = vmatprep.subr.bf16.mxu0 %v9648_v13 }
 0x6a7   :  { %vm7057_vm7 = vcmp.eq.s32.totalorder %v7056_v11, 0 }
 0x6a9   :  { %6853 = vmatpush1.bf16.msra.mxu0 %v9646_v12 }
 0x6aa   :  { %6854 = vmatprep.subr.bf16.mxu0 %v9651_v59 }
 0x6ad   :  { %6855 = vmatpush1.bf16.msra.mxu0 %v9649_v16 }
 0x6ae   :  { %8428 = vmatprep.subr.bf16.mxu0 %v9652_v17 }
 0x743   :  { %v6605_v20 = vpop.f32.mrb[16].mxu0 }
 0x744   :  { %v6606_v21 = vadd.f32 %v6605_v20, %v6404_v18  ;;  %v6607_v22 = vpop.f32.mrb[17].mxu0 }
 0x745   :  { %v6608_v23 = vadd.f32 %v6607_v22, %v6408_v19  ;;  %v6609_v24 = vpop.f32.mrb[18].mxu0 }
 0x746   :  { %v6610_v25 = vadd.f32 %v6609_v24, %v6404_v18  ;;  %v6611_v26 = vpop.f32.mrb[19].mxu0  ;;  %v6614_v28 = vmax.f32 %v6606_v21, 0.0 }
 0x747   :  { %v6612_v27 = vadd.f32 %v6611_v26, %v6408_v19  ;;  %v6615_v30 = vmax.f32 %v6608_v23, 0.0 }
 0x748   :  { %v6616_v29 = vmax.f32 %v6610_v25, 0.0 }
 0x749   :  { %v6617_v31 = vmax.f32 %v6612_v27, 0.0 }
 0x74a   :  { %v6650_v32 = vpack.c.bf16 %v6616_v29, %v6614_v28 }
 0x74b   :  { %v6651_v33 = vpack.c.bf16 %v6617_v31, %v6615_v30 }
 0x74d   :  { %6856 = vmatprep.mubr.bf16.mxu0 %v6651_v33 }
 0x74e   :  { %6857 = vmatmul.mubr.bf16.vlgmr.msra.gmra.mrb[20].mxu0 %v6650_v32 }
 0x74f   :  { %8429 = vmatpush3.bf16.msra.mxu0 %v9653_v35 }
 0x750   :  { %8430 = vmatprep.subr.bf16.mxu0 %v9654_v39 }
 0x753   :  { %8431 = vmatpush3.bf16.msra.mxu0 %v9655_v40 }
 0x754   :  { %8432 = vmatprep.subr.bf16.mxu0 %v9656_v14 }
 0x757   :  { %8433 = vmatpush3.bf16.msra.mxu0 %v9657_v15 }
 0x758   :  { %8434 = vmatprep.subr.bf16.mxu0 %v9658_v41 }
 0x75b   :  { %8435 = vmatpush3.bf16.msra.mxu0 %v9659_v42 }
 0x75c   :  { %8436 = vmatprep.subr.bf16.mxu0 %v9660_v43 }
 0x75f   :  { %8437 = vmatpush3.bf16.msra.mxu0 %v9661_v52 }
 0x760   :  { %8438 = vmatprep.subr.bf16.mxu0 %v9662_v38 }
 0x763   :  { %8439 = vmatpush3.bf16.msra.mxu0 %v9663_v55 }
 0x764   :  { %8440 = vmatprep.subr.bf16.mxu0 %v9664_v57 }
 0x767   :  { %8441 = vmatpush3.bf16.msra.mxu0 %v9665_v60 }
 0x768   :  { %8442 = vmatprep.subr.bf16.mxu0 %v9666_v44 }
 0x76b   :  { %8443 = vmatpush3.bf16.msra.mxu0 %v9667_v45 }
 0x821   :  { %v6858_v48 = vpop.f32.mrb[20].mxu0 }
 0x822   :  { %v6859_v49 = vadd.f32 %v6858_v48, %v6657_v47  ;;  %v6860_v50 = vpop.f32.mrb[21].mxu0 }
 0x823   :  { %v6861_v36 = vadd.f32 %v6860_v50, %v6661_v34  ;;  %v6862_v51 = vpop.f32.mrb[22].mxu0 }
 0x824   :  { %v6863_v37 = vadd.f32 %v6862_v51, %v6657_v47  ;;  %v6864_v53 = vpop.f32.mrb[23].mxu0  ;;  %v6867_v56 = vmax.f32 %v6859_v49, 0.0 }
 0x825   :  { %v6865_v54 = vadd.f32 %v6864_v53, %v6661_v34  ;;  %v6868_v62 = vmax.f32 %v6861_v36, 0.0 }
 0x826   :  { %v6869_v58 = vmax.f32 %v6863_v37, 0.0 }
 0x827   :  { %v6870_v0 = vmax.f32 %v6865_v54, 0.0 }
 0x828   :  { %v6903_v3 = vpack.c.bf16 %v6869_v58, %v6867_v56 }
 0x829   :  { %v6904_v4 = vpack.c.bf16 %v6870_v0, %v6868_v62 }
 0x82b   :  { %7040 = vmatprep.mubr.bf16.mxu0 %v6904_v4 }
 0x82c   :  { %7041 = vmatmul.mubr.bf16.vlgmr.msra.gmra.mrb[24].mxu0 %v6903_v3 }
 0x8ff   :  { %v8444_v5 = vpop.f32.mrb[24].mxu0 }
 0x900   :  { %v8445_v2 = vpop.f32.mrb[25].mxu0 }
 0x901   :  { %v8446_v6 = vadd.f32 %v8445_v2, %v8444_v5  ;;  %v8447_v7 = vpop.f32.mrb[26].mxu0 }
 0x902   :  { %v8448_v8 = vpop.f32.mrb[27].mxu0 }
 0x903   :  { %v7043_v9 = vadd.f32 %v8446_v6, %v8411_v63  ;;  %v8449_v10 = vadd.f32 %v8448_v8, %v8447_v7 }
 0x905   :  { %v7049_v12 = vmax.f32 %v7043_v9, 0.0  ;;  %v7046_v13 = vadd.f32 %v8449_v10, %v8411_v63 }
 0x907   :  { %v7051_v59 = vmax.f32 %v7049_v12, -20.0  ;;  %v7050_v16 = vmax.f32 %v7046_v13, 0.0 }
 0x909   :  { %v7053_v17 = vmin.f32 %v7051_v59, 2.0  ;;  %v7052_v1 = vmax.f32 %v7050_v16, -20.0 }
 0x90b   :  { %v7058_v18 = vsel %vm7057_vm7, %v7043_v9, %v7053_v17  ;;  %v7054_v19 = vmin.f32 %v7052_v1, 2.0 }
 0x90c   :  { %7061 = vst.msk [vmem:[%s12302_s19] sm:$0xff] %vm7060_vm8, %v7058_v18 }
 0x90d   :  { %v7059_v20 = vsel %vm7057_vm7, %v7046_v13, %v7054_v19 }
 0x90e   :  { %7062 = vst.msk [vmem:[%s12302_s19 + $0x8] sm:$0xff] %vm7060_vm8, %v7059_v20 }

</bundles_post_ra>
